<compile_context>
chip_gen: v7x
topology: tpu7x:2x2x1
jax: 0.10.0
libtpu: 0.0.40
codegen_flags: <defaults>
</compile_context>

<pallas_src>
import functools

import jax
import jax.numpy as jnp
from jax import lax
from jax.experimental import pallas as pl
from jax.experimental.pallas import tpu as pltpu


# ----------------------------- kernel bodies --------------------------------
_BMM = (((2,), (1,)), ((0,), (0,)))   # (b,m,k) x (b,k,n) -> (b,m,n)
_BDT = (((2,), (2,)), ((0,), (0,)))   # (b,m,k) x (b,n,k) -> (b,m,n)

_COMPILER_PARAMS = pltpu.CompilerParams(
    dimension_semantics=("parallel",),
    vmem_limit_bytes=32 << 20,
)


def _attn_branch(x_f32, w_cat, b_cat, compute_dtype):
    """One attention branch on a block of slices.

    x_f32: (N, C, L) float32, N per-slice (C, L) matrices.
    w_cat: (4C, C) rows = [Wg; Wa; Wb; Wo] (Conv1d k=1 + BN folded).
    b_cat: (4C, 1).  Returns float32 (N, C, L).
    """
    n, c, l = x_f32.shape
    c3 = 3 * c
    xc = x_f32.astype(compute_dtype)
    wc = w_cat.astype(compute_dtype)
    b32 = b_cat.astype(jnp.float32)

    # Hoisted once per kernel invocation (no per-iteration re-broadcast).
    w_qkv = jnp.broadcast_to(wc[None, :c3, :], (n, c3, c))   # (N, 3C, C)
    w_out = jnp.broadcast_to(wc[None, c3:, :], (n, c, c))    # (N, C, C)
    b_qkv = b32[None, :c3, :]                                 # (1, 3C, 1)
    b_out = b32[None, c3:, :]                                 # (1, C, 1)

    # Fused Q/K/V projection: one batched matmul, sublane-aligned slices.
    qkv = lax.dot_general(w_qkv, xc, _BMM,
                          preferred_element_type=jnp.float32) + b_qkv   # (N,3C,L)
    q = qkv[:, :c, :]
    k = qkv[:, c:2 * c, :]
    v = qkv[:, 2 * c:, :]

    # Channel-channel attention, softmax over last dim (no 1/sqrt scale,
    # matching the PyTorch module).  Softmax math stays f32; normalization is
    # exact (perf review: approx reciprocal is off the critical path anyway).
    s = lax.dot_general(q.astype(compute_dtype), k.astype(compute_dtype), _BDT,
                        preferred_element_type=jnp.float32)             # (N,C,C)
    s = s - jnp.max(s, axis=-1, keepdims=True)
    e = jnp.exp(s)
    a = e / jnp.sum(e, axis=-1, keepdims=True)

    xo = lax.dot_general(a.astype(compute_dtype), v.astype(compute_dtype), _BMM,
                         preferred_element_type=jnp.float32)             # (N,C,L)
    o = lax.dot_general(w_out, xo.astype(compute_dtype), _BMM,
                        preferred_element_type=jnp.float32) + b_out      # (N,C,L)
    return o


def _fused_kernel(t_ref, f_ref, w_ref, b_ref, out_ref, *, compute_dtype):
    """Both branches + residual for one batch slab (only valid when W == J,
    where the t-view and f-view blocks share shape and flat element order)."""
    t = t_ref[...].astype(jnp.float32)
    f = f_ref[...].astype(jnp.float32)
    w_cat = w_ref[...]
    b_cat = b_ref[...]
    y_t = _attn_branch(t, w_cat, b_cat, compute_dtype)
    y_f = _attn_branch(f, w_cat, b_cat, compute_dtype)
    # Same shape & flat order -> residual sum is a plain elementwise add.
    out_ref[...] = (y_t + y_f + t).astype(out_ref.dtype)


def _t_branch_kernel(x_ref, w_ref, b_ref, out_ref, *, compute_dtype):
    # t-branch: residual is the kernel's own input slab (t IS x in t-layout).
    x = x_ref[...].astype(jnp.float32)
    y = _attn_branch(x, w_ref[...], b_ref[...], compute_dtype)
    out_ref[...] = (y + x).astype(out_ref.dtype)


def _f_branch_kernel(x_ref, res_ref, w_ref, b_ref, out_ref, *, compute_dtype):
    # f-branch: residual is the (free bitcast-reshaped) t-branch result.
    x = x_ref[...].astype(jnp.float32)
    y = _attn_branch(x, w_ref[...], b_ref[...], compute_dtype)
    out_ref[...] = (y + res_ref[...].astype(jnp.float32)).astype(out_ref.dtype)


# ----------------------------- block sizing ----------------------------------
def _padded_rows_bytes(rows, c, l, itemsize):
    """VMEM footprint of `rows` (C, L) matrices with (8, 128) tile padding."""
    c_pad = -(-c // 8) * 8
    l_pad = -(-l // 128) * 128
    return rows * c_pad * l_pad * itemsize


def _pick_batch_block(batch, per_batch_bytes, budget_bytes=2 << 20):
    """Largest divisor of `batch` whose per-step I/O blocks fit the VMEM budget
    while keeping the grid length >= 2 (both v7x TensorCores get work and the
    software pipeline has >1 step); single-TC parts just see fewer, bigger
    steps which is what they want."""
    required_grid = min(2, batch)
    best = 1
    for d in range(1, batch + 1):
        if batch % d:
            continue
        if d * per_batch_bytes > budget_bytes:
            continue
        if batch // d >= required_grid:
            best = d
    return best


# ----------------------------- pallas_call wrappers --------------------------
def _fused_forward(t3, f3, w_cat, b_cat, batch, w_sz, j_sz, compute_dtype):
    c = t3.shape[1]
    cc = w_cat.shape[0]
    itemsize = t3.dtype.itemsize
    per_b = (2 * _padded_rows_bytes(w_sz, c, j_sz, itemsize)   # t block + out block
             + _padded_rows_bytes(j_sz, c, w_sz, itemsize))    # f block
    bb = _pick_batch_block(batch, per_b)
    grid = (batch // bb,)

    t_spec = pl.BlockSpec((bb * w_sz, c, j_sz), lambda i: (i, 0, 0))
    f_spec = pl.BlockSpec((bb * j_sz, c, w_sz), lambda i: (i, 0, 0))
    w_spec = pl.BlockSpec((cc, c), lambda i: (0, 0))
    b_spec = pl.BlockSpec((cc, 1), lambda i: (0, 0))

    kernel = functools.partial(_fused_kernel, compute_dtype=compute_dtype)
    return pl.pallas_call(
        kernel,
        out_shape=jax.ShapeDtypeStruct(t3.shape, t3.dtype),
        grid=grid,
        in_specs=[t_spec, f_spec, w_spec, b_spec],
        out_specs=t_spec,
        compiler_params=_COMPILER_PARAMS,
    )(t3, f3, w_cat, b_cat)


def _branch_forward(x3, res3, w_cat, b_cat, batch, slices_per_b, compute_dtype):
    """x3: (batch*slices_per_b, C, L).  res3: same-shape residual, or None to
    add x3 itself."""
    _, c, l = x3.shape
    cc = w_cat.shape[0]
    itemsize = x3.dtype.itemsize
    n_io = 2 if res3 is None else 3
    per_b = n_io * _padded_rows_bytes(slices_per_b, c, l, itemsize)
    bb = _pick_batch_block(batch, per_b)
    grid = (batch // bb,)

    data_spec = pl.BlockSpec((bb * slices_per_b, c, l), lambda i: (i, 0, 0))
    w_spec = pl.BlockSpec((cc, c), lambda i: (0, 0))
    b_spec = pl.BlockSpec((cc, 1), lambda i: (0, 0))
    out_shape = jax.ShapeDtypeStruct(x3.shape, x3.dtype)

    if res3 is None:
        kernel = functools.partial(_t_branch_kernel, compute_dtype=compute_dtype)
        return pl.pallas_call(
            kernel, out_shape=out_shape, grid=grid,
            in_specs=[data_spec, w_spec, b_spec], out_specs=data_spec,
            compiler_params=_COMPILER_PARAMS,
        )(x3, w_cat, b_cat)

    kernel = functools.partial(_f_branch_kernel, compute_dtype=compute_dtype)
    return pl.pallas_call(
        kernel, out_shape=out_shape, grid=grid,
        in_specs=[data_spec, data_spec, w_spec, b_spec], out_specs=data_spec,
        compiler_params=_COMPILER_PARAMS,
    )(x3, res3, w_cat, b_cat)


def multi_head_cross_attention(x, w_cat, b_cat, *, compute_dtype=None):
    """x: (B, C, W, J). w_cat: (4C, C) = [Wg;Wa;Wb;Wo] folded. b_cat: (4C, 1).
    compute_dtype: dtype fed to the MXU dots (e.g. jnp.bfloat16); accumulation
    and softmax stay f32.  Defaults to x.dtype."""
    b, c, w, j = x.shape
    if compute_dtype is None:
        compute_dtype = x.dtype
    # Raw row-major reshapes, identical to torch.reshape on contiguous x (free).
    t3 = x.reshape(b * w, c, j)
    f3 = x.reshape(b * j, c, w)

    if w == j:
        # Single fused pass over batch slabs: both views loaded per step, both
        # branches + residual computed in VMEM, one write.
        y = _fused_forward(t3, f3, w_cat, b_cat, b, w, j, compute_dtype)
    else:
        # TODO(synk): fusing the two branches for W != J needs an in-kernel
        # cross-layout ((N,C,W)->(N',C,J)) reshape; not relied upon here, so
        # fall back to two chained kernels with residuals fused in.
        y_t = _branch_forward(t3, None, w_cat, b_cat, b, w, compute_dtype)
        y = _branch_forward(f3, y_t.reshape(b * j, c, w), w_cat, b_cat,
                            b, j, compute_dtype)
    return y.reshape(b, c, w, j)


# ----------------------------- param folding ---------------------------------
def fold_conv_bn(conv_w, conv_b, gamma, beta, mean, var, eps=1e-5):
    """Fold Conv1d(k=1) + BatchNorm1d(eval) into (W_eff (C,C), b_eff (C,1))."""
    scale = gamma / jnp.sqrt(var + eps)
    w_eff = scale[:, None] * conv_w
    b_eff = scale * (conv_b - mean) + beta
    return w_eff, b_eff[:, None]


def pack_params(pg, pa, pb, po):
    w_cat = jnp.concatenate([pg[0], pa[0], pb[0], po[0]], axis=0)   # (4C, C)
    b_cat = jnp.concatenate([pg[1], pa[1], pb[1], po[1]], axis=0)   # (4C, 1)
    return w_cat, b_cat


# ----------------------------- reference (plain JAX) -------------------------
def _ref_branch(x3, wq, bq, wk, bk, wv, bv, wo, bo):
    q = jnp.einsum('oc,ncl->nol', wq, x3) + bq[None]
    k = jnp.einsum('oc,ncl->nol', wk, x3) + bk[None]
    v = jnp.einsum('oc,ncl->nol', wv, x3) + bv[None]
    s = jnp.einsum('ncl,ndl->ncd', q, k)
    a = jax.nn.softmax(s, axis=-1)
    xo = jnp.einsum('ncd,ndl->ncl', a, v)
    return jnp.einsum('oc,ncl->nol', wo, xo) + bo[None]


def _ref_forward(x, pg, pa, pb, po):
    b, c, w, j = x.shape
    t = x.reshape(b * w, c, j)
    f = x.reshape(b * j, c, w)
    args = (*pg, *pa, *pb, *po)
    x_t = _ref_branch(t, *args)
    x_f = _ref_branch(f, *args)
    return x_t.reshape(b, c, w, j) + x_f.reshape(b, c, w, j) + x


# ----------------------------------------------------------------------------
def make_layer_params(key, c):
    ks = jax.random.split(key, 6)
    conv_w = jax.random.normal(ks[0], (c, c), jnp.float32) * 0.2
    conv_b = jax.random.normal(ks[1], (c,), jnp.float32) * 0.1
    gamma = 1.0 + 0.1 * jax.random.normal(ks[2], (c,), jnp.float32)
    beta = 0.1 * jax.random.normal(ks[3], (c,), jnp.float32)
    mean = 0.1 * jax.random.normal(ks[4], (c,), jnp.float32)
    var = 0.5 + jax.random.uniform(ks[5], (c,), jnp.float32)
    return fold_conv_bn(conv_w, conv_b, gamma, beta, mean, var)


if __name__ == "__main__":
    key = jax.random.PRNGKey(0)
    kx1, kx2, kg, ka, kb, ko = jax.random.split(key, 6)
    c = 8                                                # dim1 == C

    pg = make_layer_params(kg, c)
    pa = make_layer_params(ka, c)
    pb = make_layer_params(kb, c)
    po = make_layer_params(ko, c)
    w_cat, b_cat = pack_params(pg, pa, pb, po)

    fwd = jax.jit(multi_head_cross_attention, static_argnames=("compute_dtype",))

    # Case 1: W == J -> single fused pallas_call (f32 MXU operands).
    x1 = jax.random.normal(kx1, (2, c, 16, 16), jnp.float32)
    out1 = jax.block_until_ready(fwd(x1, w_cat, b_cat, compute_dtype=jnp.float32))
    ref1 = _ref_forward(x1, pg, pa, pb, po)
    assert out1.shape == x1.shape
    assert jnp.allclose(out1, ref1, atol=5e-3, rtol=5e-3), "fused f32 mismatch"

    # Case 2: W != J -> two chained branch kernels (f32 MXU operands).
    x2 = jax.random.normal(kx2, (2, c, 16, 32), jnp.float32)
    out2 = jax.block_until_ready(fwd(x2, w_cat, b_cat, compute_dtype=jnp.float32))
    ref2 = _ref_forward(x2, pg, pa, pb, po)
    assert out2.shape == x2.shape
    assert jnp.allclose(out2, ref2, atol=5e-3, rtol=5e-3), "two-pass f32 mismatch"

    # Case 3: bf16 MXU operands (fast path on v6e/v7x); softmax stays f32.
    out3 = jax.block_until_ready(fwd(x1, w_cat, b_cat, compute_dtype=jnp.bfloat16))
    assert jnp.allclose(out3, ref1, atol=5e-2, rtol=5e-2), "fused bf16 mismatch"

    print("KERNEL_OK")
</pallas_src>

<mosaic_0001>
module attributes {stable_mosaic.version = 11 : i64} {
  func.func @_fused_kernel(%arg0: i32, %arg1: memref<16x8x16xf32, #tpu.memory_space<vmem>>, %arg2: memref<16x8x16xf32, #tpu.memory_space<vmem>>, %arg3: memref<32x8xf32, #tpu.memory_space<vmem>>, %arg4: memref<32x1xf32, #tpu.memory_space<vmem>>, %arg5: memref<16x8x16xf32, #tpu.memory_space<vmem>>) attributes {dimension_semantics = [#tpu.dimension_semantics<parallel>], iteration_bounds = array<i64: 2>, scalar_prefetch = 0 : i64, scratch_operands = 0 : i64, tpu.core_type = #tpu.core_type<tc>, window_params = [{transform_indices = @transform_0, window_bounds = array<i64: 16, 8, 16>}, {transform_indices = @transform_1, window_bounds = array<i64: 16, 8, 16>}, {pipeline_mode = #tpu.pipeline_mode<synchronous>, transform_indices = @transform_2, window_bounds = array<i64: 32, 8>}, {pipeline_mode = #tpu.pipeline_mode<synchronous>, transform_indices = @transform_3, window_bounds = array<i64: 32, 1>}, {transform_indices = @transform_4, window_bounds = array<i64: 16, 8, 16>}]} {
    %c0 = arith.constant 0 : index
    %c0_0 = arith.constant 0 : index
    %c0_1 = arith.constant 0 : index
    %0 = vector.load %arg1[%c0, %c0_0, %c0_1] : memref<16x8x16xf32, #tpu.memory_space<vmem>>, vector<16x8x16xf32>
    %c0_2 = arith.constant 0 : index
    %c0_3 = arith.constant 0 : index
    %c0_4 = arith.constant 0 : index
    %1 = vector.load %arg2[%c0_2, %c0_3, %c0_4] : memref<16x8x16xf32, #tpu.memory_space<vmem>>, vector<16x8x16xf32>
    %c0_5 = arith.constant 0 : index
    %c0_6 = arith.constant 0 : index
    %2 = vector.load %arg3[%c0_5, %c0_6] : memref<32x8xf32, #tpu.memory_space<vmem>>, vector<32x8xf32>
    %c0_7 = arith.constant 0 : index
    %c0_8 = arith.constant 0 : index
    %3 = vector.load %arg4[%c0_7, %c0_8] : memref<32x1xf32, #tpu.memory_space<vmem>>, vector<32x1xf32>
    %4 = vector.extract_strided_slice %2 {offsets = [0, 0], sizes = [24, 8], strides = [1, 1]} : vector<32x8xf32> to vector<24x8xf32>
    %5 = vector.shape_cast %4 : vector<24x8xf32> to vector<1x24x8xf32>
    %6 = vector.shape_cast %5 : vector<1x24x8xf32> to vector<1x24x8xf32>
    %7 = vector.broadcast %6 : vector<1x24x8xf32> to vector<16x24x8xf32>
    %8 = vector.extract_strided_slice %2 {offsets = [24, 0], sizes = [8, 8], strides = [1, 1]} : vector<32x8xf32> to vector<8x8xf32>
    %9 = vector.shape_cast %8 : vector<8x8xf32> to vector<1x8x8xf32>
    %10 = vector.shape_cast %9 : vector<1x8x8xf32> to vector<1x8x8xf32>
    %11 = vector.broadcast %10 : vector<1x8x8xf32> to vector<16x8x8xf32>
    %12 = vector.extract_strided_slice %3 {offsets = [0, 0], sizes = [24, 1], strides = [1, 1]} : vector<32x1xf32> to vector<24x1xf32>
    %13 = vector.shape_cast %12 : vector<24x1xf32> to vector<1x24x1xf32>
    %14 = vector.extract_strided_slice %3 {offsets = [24, 0], sizes = [8, 1], strides = [1, 1]} : vector<32x1xf32> to vector<8x1xf32>
    %15 = vector.shape_cast %14 : vector<8x1xf32> to vector<1x8x1xf32>
    %cst = arith.constant dense<0.000000e+00> : vector<16x24x16xf32>
    %16 = tpu.matmul %7, %0, %cst {dimension_numbers = #tpu.dot_dimension_numbers<[2], [1], [1], [2], [0, 0, 0, 1, 1, 2], [0], [0]>} : vector<16x24x8xf32>, vector<16x8x16xf32>, vector<16x24x16xf32> -> vector<16x24x16xf32>
    %17 = vector.broadcast %13 : vector<1x24x1xf32> to vector<16x24x16xf32>
    %18 = arith.addf %16, %17 : vector<16x24x16xf32>
    %19 = vector.extract_strided_slice %18 {offsets = [0, 0, 0], sizes = [16, 8, 16], strides = [1, 1, 1]} : vector<16x24x16xf32> to vector<16x8x16xf32>
    %20 = vector.extract_strided_slice %18 {offsets = [0, 8, 0], sizes = [16, 8, 16], strides = [1, 1, 1]} : vector<16x24x16xf32> to vector<16x8x16xf32>
    %21 = vector.extract_strided_slice %18 {offsets = [0, 16, 0], sizes = [16, 8, 16], strides = [1, 1, 1]} : vector<16x24x16xf32> to vector<16x8x16xf32>
    %cst_9 = arith.constant dense<0.000000e+00> : vector<16x8x8xf32>
    %22 = tpu.matmul %19, %20, %cst_9 {dimension_numbers = #tpu.dot_dimension_numbers<[2], [2], [1], [1], [0, 0, 0, 1, 1, 1], [0], [0]>} : vector<16x8x16xf32>, vector<16x8x16xf32>, vector<16x8x8xf32> -> vector<16x8x8xf32>
    %cst_10 = arith.constant dense<0xFF800000> : vector<16x8xf32>
    %23 = vector.multi_reduction <maximumf>, %22, %cst_10 [2] : vector<16x8x8xf32> to vector<16x8xf32>
    %24 = vector.shape_cast %23 : vector<16x8xf32> to vector<16x8x1xf32>
    %25 = vector.broadcast %24 : vector<16x8x1xf32> to vector<16x8x8xf32>
    %26 = arith.subf %22, %25 : vector<16x8x8xf32>
    %27 = math.exp %26 : vector<16x8x8xf32>
    %cst_11 = arith.constant dense<0.000000e+00> : vector<16x8xf32>
    %28 = vector.multi_reduction <add>, %27, %cst_11 [2] : vector<16x8x8xf32> to vector<16x8xf32>
    %29 = vector.shape_cast %28 : vector<16x8xf32> to vector<16x8x1xf32>
    %30 = vector.broadcast %29 : vector<16x8x1xf32> to vector<16x8x8xf32>
    %31 = arith.divf %27, %30 : vector<16x8x8xf32>
    %cst_12 = arith.constant dense<0.000000e+00> : vector<16x8x16xf32>
    %32 = tpu.matmul %31, %21, %cst_12 {dimension_numbers = #tpu.dot_dimension_numbers<[2], [1], [1], [2], [0, 0, 0, 1, 1, 2], [0], [0]>} : vector<16x8x8xf32>, vector<16x8x16xf32>, vector<16x8x16xf32> -> vector<16x8x16xf32>
    %cst_13 = arith.constant dense<0.000000e+00> : vector<16x8x16xf32>
    %33 = tpu.matmul %11, %32, %cst_13 {dimension_numbers = #tpu.dot_dimension_numbers<[2], [1], [1], [2], [0, 0, 0, 1, 1, 2], [0], [0]>} : vector<16x8x8xf32>, vector<16x8x16xf32>, vector<16x8x16xf32> -> vector<16x8x16xf32>
    %34 = vector.broadcast %15 : vector<1x8x1xf32> to vector<16x8x16xf32>
    %35 = arith.addf %33, %34 : vector<16x8x16xf32>
    %36 = vector.extract_strided_slice %2 {offsets = [0, 0], sizes = [24, 8], strides = [1, 1]} : vector<32x8xf32> to vector<24x8xf32>
    %37 = vector.shape_cast %36 : vector<24x8xf32> to vector<1x24x8xf32>
    %38 = vector.shape_cast %37 : vector<1x24x8xf32> to vector<1x24x8xf32>
    %39 = vector.broadcast %38 : vector<1x24x8xf32> to vector<16x24x8xf32>
    %40 = vector.extract_strided_slice %2 {offsets = [24, 0], sizes = [8, 8], strides = [1, 1]} : vector<32x8xf32> to vector<8x8xf32>
    %41 = vector.shape_cast %40 : vector<8x8xf32> to vector<1x8x8xf32>
    %42 = vector.shape_cast %41 : vector<1x8x8xf32> to vector<1x8x8xf32>
    %43 = vector.broadcast %42 : vector<1x8x8xf32> to vector<16x8x8xf32>
    %44 = vector.extract_strided_slice %3 {offsets = [0, 0], sizes = [24, 1], strides = [1, 1]} : vector<32x1xf32> to vector<24x1xf32>
    %45 = vector.shape_cast %44 : vector<24x1xf32> to vector<1x24x1xf32>
    %46 = vector.extract_strided_slice %3 {offsets = [24, 0], sizes = [8, 1], strides = [1, 1]} : vector<32x1xf32> to vector<8x1xf32>
    %47 = vector.shape_cast %46 : vector<8x1xf32> to vector<1x8x1xf32>
    %cst_14 = arith.constant dense<0.000000e+00> : vector<16x24x16xf32>
    %48 = tpu.matmul %39, %1, %cst_14 {dimension_numbers = #tpu.dot_dimension_numbers<[2], [1], [1], [2], [0, 0, 0, 1, 1, 2], [0], [0]>} : vector<16x24x8xf32>, vector<16x8x16xf32>, vector<16x24x16xf32> -> vector<16x24x16xf32>
    %49 = vector.broadcast %45 : vector<1x24x1xf32> to vector<16x24x16xf32>
    %50 = arith.addf %48, %49 : vector<16x24x16xf32>
    %51 = vector.extract_strided_slice %50 {offsets = [0, 0, 0], sizes = [16, 8, 16], strides = [1, 1, 1]} : vector<16x24x16xf32> to vector<16x8x16xf32>
    %52 = vector.extract_strided_slice %50 {offsets = [0, 8, 0], sizes = [16, 8, 16], strides = [1, 1, 1]} : vector<16x24x16xf32> to vector<16x8x16xf32>
    %53 = vector.extract_strided_slice %50 {offsets = [0, 16, 0], sizes = [16, 8, 16], strides = [1, 1, 1]} : vector<16x24x16xf32> to vector<16x8x16xf32>
    %cst_15 = arith.constant dense<0.000000e+00> : vector<16x8x8xf32>
    %54 = tpu.matmul %51, %52, %cst_15 {dimension_numbers = #tpu.dot_dimension_numbers<[2], [2], [1], [1], [0, 0, 0, 1, 1, 1], [0], [0]>} : vector<16x8x16xf32>, vector<16x8x16xf32>, vector<16x8x8xf32> -> vector<16x8x8xf32>
    %cst_16 = arith.constant dense<0xFF800000> : vector<16x8xf32>
    %55 = vector.multi_reduction <maximumf>, %54, %cst_16 [2] : vector<16x8x8xf32> to vector<16x8xf32>
    %56 = vector.shape_cast %55 : vector<16x8xf32> to vector<16x8x1xf32>
    %57 = vector.broadcast %56 : vector<16x8x1xf32> to vector<16x8x8xf32>
    %58 = arith.subf %54, %57 : vector<16x8x8xf32>
    %59 = math.exp %58 : vector<16x8x8xf32>
    %cst_17 = arith.constant dense<0.000000e+00> : vector<16x8xf32>
    %60 = vector.multi_reduction <add>, %59, %cst_17 [2] : vector<16x8x8xf32> to vector<16x8xf32>
    %61 = vector.shape_cast %60 : vector<16x8xf32> to vector<16x8x1xf32>
    %62 = vector.broadcast %61 : vector<16x8x1xf32> to vector<16x8x8xf32>
    %63 = arith.divf %59, %62 : vector<16x8x8xf32>
    %cst_18 = arith.constant dense<0.000000e+00> : vector<16x8x16xf32>
    %64 = tpu.matmul %63, %53, %cst_18 {dimension_numbers = #tpu.dot_dimension_numbers<[2], [1], [1], [2], [0, 0, 0, 1, 1, 2], [0], [0]>} : vector<16x8x8xf32>, vector<16x8x16xf32>, vector<16x8x16xf32> -> vector<16x8x16xf32>
    %cst_19 = arith.constant dense<0.000000e+00> : vector<16x8x16xf32>
    %65 = tpu.matmul %43, %64, %cst_19 {dimension_numbers = #tpu.dot_dimension_numbers<[2], [1], [1], [2], [0, 0, 0, 1, 1, 2], [0], [0]>} : vector<16x8x8xf32>, vector<16x8x16xf32>, vector<16x8x16xf32> -> vector<16x8x16xf32>
    %66 = vector.broadcast %47 : vector<1x8x1xf32> to vector<16x8x16xf32>
    %67 = arith.addf %65, %66 : vector<16x8x16xf32>
    %68 = arith.addf %35, %67 : vector<16x8x16xf32>
    %69 = arith.addf %68, %0 : vector<16x8x16xf32>
    %c0_20 = arith.constant 0 : index
    %c0_21 = arith.constant 0 : index
    %c0_22 = arith.constant 0 : index
    %70 = vector.load %arg5[%c0_20, %c0_21, %c0_22] : memref<16x8x16xf32, #tpu.memory_space<vmem>>, vector<16x8x16xf32>
    tpu.vector_store %arg5[%c0_20, %c0_21, %c0_22], %69 {strides = array<i32>} : memref<16x8x16xf32, #tpu.memory_space<vmem>>, vector<16x8x16xf32>,
    return
  }
  func.func @transform_0(%arg0: i32) -> (i32, i32, i32) {
    %c0_i32 = arith.constant 0 : i32
    %c0_i32_0 = arith.constant 0 : i32
    %c0_i32_1 = arith.constant 0 : i32
    return %arg0, %c0_i32, %c0_i32_0 : i32, i32, i32
  }
  func.func @transform_1(%arg0: i32) -> (i32, i32, i32) {
    %c0_i32 = arith.constant 0 : i32
    %c0_i32_0 = arith.constant 0 : i32
    %c0_i32_1 = arith.constant 0 : i32
    return %arg0, %c0_i32, %c0_i32_0 : i32, i32, i32
  }
  func.func @transform_2(%arg0: i32) -> (i32, i32) {
    %c0_i32 = arith.constant 0 : i32
    %c0_i32_0 = arith.constant 0 : i32
    %c0_i32_1 = arith.constant 0 : i32
    return %c0_i32, %c0_i32_0 : i32, i32
  }
  func.func @transform_3(%arg0: i32) -> (i32, i32) {
    %c0_i32 = arith.constant 0 : i32
    %c0_i32_0 = arith.constant 0 : i32
    %c0_i32_1 = arith.constant 0 : i32
    return %c0_i32, %c0_i32_0 : i32, i32
  }
  func.func @transform_4(%arg0: i32) -> (i32, i32, i32) {
    %c0_i32 = arith.constant 0 : i32
    %c0_i32_0 = arith.constant 0 : i32
    %c0_i32_1 = arith.constant 0 : i32
    return %arg0, %c0_i32, %c0_i32_0 : i32, i32, i32
  }
}

</mosaic_0001>

<bundles_post_ra>
// kernel: multi_head_cross_attention.1
= control target key start
LH: loop header
LB: loop body
LE: loop exit
PB: predicated region body
PF: predicated region fallthrough
CT: control target
= control target key end

     0   :  { %9 = vsyncpa [#allocation3], 0  ;;  %s14010_s0 = inlined_call_operand.hbm [shape: f32[32,8,16], index: 0, kind: input, shape index: {}, may-alias: {0,1}]   ;;  %s14011_s1 = inlined_call_operand.hbm [shape: f32[32,8,16], index: 1, kind: input, shape index: {}, may-alias: {0,1}]   ;;  %s14012_s2 = inlined_call_operand.vmem [shape: f32[32,8], index: 2, kind: input, shape index: {}]   ;;  %s14013_s3 = inlined_call_operand.vmem [shape: f32[32,1], index: 3, kind: input, shape index: {}]   ;;  %s14014_s4 = inlined_call_operand.hbm [shape: f32[32,8,16], index: 4, kind: output, shape index: {}]  }
   0x1   :  { %11 = vsyncpa [#allocation3 + $0x1], 0 }
   0x2   :  { %12 = vsyncpa [#allocation6], 0 }
   0x3   :  { %14 = vsyncpa [#allocation6 + $0x1], 0 }
   0x4   :  { %15 = vsyncpa [#allocation4], 0 }
   0x5   :  { %17 = vsyncpa [#allocation4 + $0x1], 0  ;;  %s12183_s15 = smov 0   ;;  %s12185_s16 = smov 0  }
   0x6   :  { %s12187_s17 = smov 0   ;;  %s12189_s18 = smov 0  }
   0x7 LB: > { %s12204_s19 = sadd.s32 4294967295, %s12146_s18   ;;  %s10411_s20 = sadd.s32 4294967294, %s12146_s18   ;;  %s12146_s18 = sphi %s12189_s18, %s14030_s18   ;;  %s12142_s17 = sphi %s12187_s17, %s14029_s17   ;;  %s12138_s16 = sphi %s12185_s16, %s14028_s16   ;;  %s12134_s15 = sphi %s12183_s15, %s14027_s15  }
   0x8   : > { %s12208_s21 = sadd.s32 1, %s12146_s18   ;;  %s30_s22 = sadd.s32 1, %s12142_s17 }
   0x9   : > { %s27_s23 = ssub.s32 %s12146_s18, %s12208_s21  ;;  %p37_p0 = scmp.ne.s32.totalorder %s12142_s17, %s12138_s16 }
   0xa   : > { %p28_p1 = scmp.eq.s32.totalorder %s27_s23, 0  ;;  %p38_p2 = scmp.eq.s32.totalorder %s12146_s18, 0 }
   0xb   : > { %p43_p3 = scmp.ne.s32.totalorder %s12138_s16, %s12134_s15  ;;  %p44_p4 = scmp.eq.s32.totalorder %s12204_s19, 0 }
   0xc   : > { %s12220_s24 = scalar_select %p28_p1, %s12142_s17, %s30_s22  }
   0xd   : > { %p12222_p5 = por %p38_p2, %p37_p0  ;;  %p12226_p6 = por %p44_p4, %p43_p3 }
   0xe   : > { %p135_p7 = scmp.eq.s32.totalorder %s12204_s19, 1  ;;  %p141_p8 = scmp.eq.s32.totalorder %s10411_s20, 1 }
   0xf   : > { %s14018_s26 = scalar_select %p12226_p6, 1, 0 }
  0x10   : > { %p11825_p10 = scmp.lt.s32.totalorder %s12146_s18, 2  ;;  %p12233_p11 = por %p135_p7, %p37_p0 }
  0x11   : > { %p12237_p12 = por %p141_p8, %p43_p3  ;;  %s12242_s29 = sand.u32 1, %s12142_s17  }
  0x12   : > { %s14019_s27 = scalar_select %p12233_p11, 1, 0 }
  0x13   : > { %s14020_s28 = scalar_select %p12237_p12, 1, 0 }
  0x14   : > { %s10653_s30 = sshll.u32 %s12146_s18, 11  ;;  %s10414_s5 = sshll.u32 %s12242_s29, 7 }
  0x15   : > { %s12251_s8 = scalar_lea.hbm %s14010_s0, %s10653_s30  ;;  %s171_s9 = scalar_lea.vmem [#allocation2], %s10414_s5 }
  0x16   : > { %s178_s10 = sshll.u32 %s171_s9, 4  ;;  %p12257_p13 = pnand %p11825_p10, %p12222_p5  ;;  %s12261_s10 = int_to_ptr.vmem [resolvable:$true] %s178_s10 }
  0x17   : > { %s168_s12 = scalar_lea.sflag [#allocation3], %s12242_s29  ;;  %s12016_s13 = scalar_lea.hbm %s12251_s8, 2048 }
  0x18   : > { %p12017_p0 = scmp.ne.s32.totalorder %s12251_s8, %s12016_s13  ;;  %p12018_p1 = pneg %p12257_p13 }
  0x19   : > { %s12021_s22 = scalar_lea.hbm %s14010_s0, 4096  ;;  %p12022_p4 = scmp.lt.u32.totalorder %s12251_s8, %s14010_s0 }
  0x1a   : > { %p12019_p2 = pnand %p12018_p1, %p12017_p0  ;;  %p12023_p5 = scmp.lt.u32.totalorder %s12021_s22, %s12016_s13 }
  0x1b   : > { %p12025_p8 = scmp.lt.u32.totalorder %s12016_s13, %s12251_s8 }
  0x1c   : > { %p12020_p3 = pneg %p12019_p2  ;;  %p12024_p7 = por %p12023_p5, %p12022_p4 }
  0x1e   : > { %p12026_p10 = por %p12025_p8, %p12024_p7 }
  0x20   : > { %p12027_p9 = pnand %p12026_p10, %p12020_p3 }
  0x22   : > { %12030 = shalt.err (!%p12027_p9)
}
  0x23   : > { %s12031_s6 = scalar_lea.vmem %s12261_s10, 2048  ;;  %s12148_s7 = smov [#allocation2]  }
  0x24   : > { %p12032_p0 = scmp.ne.s32.totalorder %s12261_s10, %s12031_s6  ;;  %s12036_s9 = sshll.u32 %s12148_s7, 4  ;;  %s12037_s9 = int_to_ptr.vmem [resolvable:$false] %s12036_s9 }
  0x25   : > { %s12038_s14 = scalar_lea.vmem %s12037_s9, 4096  ;;  %p12039_p11 = scmp.lt.s32.totalorder %s12261_s10, %s12037_s9 }
  0x26   : > { %p12034_p2 = pnand %p12032_p0, %p12018_p1  ;;  %p12040_p4 = scmp.lt.s32.totalorder %s12038_s14, %s12031_s6 }
  0x28   : > { %p12035_p12 = pneg %p12034_p2  ;;  %p12041_p5 = por %p12040_p4, %p12039_p11 }
  0x2a   : > { %p12042_p7 = pnand %p12041_p5, %p12035_p12 }
  0x2c   : > { %12045 = shalt.err (!%p12042_p7)
}
  0x2d   : > { %s12149_s13 = smov 128   ;;  %s12150_s20 = smov 8  }
  0x2e   : > { %11817 = dma.hbm_to_vmem [thread:$0]  (!%p12257_p13), %s12251_s8, 2048, %s12261_s10, %s168_s12, %s12149_s13, %s12149_s13, %s12150_s20  }
  0x2f   : > { %p10420_p9 = scmp.ge.s32.totalorder %s12146_s18, 1  ;;  %p207_p11 = scmp.lt.s32.totalorder %s12146_s18, 3 }
  0x30   : > { %s12305_s6 = scalar_lea.hbm %s14011_s1, %s10653_s30  ;;  %s192_s7 = scalar_lea.vmem [#allocation5], %s10414_s5 }
  0x31   : > { %p12296_p12 = pnand %p10420_p9, %p207_p11  ;;  %s199_s9 = sshll.u32 %s192_s7, 4  ;;  %s12309_s9 = int_to_ptr.vmem [resolvable:$true] %s199_s9 }
  0x32   : > { %s189_s8 = scalar_lea.sflag [#allocation6], %s12242_s29  ;;  %s12046_s10 = scalar_lea.hbm %s12305_s6, 2048 }
  0x33   : > { %p12047_p3 = scmp.ne.s32.totalorder %s12305_s6, %s12046_s10  ;;  %s12051_s30 = scalar_lea.hbm %s14011_s1, 4096 }
  0x34   : > { %p12052_p0 = scmp.lt.u32.totalorder %s12305_s6, %s14011_s1  ;;  %p12053_p2 = scmp.lt.u32.totalorder %s12051_s30, %s12046_s10 }
  0x35   : > { %p12049_p8 = pnand %p12047_p3, %p12018_p1  ;;  %p12055_p5 = scmp.lt.u32.totalorder %s12046_s10, %s12305_s6 }
  0x36   : > { %p12054_p4 = por %p12053_p2, %p12052_p0 }
  0x37   : > { %p12050_p10 = pneg %p12049_p8 }
  0x38   : > { %p12056_p7 = por %p12055_p5, %p12054_p4 }
  0x3a   : > { %p12057_p9 = pnand %p12056_p7, %p12050_p10 }
  0x3c   : > { %12060 = shalt.err (!%p12057_p9)
}
  0x3d   : > { %s12061_s5 = scalar_lea.vmem %s12309_s9, 2048  ;;  %s12151_s7 = smov [#allocation5]  }
  0x3e   : > { %p12062_p11 = scmp.ne.s32.totalorder %s12309_s9, %s12061_s5  ;;  %s12066_s12 = sshll.u32 %s12151_s7, 4  ;;  %s12067_s12 = int_to_ptr.vmem [resolvable:$false] %s12066_s12 }
  0x3f   : > { %s12068_s14 = scalar_lea.vmem %s12067_s12, 4096  ;;  %p12069_p6 = scmp.lt.s32.totalorder %s12309_s9, %s12067_s12 }
  0x40   : > { %p12064_p3 = pnand %p12062_p11, %p12018_p1  ;;  %p12070_p0 = scmp.lt.s32.totalorder %s12068_s14, %s12061_s5 }
  0x42   : > { %p12065_p8 = pneg %p12064_p3  ;;  %p12071_p2 = por %p12070_p0, %p12069_p6 }
  0x44   : > { %p12072_p4 = pnand %p12071_p2, %p12065_p8 }
  0x46   : > { %12075 = shalt.err (!%p12072_p4)
}
  0x47   : > { %11820 = dma.hbm_to_vmem [thread:$0]  (!%p12257_p13), %s12305_s6, 2048, %s12309_s9, %s189_s8, %s12149_s13, %s12149_s13, %s12150_s20  }
  0x48   : > { %211 = sbr.rel (%p12296_p12) target bundleno = 2429 (0x97d), region = 36  ;;  %s12343_s10 = sand.u32 (!%p12296_p12), 1, %s12138_s16  }
  0x49   : > { %s12346_s30 = sshll.u32 (!%p12296_p12), %s12343_s10, 7  ;;  %s214_s11 = scalar_lea.sflag (!%p12296_p12), [#allocation3], %s12343_s10 }
  0x4a   : > { %s12350_s23 = scalar_lea.vmem (!%p12296_p12), [#allocation2], %s12346_s30  ;;  %p14023_p6 = scmp.ne.s32.totalorder (!%p12296_p12), %s14018_s26, 0 }
  0x4f   : > { %12121 = dma.done.wait (%p14023_p6), %s214_s11, 2048  }
  0x50   : > { %12123 = vsyncadd (%p14023_p6), %s214_s11, 4294965248  ;;  %s223_s29 = scalar_lea.sflag [#allocation6], %s12343_s10  ;;  %s12358_s13 = scalar_lea.vmem [#allocation5], %s12346_s30 }
  0x51   : > { %12125 = dma.done.wait (%p14023_p6), %s223_s29, 2048  }
  0x52   : > { %12127 = vsyncadd (%p14023_p6), %s223_s29, 4294965248  ;;  %v12152_v0 = vmov 0.0   ;;  %vm12153_vm0 = vmmov 0   ;;  %v12154_v1 = vmov 0   ;;  %vm314_vm1 = vcmask 64512   ;;  %v259_v2 = vld [vmem:[%s12350_s23] sm:$0xff] }
  0x53   : > { %10976 = vmatprep.subr.mxu0 %v12152_v0  ;;  %10987 = vmatprep.subr.mxu1 %v12152_v0  ;;  %v260_v3 = vld [vmem:[%s12350_s23 + $0x8] sm:$0xff]  ;;  %v12375_v4 = vld [vmem:[%s14012_s2] sm:$0xff]  ;;  %v261_v5 = vld [vmem:[%s12350_s23 + $0x10] sm:$0xff]  ;;  %vm1604_vm2 = vcmask 130048   ;;  %s13868_s14 = scalar_lea.vmem [#allocation7], %s12346_s30  ;;  %s10655_s30 = sshll.u32 %s12204_s19, 11 }
  0x54   : > { %10978 = vmatprep.mubr.msk.f32.mxu0 %vm12153_vm0, %v12152_v0  ;;  %10989 = vmatprep.mubr.msk.f32.mxu1 %vm12153_vm0, %v12152_v0  ;;  %v12388_v6 = vld [vmem:[%s14012_s2 + $0x8] sm:$0xff]  ;;  %v262_v7 = vld [vmem:[%s12350_s23 + $0x18] sm:$0xff]  ;;  %v12409_v9 = vld [vmem:[%s14012_s2 + $0x10] sm:$0xff]  ;;  %s10315_s11 = sshll.u32 %s13868_s14, 4  ;;  %s13961_s20 = scalar_lea.hbm %s14014_s4, %s10655_s30  ;;  %s13963_s11 = int_to_ptr.vmem [resolvable:$true] %s10315_s11 }
  0x55   : > { %11866 = vset.pattern.permute.xlu0 %v12154_v1  ;;  %11867 = vset.pattern.permute.xlu1 %v12154_v1  ;;  %v296_v8 = vld [vmem:[%s14013_s3 + $0x8] sm:$0xff]  ;;  %v295_v10 = vld [vmem:[%s14013_s3] sm:$0xff]  ;;  %v265_v13 = vld [vmem:[%s12350_s23 + $0x30] sm:$0xff]  ;;  %s10302_s22 = scalar_lea.sflag [#allocation4], %s12343_s10  ;;  %s12076_s6 = scalar_lea.vmem %s13963_s11, 2048 }
  0x56   : > { %10977 = vmatpush3.msra.mxu0 %v259_v2  ;;  %10988 = vmatpush3.msra.mxu1 %v260_v3  ;;  %v263_v11 = vld [vmem:[%s12350_s23 + $0x20] sm:$0xff]  ;;  %v264_v12 = vld [vmem:[%s12350_s23 + $0x28] sm:$0xff]  ;;  %v266_v14 = vld [vmem:[%s12350_s23 + $0x38] sm:$0xff]  ;;  %p12077_p13 = scmp.ne.s32.totalorder %s13963_s11, %s12076_s6  ;;  %p14024_p1 = scmp.ne.s32.totalorder %s14019_s27, 0 }
  0x57   : > { %10979 = vmatmul.mubr.msk.f32.vlgmr.msra.gmra.mrb[0].mxu0 %vm314_vm1, %v12375_v4  ;;  %10990 = vmatmul.mubr.msk.f32.vlgmr.msra.gmra.mrb[0].mxu1 %vm314_vm1, %v12375_v4  ;;  %v267_v15 = vld [vmem:[%s12350_s23 + $0x40] sm:$0xff]  ;;  %v268_v16 = vld [vmem:[%s12350_s23 + $0x48] sm:$0xff]  ;;  %v269_v17 = vld [vmem:[%s12350_s23 + $0x50] sm:$0xff]  ;;  %s12155_s19 = smov [#allocation7]  }
  0x58   : > { %10998 = vmatprep.subr.mxu0 %v12152_v0  ;;  %10981 = vmatprep.mubr.msk.f32.mxu0 %vm12153_vm0, %v12152_v0  ;;  %v270_v18 = vld [vmem:[%s12350_s23 + $0x58] sm:$0xff]  ;;  %v271_v19 = vld [vmem:[%s12350_s23 + $0x60] sm:$0xff]  ;;  %v272_v20 = vld [vmem:[%s12350_s23 + $0x68] sm:$0xff]  ;;  %p12078_p12 = pnand %p12077_p13, %p14024_p1  ;;  %s12080_s9 = sshll.u32 %s12155_s19, 4  ;;  %s12081_s9 = int_to_ptr.vmem [resolvable:$false] %s12080_s9 }
  0x59   : > { %10992 = vmatprep.mubr.msk.f32.mxu1 %vm12153_vm0, %v12152_v0  ;;  %10999 = vmatpush3.msra.mxu0 %v261_v5  ;;  %v273_v21 = vld [vmem:[%s12350_s23 + $0x70] sm:$0xff]  ;;  %v274_v22 = vld [vmem:[%s12350_s23 + $0x78] sm:$0xff]  ;;  %s12082_s8 = scalar_lea.vmem %s12081_s9, 4096  ;;  %p12083_p5 = scmp.lt.s32.totalorder %s13963_s11, %s12081_s9 }
  0x5a   : > { %11009 = vmatprep.subr.mxu1 %v12152_v0  ;;  %11020 = vmatprep.subr.mxu0 %v12152_v0  ;;  %p12079_p10 = pneg %p12078_p12  ;;  %p12084_p7 = scmp.lt.s32.totalorder %s12082_s8, %s12076_s6 }
  0x5b   : > { %10982 = vmatmul.mubr.msk.f32.gmra.mrb[2].mxu0 %vm314_vm1, %v12388_v6  ;;  %10993 = vmatmul.mubr.msk.f32.gmra.mrb[2].mxu1 %vm314_vm1, %v12388_v6 }
  0x5c   : > { %10984 = vmatprep.mubr.msk.f32.mxu0 %vm12153_vm0, %v12152_v0  ;;  %10995 = vmatprep.mubr.msk.f32.mxu1 %vm12153_vm0, %v12152_v0  ;;  %p12085_p9 = por %p12084_p7, %p12083_p5 }
  0x5d   : > { %11010 = vmatpush3.msra.mxu1 %v262_v7  ;;  %306 = vperm.xlu0 %11866, %v296_v8  }
  0x5e   : > { %11031 = vmatprep.subr.mxu1 %v12152_v0  ;;  %p12086_p11 = pnand %p12085_p9, %p12079_p10 }
  0x5f   : > { %10985 = vmatmul.mubr.msk.f32.gmra.mrb[4].mxu0 %vm314_vm1, %v12409_v9  ;;  %10996 = vmatmul.mubr.msk.f32.gmra.mrb[4].mxu1 %vm314_vm1, %v12409_v9 }
  0x60   : > { %11000 = vmatprep.mubr.msk.f32.mxu0 %vm12153_vm0, %v12152_v0  ;;  %11011 = vmatprep.mubr.msk.f32.mxu1 %vm12153_vm0, %v12152_v0 }
  0x61   : > { %301 = vperm.xlu0 %11866, %v295_v10  }
  0x63   : > { %11001 = vmatmul.mubr.msk.f32.vlgmr.msra.gmra.mrb[6].mxu0 %vm314_vm1, %v12375_v4  ;;  %11012 = vmatmul.mubr.msk.f32.vlgmr.msra.gmra.mrb[6].mxu1 %vm314_vm1, %v12375_v4 }
  0x64   : > { %11003 = vmatprep.mubr.msk.f32.mxu0 %vm12153_vm0, %v12152_v0  ;;  %11014 = vmatprep.mubr.msk.f32.mxu1 %vm12153_vm0, %v12152_v0 }
  0x65   : > { %11021 = vmatpush3.msra.mxu0 %v263_v11  ;;  %11032 = vmatpush3.msra.mxu1 %v264_v12 }
  0x66   : > { %11042 = vmatprep.subr.mxu0 %v12152_v0  ;;  %11053 = vmatprep.subr.mxu1 %v12152_v0 }
  0x67   : > { %11004 = vmatmul.mubr.msk.f32.gmra.mrb[8].mxu0 %vm314_vm1, %v12388_v6  ;;  %11015 = vmatmul.mubr.msk.f32.gmra.mrb[8].mxu1 %vm314_vm1, %v12388_v6 }
  0x68   : > { %11006 = vmatprep.mubr.msk.f32.mxu0 %vm12153_vm0, %v12152_v0  ;;  %11017 = vmatprep.mubr.msk.f32.mxu1 %vm12153_vm0, %v12152_v0 }
  0x6b   : > { %11007 = vmatmul.mubr.msk.f32.gmra.mrb[10].mxu0 %vm314_vm1, %v12409_v9  ;;  %11018 = vmatmul.mubr.msk.f32.gmra.mrb[10].mxu1 %vm314_vm1, %v12409_v9 }
  0x6c   : > { %11022 = vmatprep.mubr.msk.f32.mxu0 %vm12153_vm0, %v12152_v0  ;;  %11033 = vmatprep.mubr.msk.f32.mxu1 %vm12153_vm0, %v12152_v0 }
  0x6f   : > { %11023 = vmatmul.mubr.msk.f32.vlgmr.msra.gmra.mrb[12].mxu0 %vm314_vm1, %v12375_v4  ;;  %11034 = vmatmul.mubr.msk.f32.vlgmr.msra.gmra.mrb[12].mxu1 %vm314_vm1, %v12375_v4 }
  0x70   : > { %11025 = vmatprep.mubr.msk.f32.mxu0 %vm12153_vm0, %v12152_v0  ;;  %11036 = vmatprep.mubr.msk.f32.mxu1 %vm12153_vm0, %v12152_v0 }
  0x71   : > { %11043 = vmatpush3.msra.mxu0 %v265_v13  ;;  %11054 = vmatpush3.msra.mxu1 %v266_v14 }
  0x72   : > { %11064 = vmatprep.subr.mxu0 %v12152_v0  ;;  %11075 = vmatprep.subr.mxu1 %v12152_v0 }
  0x73   : > { %11026 = vmatmul.mubr.msk.f32.gmra.mrb[14].mxu0 %vm314_vm1, %v12388_v6  ;;  %11037 = vmatmul.mubr.msk.f32.gmra.mrb[14].mxu1 %vm314_vm1, %v12388_v6 }
  0x74   : > { %11028 = vmatprep.mubr.msk.f32.mxu0 %vm12153_vm0, %v12152_v0  ;;  %11039 = vmatprep.mubr.msk.f32.mxu1 %vm12153_vm0, %v12152_v0 }
  0x77   : > { %11029 = vmatmul.mubr.msk.f32.gmra.mrb[16].mxu0 %vm314_vm1, %v12409_v9  ;;  %11040 = vmatmul.mubr.msk.f32.gmra.mrb[16].mxu1 %vm314_vm1, %v12409_v9 }
  0x78   : > { %11044 = vmatprep.mubr.msk.f32.mxu0 %vm12153_vm0, %v12152_v0  ;;  %11055 = vmatprep.mubr.msk.f32.mxu1 %vm12153_vm0, %v12152_v0 }
  0x7b   : > { %11045 = vmatmul.mubr.msk.f32.vlgmr.msra.gmra.mrb[18].mxu0 %vm314_vm1, %v12375_v4  ;;  %11056 = vmatmul.mubr.msk.f32.vlgmr.msra.gmra.mrb[18].mxu1 %vm314_vm1, %v12375_v4 }
  0x7c   : > { %11047 = vmatprep.mubr.msk.f32.mxu0 %vm12153_vm0, %v12152_v0  ;;  %11058 = vmatprep.mubr.msk.f32.mxu1 %vm12153_vm0, %v12152_v0 }
  0x7d   : > { %11065 = vmatpush3.msra.mxu0 %v267_v15  ;;  %11076 = vmatpush3.msra.mxu1 %v268_v16 }
  0x7e   : > { %11086 = vmatprep.subr.mxu0 %v12152_v0  ;;  %11097 = vmatprep.subr.mxu1 %v12152_v0 }
  0x7f   : > { %11048 = vmatmul.mubr.msk.f32.gmra.mrb[20].mxu0 %vm314_vm1, %v12388_v6  ;;  %11059 = vmatmul.mubr.msk.f32.gmra.mrb[20].mxu1 %vm314_vm1, %v12388_v6 }
  0x80   : > { %11050 = vmatprep.mubr.msk.f32.mxu0 %vm12153_vm0, %v12152_v0  ;;  %11061 = vmatprep.mubr.msk.f32.mxu1 %vm12153_vm0, %v12152_v0 }
  0x83   : > { %11051 = vmatmul.mubr.msk.f32.gmra.mrb[22].mxu0 %vm314_vm1, %v12409_v9  ;;  %11062 = vmatmul.mubr.msk.f32.gmra.mrb[22].mxu1 %vm314_vm1, %v12409_v9 }
  0x84   : > { %11066 = vmatprep.mubr.msk.f32.mxu0 %vm12153_vm0, %v12152_v0  ;;  %11077 = vmatprep.mubr.msk.f32.mxu1 %vm12153_vm0, %v12152_v0 }
  0x87   : > { %11067 = vmatmul.mubr.msk.f32.vlgmr.msra.gmra.mrb[24].mxu0 %vm314_vm1, %v12375_v4  ;;  %11078 = vmatmul.mubr.msk.f32.vlgmr.msra.gmra.mrb[24].mxu1 %vm314_vm1, %v12375_v4 }
  0x88   : > { %11069 = vmatprep.mubr.msk.f32.mxu0 %vm12153_vm0, %v12152_v0  ;;  %11080 = vmatprep.mubr.msk.f32.mxu1 %vm12153_vm0, %v12152_v0 }
  0x89   : > { %11087 = vmatpush3.msra.mxu0 %v269_v17  ;;  %11098 = vmatpush3.msra.mxu1 %v270_v18 }
  0x8a   : > { %11108 = vmatprep.subr.mxu0 %v12152_v0  ;;  %11119 = vmatprep.subr.mxu1 %v12152_v0 }
  0x8b   : > { %11070 = vmatmul.mubr.msk.f32.gmra.mrb[26].mxu0 %vm314_vm1, %v12388_v6  ;;  %11081 = vmatmul.mubr.msk.f32.gmra.mrb[26].mxu1 %vm314_vm1, %v12388_v6 }
  0x8c   : > { %11072 = vmatprep.mubr.msk.f32.mxu0 %vm12153_vm0, %v12152_v0  ;;  %11083 = vmatprep.mubr.msk.f32.mxu1 %vm12153_vm0, %v12152_v0 }
  0x8f   : > { %11073 = vmatmul.mubr.msk.f32.gmra.mrb[28].mxu0 %vm314_vm1, %v12409_v9  ;;  %11084 = vmatmul.mubr.msk.f32.gmra.mrb[28].mxu1 %vm314_vm1, %v12409_v9 }
  0x90   : > { %11088 = vmatprep.mubr.msk.f32.mxu0 %vm12153_vm0, %v12152_v0  ;;  %11099 = vmatprep.mubr.msk.f32.mxu1 %vm12153_vm0, %v12152_v0 }
  0x93   : > { %11089 = vmatmul.mubr.msk.f32.vlgmr.msra.gmra.mrb[30].mxu0 %vm314_vm1, %v12375_v4  ;;  %11100 = vmatmul.mubr.msk.f32.vlgmr.msra.gmra.mrb[30].mxu1 %vm314_vm1, %v12375_v4 }
  0x94   : > { %11091 = vmatprep.mubr.msk.f32.mxu0 %vm12153_vm0, %v12152_v0  ;;  %11102 = vmatprep.mubr.msk.f32.mxu1 %vm12153_vm0, %v12152_v0 }
  0x95   : > { %11109 = vmatpush3.msra.mxu0 %v271_v19  ;;  %11120 = vmatpush3.msra.mxu1 %v272_v20 }
  0x96   : > { %11130 = vmatprep.subr.mxu0 %v12152_v0  ;;  %11141 = vmatprep.subr.mxu1 %v12152_v0 }
  0x97   : > { %11092 = vmatmul.mubr.msk.f32.gmra.mrb[32].mxu0 %vm314_vm1, %v12388_v6  ;;  %11103 = vmatmul.mubr.msk.f32.gmra.mrb[32].mxu1 %vm314_vm1, %v12388_v6 }
  0x98   : > { %11094 = vmatprep.mubr.msk.f32.mxu0 %vm12153_vm0, %v12152_v0  ;;  %11105 = vmatprep.mubr.msk.f32.mxu1 %vm12153_vm0, %v12152_v0 }
  0x9b   : > { %11095 = vmatmul.mubr.msk.f32.gmra.mrb[34].mxu0 %vm314_vm1, %v12409_v9  ;;  %11106 = vmatmul.mubr.msk.f32.gmra.mrb[34].mxu1 %vm314_vm1, %v12409_v9 }
  0x9c   : > { %11110 = vmatprep.mubr.msk.f32.mxu0 %vm12153_vm0, %v12152_v0  ;;  %11121 = vmatprep.mubr.msk.f32.mxu1 %vm12153_vm0, %v12152_v0 }
  0x9f   : > { %11111 = vmatmul.mubr.msk.f32.vlgmr.msra.gmra.mrb[36].mxu0 %vm314_vm1, %v12375_v4  ;;  %11122 = vmatmul.mubr.msk.f32.vlgmr.msra.gmra.mrb[36].mxu1 %vm314_vm1, %v12375_v4 }
  0xa0   : > { %11113 = vmatprep.mubr.msk.f32.mxu0 %vm12153_vm0, %v12152_v0  ;;  %11124 = vmatprep.mubr.msk.f32.mxu1 %vm12153_vm0, %v12152_v0 }
  0xa1   : > { %11131 = vmatpush3.msra.mxu0 %v273_v21  ;;  %11142 = vmatpush3.msra.mxu1 %v274_v22 }
  0xa2   : > { %11152 = vmatprep.subr.mxu0 %v12152_v0  ;;  %11157 = vmatprep.subr.mxu1 %v12152_v0 }
  0xa3   : > { %11114 = vmatmul.mubr.msk.f32.gmra.mrb[38].mxu0 %vm314_vm1, %v12388_v6  ;;  %11125 = vmatmul.mubr.msk.f32.gmra.mrb[38].mxu1 %vm314_vm1, %v12388_v6 }
  0xa4   : > { %11116 = vmatprep.mubr.msk.f32.mxu0 %vm12153_vm0, %v12152_v0  ;;  %11127 = vmatprep.mubr.msk.f32.mxu1 %vm12153_vm0, %v12152_v0 }
  0xa7   : > { %11117 = vmatmul.mubr.msk.f32.gmra.mrb[40].mxu0 %vm314_vm1, %v12409_v9  ;;  %11128 = vmatmul.mubr.msk.f32.gmra.mrb[40].mxu1 %vm314_vm1, %v12409_v9 }
  0xa8   : > { %11132 = vmatprep.mubr.msk.f32.mxu0 %vm12153_vm0, %v12152_v0  ;;  %11143 = vmatprep.mubr.msk.f32.mxu1 %vm12153_vm0, %v12152_v0 }
  0xab   : > { %11133 = vmatmul.mubr.msk.f32.vlgmr.msra.gmra.mrb[42].mxu0 %vm314_vm1, %v12375_v4  ;;  %11144 = vmatmul.mubr.msk.f32.vlgmr.msra.gmra.mrb[42].mxu1 %vm314_vm1, %v12375_v4 }
  0xac   : > { %11135 = vmatprep.mubr.msk.f32.mxu0 %vm12153_vm0, %v12152_v0  ;;  %11146 = vmatprep.mubr.msk.f32.mxu1 %vm12153_vm0, %v12152_v0 }
  0xaf   : > { %11136 = vmatmul.mubr.msk.f32.gmra.mrb[44].mxu0 %vm314_vm1, %v12388_v6  ;;  %11147 = vmatmul.mubr.msk.f32.gmra.mrb[44].mxu1 %vm314_vm1, %v12388_v6 }
  0xb0   : > { %11138 = vmatprep.mubr.msk.f32.mxu0 %vm12153_vm0, %v12152_v0  ;;  %11149 = vmatprep.mubr.msk.f32.mxu1 %vm12153_vm0, %v12152_v0 }
  0xb3   : > { %11139 = vmatmul.mubr.msk.f32.gmra.mrb[46].mxu0 %vm314_vm1, %v12409_v9  ;;  %11150 = vmatmul.mubr.msk.f32.gmra.mrb[46].mxu1 %vm314_vm1, %v12409_v9 }
  0xb4   : > { %11154 = vmatprep.mubr.msk.f32.mxu0 %vm12153_vm0, %v12152_v0  ;;  %11159 = vmatprep.mubr.msk.f32.mxu1 %vm12153_vm0, %v12152_v0 }
  0xdc   : > { %v12615_v23 = vpop.permute.xlu0 %306 }
  0xe0   : > { %v12617_v28 = vpop.permute.xlu0 %301 }
 0x12a   : > { %v390_v24 = vpop.f32.mrb[0].mxu0  ;;  %v470_v25 = vpop.f32.mrb[0].mxu1 }
 0x12b   : > { %v10980_v26 = vpop.f32.mrb[1].mxu0  ;;  %v10991_v27 = vpop.f32.mrb[1].mxu1  ;;  %v471_v35 = vadd.f32 %v470_v25, %v12617_v28  ;;  %v391_v36 = vadd.f32 %v390_v24, %v12617_v28 }
 0x12e   : > { %v395_v29 = vpop.f32.mrb[2].mxu0  ;;  %v475_v30 = vpop.f32.mrb[2].mxu1 }
 0x12f   : > { %v396_v31 = vadd.f32 %v395_v29, %v12615_v23  ;;  %v476_v32 = vadd.f32 %v475_v30, %v12615_v23  ;;  %v10983_v33 = vpop.f32.mrb[3].mxu0  ;;  %v10994_v34 = vpop.f32.mrb[3].mxu1 }
 0x131   : > { %11153 = vmatpush3.xpose.msk.msra.mxu0 %vm1604_vm2, %v396_v31  ;;  %11158 = vmatpush3.xpose.msk.msra.mxu1 %vm1604_vm2, %v476_v32 }
 0x132   : > { %v12625_v37 = vpop.f32.mrb[4].mxu0  ;;  %v12627_v38 = vpop.f32.mrb[4].mxu1  ;;  %11162 = vmatprep.subr.mxu0 %v12152_v0  ;;  %11167 = vmatprep.subr.mxu1 %v12152_v0 }
 0x133   : > { %v10986_v39 = vpop.f32.mrb[5].mxu0  ;;  %v10997_v40 = vpop.f32.mrb[5].mxu1 }
 0x134   : > { %11155 = vmatmul.mubr.msk.f32.vlgmr.msra.gmra.mrb[48].mxu0 %vm1604_vm2, %v391_v36  ;;  %11160 = vmatmul.mubr.msk.f32.vlgmr.msra.gmra.mrb[48].mxu1 %vm1604_vm2, %v471_v35 }
 0x135   : > { %11164 = vmatprep.mubr.msk.f32.mxu0 %vm12153_vm0, %v12152_v0  ;;  %11169 = vmatprep.mubr.msk.f32.mxu1 %vm12153_vm0, %v12152_v0 }
 0x136   : > { %v550_v41 = vpop.f32.mrb[6].mxu0  ;;  %v630_v42 = vpop.f32.mrb[6].mxu1 }
 0x137   : > { %v11002_v43 = vpop.f32.mrb[7].mxu0  ;;  %v11013_v44 = vpop.f32.mrb[7].mxu1  ;;  %v631_v51 = vadd.f32 %v630_v42, %v12617_v28  ;;  %v551_v52 = vadd.f32 %v550_v41, %v12617_v28 }
 0x13a   : > { %v555_v45 = vpop.f32.mrb[8].mxu0  ;;  %v635_v46 = vpop.f32.mrb[8].mxu1 }
 0x13b   : > { %v556_v47 = vadd.f32 %v555_v45, %v12615_v23  ;;  %v636_v48 = vadd.f32 %v635_v46, %v12615_v23  ;;  %v11005_v49 = vpop.f32.mrb[9].mxu0  ;;  %v11016_v50 = vpop.f32.mrb[9].mxu1 }
 0x13d   : > { %11163 = vmatpush3.xpose.msk.msra.mxu0 %vm1604_vm2, %v556_v47  ;;  %11168 = vmatpush3.xpose.msk.msra.mxu1 %vm1604_vm2, %v636_v48 }
 0x13e   : > { %v12643_v53 = vpop.f32.mrb[10].mxu0  ;;  %v12645_v54 = vpop.f32.mrb[10].mxu1  ;;  %11172 = vmatprep.subr.mxu0 %v12152_v0  ;;  %11177 = vmatprep.subr.mxu1 %v12152_v0 }
 0x13f   : > { %v11008_v55 = vpop.f32.mrb[11].mxu0  ;;  %v11019_v56 = vpop.f32.mrb[11].mxu1 }
 0x140   : > { %11165 = vmatmul.mubr.msk.f32.vlgmr.msra.gmra.mrb[50].mxu0 %vm1604_vm2, %v551_v52  ;;  %11170 = vmatmul.mubr.msk.f32.vlgmr.msra.gmra.mrb[50].mxu1 %vm1604_vm2, %v631_v51 }
 0x141   : > { %11174 = vmatprep.mubr.msk.f32.mxu0 %vm12153_vm0, %v12152_v0  ;;  %11179 = vmatprep.mubr.msk.f32.mxu1 %vm12153_vm0, %v12152_v0 }
 0x142   : > { %v710_v57 = vpop.f32.mrb[12].mxu0  ;;  %v790_v58 = vpop.f32.mrb[12].mxu1 }
 0x143   : > { %v11024_v59 = vpop.f32.mrb[13].mxu0  ;;  %v11035_v60 = vpop.f32.mrb[13].mxu1  ;;  %v711_v4 = vadd.f32 %v710_v57, %v12617_v28  ;;  %v791_v5 = vadd.f32 %v790_v58, %v12617_v28 }
 0x146   : > { %v715_v61 = vpop.f32.mrb[14].mxu0  ;;  %v795_v62 = vpop.f32.mrb[14].mxu1 }
 0x147   : > { %v716_v63 = vadd.f32 %v715_v61, %v12615_v23  ;;  %v796_v1 = vadd.f32 %v795_v62, %v12615_v23  ;;  %v11027_v2 = vpop.f32.mrb[15].mxu0  ;;  %v11038_v3 = vpop.f32.mrb[15].mxu1 }
 0x149   : > { %11173 = vmatpush3.xpose.msk.msra.mxu0 %vm1604_vm2, %v716_v63  ;;  %11178 = vmatpush3.xpose.msk.msra.mxu1 %vm1604_vm2, %v796_v1 }
 0x14a   : > { %v12661_v6 = vpop.f32.mrb[16].mxu0  ;;  %v12663_v7 = vpop.f32.mrb[16].mxu1  ;;  %11182 = vmatprep.subr.mxu0 %v12152_v0  ;;  %11187 = vmatprep.subr.mxu1 %v12152_v0 }
 0x14b   : > { %v11030_v8 = vpop.f32.mrb[17].mxu0  ;;  %v11041_v9 = vpop.f32.mrb[17].mxu1 }
 0x14c   : > { %11175 = vmatmul.mubr.msk.f32.vlgmr.msra.gmra.mrb[52].mxu0 %vm1604_vm2, %v711_v4  ;;  %11180 = vmatmul.mubr.msk.f32.vlgmr.msra.gmra.mrb[52].mxu1 %vm1604_vm2, %v791_v5 }
 0x14d   : > { %11184 = vmatprep.mubr.msk.f32.mxu0 %vm12153_vm0, %v12152_v0  ;;  %11189 = vmatprep.mubr.msk.f32.mxu1 %vm12153_vm0, %v12152_v0 }
 0x14e   : > { %v870_v10 = vpop.f32.mrb[18].mxu0  ;;  %v950_v11 = vpop.f32.mrb[18].mxu1 }
 0x14f   : > { %v11046_v12 = vpop.f32.mrb[19].mxu0  ;;  %v11057_v13 = vpop.f32.mrb[19].mxu1  ;;  %v871_v20 = vadd.f32 %v870_v10, %v12617_v28  ;;  %v951_v21 = vadd.f32 %v950_v11, %v12617_v28 }
 0x152   : > { %v875_v14 = vpop.f32.mrb[20].mxu0  ;;  %v955_v15 = vpop.f32.mrb[20].mxu1 }
 0x153   : > { %v876_v16 = vadd.f32 %v875_v14, %v12615_v23  ;;  %v956_v17 = vadd.f32 %v955_v15, %v12615_v23  ;;  %v11049_v18 = vpop.f32.mrb[21].mxu0  ;;  %v11060_v19 = vpop.f32.mrb[21].mxu1 }
 0x155   : > { %11183 = vmatpush3.xpose.msk.msra.mxu0 %vm1604_vm2, %v876_v16  ;;  %11188 = vmatpush3.xpose.msk.msra.mxu1 %vm1604_vm2, %v956_v17 }
 0x156   : > { %v12679_v22 = vpop.f32.mrb[22].mxu0  ;;  %v12681_v24 = vpop.f32.mrb[22].mxu1  ;;  %11192 = vmatprep.subr.mxu0 %v12152_v0  ;;  %11197 = vmatprep.subr.mxu1 %v12152_v0 }
 0x157   : > { %v11052_v25 = vpop.f32.mrb[23].mxu0  ;;  %v11063_v26 = vpop.f32.mrb[23].mxu1 }
 0x158   : > { %11185 = vmatmul.mubr.msk.f32.vlgmr.msra.gmra.mrb[54].mxu0 %vm1604_vm2, %v871_v20  ;;  %11190 = vmatmul.mubr.msk.f32.vlgmr.msra.gmra.mrb[54].mxu1 %vm1604_vm2, %v951_v21 }
 0x159   : > { %11194 = vmatprep.mubr.msk.f32.mxu0 %vm12153_vm0, %v12152_v0  ;;  %11199 = vmatprep.mubr.msk.f32.mxu1 %vm12153_vm0, %v12152_v0 }
 0x15a   : > { %v1030_v27 = vpop.f32.mrb[24].mxu0  ;;  %v1110_v29 = vpop.f32.mrb[24].mxu1 }
 0x15b   : > { %v11068_v30 = vpop.f32.mrb[25].mxu0  ;;  %v11079_v31 = vpop.f32.mrb[25].mxu1  ;;  %v1031_v40 = vadd.f32 %v1030_v27, %v12617_v28  ;;  %v1111_v41 = vadd.f32 %v1110_v29, %v12617_v28 }
 0x15e   : > { %v1035_v32 = vpop.f32.mrb[26].mxu0  ;;  %v1115_v33 = vpop.f32.mrb[26].mxu1 }
 0x15f   : > { %v1036_v34 = vadd.f32 %v1035_v32, %v12615_v23  ;;  %v1116_v35 = vadd.f32 %v1115_v33, %v12615_v23  ;;  %v11071_v36 = vpop.f32.mrb[27].mxu0  ;;  %v11082_v39 = vpop.f32.mrb[27].mxu1 }
 0x161   : > { %11193 = vmatpush3.xpose.msk.msra.mxu0 %vm1604_vm2, %v1036_v34  ;;  %11198 = vmatpush3.xpose.msk.msra.mxu1 %vm1604_vm2, %v1116_v35 }
 0x162   : > { %v12697_v42 = vpop.f32.mrb[28].mxu0  ;;  %v12699_v43 = vpop.f32.mrb[28].mxu1  ;;  %11202 = vmatprep.subr.mxu0 %v12152_v0  ;;  %11207 = vmatprep.subr.mxu1 %v12152_v0 }
 0x163   : > { %v11074_v44 = vpop.f32.mrb[29].mxu0  ;;  %v11085_v45 = vpop.f32.mrb[29].mxu1 }
 0x164   : > { %11195 = vmatmul.mubr.msk.f32.vlgmr.msra.gmra.mrb[56].mxu0 %vm1604_vm2, %v1031_v40  ;;  %11200 = vmatmul.mubr.msk.f32.vlgmr.msra.gmra.mrb[56].mxu1 %vm1604_vm2, %v1111_v41 }
 0x165   : > { %11204 = vmatprep.mubr.msk.f32.mxu0 %vm12153_vm0, %v12152_v0  ;;  %11209 = vmatprep.mubr.msk.f32.mxu1 %vm12153_vm0, %v12152_v0 }
 0x166   : > { %v1190_v46 = vpop.f32.mrb[30].mxu0  ;;  %v1270_v47 = vpop.f32.mrb[30].mxu1 }
 0x167   : > { %v11090_v48 = vpop.f32.mrb[31].mxu0  ;;  %v11101_v49 = vpop.f32.mrb[31].mxu1  ;;  %v1191_v58 = vadd.f32 %v1190_v46, %v12617_v28  ;;  %v1271_v59 = vadd.f32 %v1270_v47, %v12617_v28 }
 0x16a   : > { %v1195_v50 = vpop.f32.mrb[32].mxu0  ;;  %v1275_v51 = vpop.f32.mrb[32].mxu1 }
 0x16b   : > { %v1196_v52 = vadd.f32 %v1195_v50, %v12615_v23  ;;  %v1276_v55 = vadd.f32 %v1275_v51, %v12615_v23  ;;  %v11093_v56 = vpop.f32.mrb[33].mxu0  ;;  %v11104_v57 = vpop.f32.mrb[33].mxu1 }
 0x16d   : > { %11203 = vmatpush3.xpose.msk.msra.mxu0 %vm1604_vm2, %v1196_v52  ;;  %11208 = vmatpush3.xpose.msk.msra.mxu1 %vm1604_vm2, %v1276_v55 }
 0x16e   : > { %v12715_v60 = vpop.f32.mrb[34].mxu0  ;;  %v12717_v61 = vpop.f32.mrb[34].mxu1  ;;  %11212 = vmatprep.subr.mxu0 %v12152_v0  ;;  %11217 = vmatprep.subr.mxu1 %v12152_v0 }
 0x16f   : > { %v11096_v62 = vpop.f32.mrb[35].mxu0  ;;  %v11107_v63 = vpop.f32.mrb[35].mxu1 }
 0x170   : > { %11205 = vmatmul.mubr.msk.f32.vlgmr.msra.gmra.mrb[58].mxu0 %vm1604_vm2, %v1191_v58  ;;  %11210 = vmatmul.mubr.msk.f32.vlgmr.msra.gmra.mrb[58].mxu1 %vm1604_vm2, %v1271_v59 }
 0x171   : > { %11214 = vmatprep.mubr.msk.f32.mxu0 %vm12153_vm0, %v12152_v0  ;;  %11219 = vmatprep.mubr.msk.f32.mxu1 %vm12153_vm0, %v12152_v0 }
 0x172   : > { %v1350_v1 = vpop.f32.mrb[36].mxu0  ;;  %v1430_v2 = vpop.f32.mrb[36].mxu1 }
 0x173   : > { %v11112_v3 = vpop.f32.mrb[37].mxu0  ;;  %v11123_v4 = vpop.f32.mrb[37].mxu1  ;;  %v1351_v13 = vadd.f32 %v1350_v1, %v12617_v28  ;;  %v1431_v14 = vadd.f32 %v1430_v2, %v12617_v28 }
 0x176   : > { %v1355_v5 = vpop.f32.mrb[38].mxu0  ;;  %v1435_v8 = vpop.f32.mrb[38].mxu1 }
 0x177   : > { %v1356_v9 = vadd.f32 %v1355_v5, %v12615_v23  ;;  %v1436_v10 = vadd.f32 %v1435_v8, %v12615_v23  ;;  %v11115_v11 = vpop.f32.mrb[39].mxu0  ;;  %v11126_v12 = vpop.f32.mrb[39].mxu1 }
 0x179   : > { %11213 = vmatpush3.xpose.msk.msra.mxu0 %vm1604_vm2, %v1356_v9  ;;  %11218 = vmatpush3.xpose.msk.msra.mxu1 %vm1604_vm2, %v1436_v10 }
 0x17a   : > { %v12733_v15 = vpop.f32.mrb[40].mxu0  ;;  %v12735_v16 = vpop.f32.mrb[40].mxu1  ;;  %11222 = vmatprep.subr.mxu0 %v12152_v0  ;;  %11227 = vmatprep.subr.mxu1 %v12152_v0 }
 0x17b   : > { %v11118_v17 = vpop.f32.mrb[41].mxu0  ;;  %v11129_v18 = vpop.f32.mrb[41].mxu1 }
 0x17c   : > { %11215 = vmatmul.mubr.msk.f32.vlgmr.msra.gmra.mrb[60].mxu0 %vm1604_vm2, %v1351_v13  ;;  %11220 = vmatmul.mubr.msk.f32.vlgmr.msra.gmra.mrb[60].mxu1 %vm1604_vm2, %v1431_v14 }
 0x17d   : > { %11224 = vmatprep.mubr.msk.f32.mxu0 %vm12153_vm0, %v12152_v0  ;;  %11229 = vmatprep.mubr.msk.f32.mxu1 %vm12153_vm0, %v12152_v0 }
 0x17e   : > { %v1510_v19 = vpop.f32.mrb[42].mxu0  ;;  %v1590_v20 = vpop.f32.mrb[42].mxu1 }
 0x17f   : > { %v11134_v21 = vpop.f32.mrb[43].mxu0  ;;  %v11145_v25 = vpop.f32.mrb[43].mxu1  ;;  %v1511_v33 = vadd.f32 %v1510_v19, %v12617_v28  ;;  %v1591_v34 = vadd.f32 %v1590_v20, %v12617_v28 }
 0x182   : > { %v1515_v26 = vpop.f32.mrb[44].mxu0  ;;  %v1595_v27 = vpop.f32.mrb[44].mxu1 }
 0x183   : > { %v1516_v29 = vadd.f32 %v1515_v26, %v12615_v23  ;;  %v1596_v30 = vadd.f32 %v1595_v27, %v12615_v23  ;;  %v11137_v31 = vpop.f32.mrb[45].mxu0  ;;  %v11148_v32 = vpop.f32.mrb[45].mxu1 }
 0x185   : > { %11223 = vmatpush3.xpose.msk.msra.mxu0 %vm1604_vm2, %v1516_v29  ;;  %11228 = vmatpush3.xpose.msk.msra.mxu1 %vm1604_vm2, %v1596_v30 }
 0x186   : > { %v12751_v35 = vpop.f32.mrb[46].mxu0  ;;  %v12753_v36 = vpop.f32.mrb[46].mxu1  ;;  %11232 = vmatprep.subr.mxu0 %v12152_v0  ;;  %11237 = vmatprep.subr.mxu1 %v12152_v0 }
 0x187   : > { %v11140_v39 = vpop.f32.mrb[47].mxu0  ;;  %v11151_v40 = vpop.f32.mrb[47].mxu1 }
 0x188   : > { %11225 = vmatmul.mubr.msk.f32.vlgmr.msra.gmra.mrb[62].mxu0 %vm1604_vm2, %v1511_v33  ;;  %11230 = vmatmul.mubr.msk.f32.vlgmr.msra.gmra.mrb[62].mxu1 %vm1604_vm2, %v1591_v34 }
 0x189   : > { %11234 = vmatprep.mubr.msk.f32.mxu0 %vm12153_vm0, %v12152_v0  ;;  %11239 = vmatprep.mubr.msk.f32.mxu1 %vm12153_vm0, %v12152_v0 }
 0x207   : > { %v12763_v41 = vpop.f32.mrb[48].mxu0  ;;  %v12765_v44 = vpop.f32.mrb[48].mxu1 }
 0x208   : > { %v11156_v45 = vpop.f32.mrb[49].mxu0  ;;  %v11161_v46 = vpop.f32.mrb[49].mxu1  ;;  %v2821_v47 = vsel %vm314_vm1, %v12763_v41, -inf  ;;  %v2824_v48 = vsel %vm314_vm1, %v12765_v44, -inf }
 0x209   : > { %2822 = vmax.xlane.f32.xlu1 %v2821_v47 }
 0x20d   : > { %2825 = vmax.xlane.f32.xlu1 %v2824_v48 }
 0x213   : > { %v12771_v49 = vpop.f32.mrb[50].mxu0  ;;  %v12773_v50 = vpop.f32.mrb[50].mxu1 }
 0x214   : > { %v11166_v51 = vpop.f32.mrb[51].mxu0  ;;  %v11171_v52 = vpop.f32.mrb[51].mxu1  ;;  %v2830_v55 = vsel %vm314_vm1, %v12773_v50, -inf  ;;  %v2827_v56 = vsel %vm314_vm1, %v12771_v49, -inf }
 0x215   : > { %2831 = vmax.xlane.f32.xlu1 %v2830_v55  ;;  %2828 = vmax.xlane.f32.xlu0 %v2827_v56 }
 0x21f   : > { %v12779_v57 = vpop.f32.mrb[52].mxu0  ;;  %v12781_v58 = vpop.f32.mrb[52].mxu1 }
 0x220   : > { %v11176_v59 = vpop.f32.mrb[53].mxu0  ;;  %v11181_v62 = vpop.f32.mrb[53].mxu1  ;;  %v2833_v63 = vsel %vm314_vm1, %v12779_v57, -inf  ;;  %v2836_v1 = vsel %vm314_vm1, %v12781_v58, -inf }
 0x221   : > { %2834 = vmax.xlane.f32.xlu1 %v2833_v63 }
 0x225   : > { %2837 = vmax.xlane.f32.xlu1 %v2836_v1 }
 0x22b   : > { %v12787_v2 = vpop.f32.mrb[54].mxu0  ;;  %v12789_v3 = vpop.f32.mrb[54].mxu1 }
 0x22c   : > { %v11186_v4 = vpop.f32.mrb[55].mxu0  ;;  %v11191_v5 = vpop.f32.mrb[55].mxu1  ;;  %v2839_v8 = vsel %vm314_vm1, %v12787_v2, -inf  ;;  %v2842_v9 = vsel %vm314_vm1, %v12789_v3, -inf }
 0x22d   : > { %2840 = vmax.xlane.f32.xlu1 %v2839_v8 }
 0x231   : > { %2843 = vmax.xlane.f32.xlu1 %v2842_v9 }
 0x237   : > { %v12795_v10 = vpop.f32.mrb[56].mxu0  ;;  %v12797_v11 = vpop.f32.mrb[56].mxu1 }
 0x238   : > { %v11196_v12 = vpop.f32.mrb[57].mxu0  ;;  %v11201_v13 = vpop.f32.mrb[57].mxu1  ;;  %v2845_v14 = vsel %vm314_vm1, %v12795_v10, -inf  ;;  %v2848_v17 = vsel %vm314_vm1, %v12797_v11, -inf }
 0x239   : > { %2846 = vmax.xlane.f32.xlu1 %v2845_v14 }
 0x23d   : > { %2849 = vmax.xlane.f32.xlu1 %v2848_v17 }
 0x243   : > { %v12803_v18 = vpop.f32.mrb[58].mxu0  ;;  %v12805_v19 = vpop.f32.mrb[58].mxu1 }
 0x244   : > { %v11206_v20 = vpop.f32.mrb[59].mxu0  ;;  %v11211_v21 = vpop.f32.mrb[59].mxu1  ;;  %v2854_v25 = vsel %vm314_vm1, %v12805_v19, -inf  ;;  %v2851_v26 = vsel %vm314_vm1, %v12803_v18, -inf }
 0x245   : > { %2855 = vmax.xlane.f32.xlu0 %v2854_v25  ;;  %2852 = vmax.xlane.f32.xlu1 %v2851_v26 }
 0x24f   : > { %v12811_v27 = vpop.f32.mrb[60].mxu0  ;;  %v12813_v29 = vpop.f32.mrb[60].mxu1 }
 0x250   : > { %v11216_v30 = vpop.f32.mrb[61].mxu0  ;;  %v11221_v31 = vpop.f32.mrb[61].mxu1  ;;  %v2860_v32 = vsel %vm314_vm1, %v12813_v29, -inf  ;;  %v2857_v33 = vsel %vm314_vm1, %v12811_v27, -inf }
 0x251   : > { %2861 = vmax.xlane.f32.xlu0 %v2860_v32  ;;  %2858 = vmax.xlane.f32.xlu1 %v2857_v33 }
 0x25b   : > { %v12819_v34 = vpop.f32.mrb[62].mxu0  ;;  %v12821_v39 = vpop.f32.mrb[62].mxu1 }
 0x25c   : > { %v11226_v40 = vpop.f32.mrb[63].mxu0  ;;  %v11231_v45 = vpop.f32.mrb[63].mxu1  ;;  %v2866_v46 = vsel %vm314_vm1, %v12821_v39, -inf  ;;  %v2863_v47 = vsel %vm314_vm1, %v12819_v34, -inf }
 0x25d   : > { %2867 = vmax.xlane.f32.xlu0 %v2866_v46  ;;  %2864 = vmax.xlane.f32.xlu1 %v2863_v47 }
 0x296   : > { %v2823_v48 = vpop.xlane.xlu1 %2822 }
 0x297   : > { %v2869_v51 = vsub.f32 %v12763_v41, %v2823_v48 }
 0x299   : > { %v2885_v52 = vmul.f32 1.442695, %v2869_v51 }
 0x29a   : > { %v2826_v55 = vpop.xlane.xlu1 %2825 }
 0x29b   : > { %11868 = vpow2.f32 %v2885_v52  ;;  %v2870_v56 = vsub.f32 %v12765_v44, %v2826_v55 }
 0x29d   : > { %v2887_v59 = vmul.f32 1.442695, %v2870_v56 }
 0x29f   : > { %11870 = vpow2.f32 %v2887_v59 }
 0x2a2   : > { %v2832_v62 = vpop.xlane.xlu1 %2831  ;;  %v2829_v63 = vpop.xlane.xlu0 %2828 }
 0x2a3   : > { %v2872_v1 = vsub.f32 %v12773_v50, %v2832_v62  ;;  %v2871_v4 = vsub.f32 %v12771_v49, %v2829_v63 }
 0x2a5   : > { %v12831_v5 = vpop.eup %11868  ;;  %v2891_v8 = vmul.f32 1.442695, %v2872_v1  ;;  %v2889_v9 = vmul.f32 1.442695, %v2871_v4 }
 0x2a6   : > { %v2917_v41 = vsel %vm314_vm1, %v12831_v5, 0.0 }
 0x2a7   : > { %11872 = vpow2.f32 %v2891_v8  ;;  %2918 = vadd.xlane.f32.xlu1 %v2917_v41 }
 0x2a8   : > { %11874 = vpow2.f32 %v2889_v9 }
 0x2a9   : > { %v12835_v12 = vpop.eup %11870 }
 0x2aa   : > { %v2920_v44 = vsel %vm314_vm1, %v12835_v12, 0.0 }
 0x2ab   : > { %2921 = vadd.xlane.f32.xlu0 %v2920_v44 }
 0x2ae   : > { %v2835_v13 = vpop.xlane.xlu1 %2834 }
 0x2af   : > { %v2873_v50 = vsub.f32 %v12779_v57, %v2835_v13 }
 0x2b1   : > { %v12840_v49 = vpop.eup %11872  ;;  %v2893_v14 = vmul.f32 1.442695, %v2873_v50 }
 0x2b2   : > { %v12842_v17 = vpop.eup %11874  ;;  %v2838_v20 = vpop.xlane.xlu1 %2837  ;;  %v2926_v21 = vsel %vm314_vm1, %v12840_v49, 0.0 }
 0x2b3   : > { %11876 = vpow2.f32 %v2893_v14  ;;  %v2874_v25 = vsub.f32 %v12781_v58, %v2838_v20  ;;  %2927 = vadd.xlane.f32.xlu0 %v2926_v21  ;;  %v2923_v26 = vsel %vm314_vm1, %v12842_v17, 0.0 }
 0x2b4   : > { %2924 = vadd.xlane.f32.xlu1 %v2923_v26 }
 0x2b5   : > { %v2895_v30 = vmul.f32 1.442695, %v2874_v25 }
 0x2b7   : > { %11878 = vpow2.f32 %v2895_v30 }
 0x2ba   : > { %v2841_v57 = vpop.xlane.xlu1 %2840 }
 0x2bb   : > { %v2875_v31 = vsub.f32 %v12787_v2, %v2841_v57 }
 0x2bd   : > { %v12850_v32 = vpop.eup %11876  ;;  %v2897_v33 = vmul.f32 1.442695, %v2875_v31 }
 0x2be   : > { %v2844_v40 = vpop.xlane.xlu1 %2843  ;;  %v2929_v45 = vsel %vm314_vm1, %v12850_v32, 0.0 }
 0x2bf   : > { %11880 = vpow2.f32 %v2897_v33  ;;  %v2876_v58 = vsub.f32 %v12789_v3, %v2844_v40  ;;  %2930 = vadd.xlane.f32.xlu1 %v2929_v45  ;;  %v297_v33 = vld [vmem:[%s14013_s3 + $0x10] sm:$0xff] }
 0x2c1   : > { %v12855_v46 = vpop.eup %11878  ;;  %v2899_v47 = vmul.f32 1.442695, %v2876_v58 }
 0x2c2   : > { %v2932_v48 = vsel %vm314_vm1, %v12855_v46, 0.0 }
 0x2c3   : > { %11882 = vpow2.f32 %v2899_v47  ;;  %2933 = vadd.xlane.f32.xlu0 %v2932_v48 }
 0x2c6   : > { %v2847_v2 = vpop.xlane.xlu1 %2846 }
 0x2c7   : > { %v2877_v51 = vsub.f32 %v12795_v10, %v2847_v2 }
 0x2c9   : > { %v12860_v52 = vpop.eup %11880  ;;  %v2901_v55 = vmul.f32 1.442695, %v2877_v51 }
 0x2ca   : > { %v2850_v56 = vpop.xlane.xlu1 %2849  ;;  %v2935_v59 = vsel %vm314_vm1, %v12860_v52, 0.0 }
 0x2cb   : > { %11884 = vpow2.f32 %v2901_v55  ;;  %v2878_v3 = vsub.f32 %v12797_v11, %v2850_v56  ;;  %2936 = vadd.xlane.f32.xlu1 %v2935_v59 }
 0x2cd   : > { %v12865_v62 = vpop.eup %11882  ;;  %v2903_v63 = vmul.f32 1.442695, %v2878_v3 }
 0x2ce   : > { %v2938_v1 = vsel %vm314_vm1, %v12865_v62, 0.0 }
 0x2cf   : > { %11886 = vpow2.f32 %v2903_v63  ;;  %2939 = vadd.xlane.f32.xlu0 %v2938_v1 }
 0x2d2   : > { %v2856_v10 = vpop.xlane.xlu0 %2855  ;;  %v2853_v4 = vpop.xlane.xlu1 %2852 }
 0x2d3   : > { %v2880_v8 = vsub.f32 %v12805_v19, %v2856_v10  ;;  %v2879_v9 = vsub.f32 %v12803_v18, %v2853_v4 }
 0x2d5   : > { %v12871_v41 = vpop.eup %11884  ;;  %v2905_v44 = vmul.f32 1.442695, %v2879_v9  ;;  %v2907_v13 = vmul.f32 1.442695, %v2880_v8 }
 0x2d6   : > { %v2941_v11 = vsel %vm314_vm1, %v12871_v41, 0.0 }
 0x2d7   : > { %2942 = vadd.xlane.f32.xlu1 %v2941_v11  ;;  %11888 = vpow2.f32 %v2905_v44 }
 0x2d8   : > { %11890 = vpow2.f32 %v2907_v13 }
 0x2d9   : > { %v12875_v50 = vpop.eup %11886 }
 0x2da   : > { %v2944_v14 = vsel %vm314_vm1, %v12875_v50, 0.0 }
 0x2db   : > { %2945 = vadd.xlane.f32.xlu0 %v2944_v14 }
 0x2de   : > { %v2862_v20 = vpop.xlane.xlu0 %2861  ;;  %v2859_v19 = vpop.xlane.xlu1 %2858 }
 0x2df   : > { %v2882_v18 = vsub.f32 %v12813_v29, %v2862_v20  ;;  %v2881_v21 = vsub.f32 %v12811_v27, %v2859_v19 }
 0x2e1   : > { %v2909_v25 = vmul.f32 1.442695, %v2881_v21  ;;  %v12881_v26 = vpop.eup %11888  ;;  %v2911_v30 = vmul.f32 1.442695, %v2882_v18 }
 0x2e2   : > { %v2947_v57 = vsel %vm314_vm1, %v12881_v26, 0.0  ;;  %v12885_v31 = vpop.eup %11890 }
 0x2e3   : > { %11892 = vpow2.f32 %v2909_v25  ;;  %2948 = vadd.xlane.f32.xlu0 %v2947_v57  ;;  %v2950_v29 = vsel %vm314_vm1, %v12885_v31, 0.0 }
 0x2e4   : > { %11894 = vpow2.f32 %v2911_v30 }
 0x2e7   : > { %2951 = vadd.xlane.f32.xlu0 %v2950_v29 }
 0x2e8   : > { %311 = vperm.xlu1 %11867, %v297_v33  }
 0x2ea   : > { %v2868_v27 = vpop.xlane.xlu0 %2867  ;;  %v2865_v2 = vpop.xlane.xlu1 %2864 }
 0x2eb   : > { %v2884_v40 = vsub.f32 %v12821_v39, %v2868_v27  ;;  %v2883_v55 = vsub.f32 %v12819_v34, %v2865_v2 }
 0x2ed   : > { %v2915_v45 = vmul.f32 1.442695, %v2884_v40  ;;  %v12893_v58 = vpop.eup %11892  ;;  %v2913_v39 = vmul.f32 1.442695, %v2883_v55 }
 0x2ee   : > { %v2953_v47 = vsel %vm314_vm1, %v12893_v58, 0.0  ;;  %v12897_v48 = vpop.eup %11894 }
 0x2ef   : > { %11896 = vpow2.f32 %v2915_v45  ;;  %2954 = vadd.xlane.f32.xlu0 %v2953_v47  ;;  %v2956_v51 = vsel %vm314_vm1, %v12897_v48, 0.0 }
 0x2f0   : > { %11898 = vpow2.f32 %v2913_v39 }
 0x2f3   : > { %2957 = vadd.xlane.f32.xlu0 %v2956_v51 }
 0x2f9   : > { %v12902_v56 = vpop.eup %11896 }
 0x2fa   : > { %v2962_v59 = vsel %vm314_vm1, %v12902_v56, 0.0  ;;  %v12906_v3 = vpop.eup %11898 }
 0x2fb   : > { %2963 = vadd.xlane.f32.xlu0 %v2962_v59  ;;  %v2959_v63 = vsel %vm314_vm1, %v12906_v3, 0.0 }
 0x30c   : > { %2960 = vadd.xlane.f32.xlu1 %v2959_v63 }
 0x334   : > { %v2919_v1 = vpop.xlane.xlu1 %2918 }
 0x335   : > { %11900 = vrcp.f32 %v2919_v1 }
 0x338   : > { %v2922_v4 = vpop.xlane.xlu0 %2921 }
 0x339   : > { %11902 = vrcp.f32 %v2922_v4 }
 0x33f   : > { %v11901_v11 = vpop.eup %11900 }
 0x340   : > { %v2928_v34 = vpop.xlane.xlu0 %2927  ;;  %v2966_v25 = vmul.f32 %v11901_v11, %v12831_v5 }
 0x341   : > { %v2925_v10 = vpop.xlane.xlu1 %2924  ;;  %11904 = vrcp.f32 %v2928_v34 }
 0x342   : > { %11906 = vrcp.f32 %v2925_v10 }
 0x343   : > { %v11903_v14 = vpop.eup %11902 }
 0x344   : > { %v2968_v30 = vmul.f32 %v11903_v14, %v12835_v12 }
 0x34b   : > { %v11905_v57 = vpop.eup %11904 }
 0x34c   : > { %v2931_v8 = vpop.xlane.xlu1 %2930  ;;  %v11907_v29 = vpop.eup %11906  ;;  %v2972_v12 = vmul.f32 %v11905_v57, %v12840_v49 }
 0x34d   : > { %11908 = vrcp.f32 %v2931_v8  ;;  %v2970_v27 = vmul.f32 %v11907_v29, %v12842_v17 }
 0x350   : > { %v2934_v44 = vpop.xlane.xlu0 %2933 }
 0x351   : > { %11910 = vrcp.f32 %v2934_v44 }
 0x357   : > { %v11909_v5 = vpop.eup %11908 }
 0x358   : > { %v2937_v9 = vpop.xlane.xlu1 %2936  ;;  %v2974_v45 = vmul.f32 %v11909_v5, %v12850_v32 }
 0x359   : > { %11912 = vrcp.f32 %v2937_v9 }
 0x35c   : > { %v2940_v20 = vpop.xlane.xlu0 %2939 }
 0x35d   : > { %11914 = vrcp.f32 %v2940_v20 }
 0x364   : > { %v2943_v13 = vpop.xlane.xlu1 %2942 }
 0x365   : > { %11916 = vrcp.f32 %v2943_v13 }
 0x368   : > { %v12910_v19 = vpop.permute.xlu1 %311  ;;  %v2946_v33 = vpop.xlane.xlu0 %2945 }
 0x369   : > { %v401_v18 = vadd.f32 %v12625_v37, %v12910_v19  ;;  %v481_v21 = vadd.f32 %v12627_v38, %v12910_v19  ;;  %v561_v37 = vadd.f32 %v12643_v53, %v12910_v19  ;;  %v641_v38 = vadd.f32 %v12645_v54, %v12910_v19  ;;  %v11911_v53 = vpop.eup %11910 }
 0x36a   : > { %11918 = vrcp.f32 %v2946_v33  ;;  %v721_v54 = vadd.f32 %v12661_v6, %v12910_v19  ;;  %v801_v40 = vadd.f32 %v12663_v7, %v12910_v19  ;;  %v11913_v17 = vpop.eup %11912  ;;  %v2976_v47 = vmul.f32 %v11911_v53, %v12855_v46 }
 0x36b   : > { %11233 = vmatpush3.msra.mxu0 %v401_v18  ;;  %11238 = vmatpush3.msra.mxu1 %v481_v21  ;;  %v11915_v6 = vpop.eup %11914  ;;  %v881_v7 = vadd.f32 %v12679_v22, %v12910_v19  ;;  %v961_v2 = vadd.f32 %v12681_v24, %v12910_v19  ;;  %v2978_v51 = vmul.f32 %v11913_v17, %v12860_v52 }
 0x36c   : > { %11235 = vmatmul.mubr.msk.f32.vlgmr.msra.gmra.mrb[64].mxu0 %vm314_vm1, %v2966_v25  ;;  %11240 = vmatmul.mubr.msk.f32.vlgmr.msra.gmra.mrb[64].mxu1 %vm314_vm1, %v2968_v30  ;;  %v2980_v55 = vmul.f32 %v11915_v6, %v12865_v62  ;;  %v1041_v24 = vadd.f32 %v12697_v42, %v12910_v19  ;;  %v1121_v39 = vadd.f32 %v12699_v43, %v12910_v19 }
 0x36d   : > { %11242 = vmatprep.subr.mxu0 %v12152_v0  ;;  %11247 = vmatprep.subr.mxu1 %v12152_v0  ;;  %v1201_v43 = vadd.f32 %v12715_v60, %v12910_v19  ;;  %v1281_v59 = vadd.f32 %v12717_v61, %v12910_v19  ;;  %v1361_v60 = vadd.f32 %v12733_v15, %v12910_v19 }
 0x36e   : > { %11243 = vmatpush3.msra.mxu0 %v561_v37  ;;  %11248 = vmatpush3.msra.mxu1 %v641_v38  ;;  %v1601_v34 = vadd.f32 %v12753_v36, %v12910_v19 }
 0x36f   : > { %11244 = vmatprep.mubr.msk.f32.mxu0 %vm12153_vm0, %v12152_v0  ;;  %11249 = vmatprep.mubr.msk.f32.mxu1 %vm12153_vm0, %v12152_v0  ;;  %v11917_v46 = vpop.eup %11916 }
 0x370   : > { %11252 = vmatprep.subr.mxu0 %v12152_v0  ;;  %11257 = vmatprep.subr.mxu1 %v12152_v0  ;;  %v2949_v49 = vpop.xlane.xlu0 %2948  ;;  %v2982_v52 = vmul.f32 %v11917_v46, %v12871_v41  ;;  %v276_v46 = vld [vmem:[%s12358_s13 + $0x8] sm:$0xff] }
 0x371   : > { %11245 = vmatmul.mubr.msk.f32.vlgmr.msra.gmra.mrb[66].mxu0 %vm314_vm1, %v2970_v27  ;;  %11250 = vmatmul.mubr.msk.f32.vlgmr.msra.gmra.mrb[66].mxu1 %vm314_vm1, %v2972_v12  ;;  %11920 = vrcp.f32 %v2949_v49 }
 0x372   : > { %11253 = vmatpush3.msra.mxu0 %v721_v54  ;;  %11258 = vmatpush3.msra.mxu1 %v801_v40 }
 0x373   : > { %11254 = vmatprep.mubr.msk.f32.mxu0 %vm12153_vm0, %v12152_v0  ;;  %11259 = vmatprep.mubr.msk.f32.mxu1 %vm12153_vm0, %v12152_v0 }
 0x374   : > { %11262 = vmatprep.subr.mxu0 %v12152_v0  ;;  %11267 = vmatprep.subr.mxu1 %v12152_v0  ;;  %v2952_v32 = vpop.xlane.xlu0 %2951  ;;  %v11919_v22 = vpop.eup %11918 }
 0x375   : > { %11255 = vmatmul.mubr.msk.f32.vlgmr.msra.gmra.mrb[68].mxu0 %vm314_vm1, %v2974_v45  ;;  %11260 = vmatmul.mubr.msk.f32.vlgmr.msra.gmra.mrb[68].mxu1 %vm314_vm1, %v2976_v47  ;;  %11922 = vrcp.f32 %v2952_v32  ;;  %v2984_v62 = vmul.f32 %v11919_v22, %v12875_v50  ;;  %v13110_v22 = vld [vmem:[%s14012_s2] sm:$0xff] }
 0x376   : > { %11263 = vmatpush3.msra.mxu0 %v881_v7  ;;  %11268 = vmatpush3.msra.mxu1 %v961_v2 }
 0x377   : > { %11264 = vmatprep.mubr.msk.f32.mxu0 %vm12153_vm0, %v12152_v0  ;;  %11269 = vmatprep.mubr.msk.f32.mxu1 %vm12153_vm0, %v12152_v0 }
 0x378   : > { %11272 = vmatprep.subr.mxu0 %v12152_v0  ;;  %11277 = vmatprep.subr.mxu1 %v12152_v0 }
 0x379   : > { %11265 = vmatmul.mubr.msk.f32.vlgmr.msra.gmra.mrb[70].mxu0 %vm314_vm1, %v2978_v51  ;;  %11270 = vmatmul.mubr.msk.f32.vlgmr.msra.gmra.mrb[70].mxu1 %vm314_vm1, %v2980_v55  ;;  %v278_v55 = vld [vmem:[%s12358_s13 + $0x18] sm:$0xff] }
 0x37a   : > { %11273 = vmatpush3.msra.mxu0 %v1041_v24  ;;  %11278 = vmatpush3.msra.mxu1 %v1121_v39  ;;  %v13120_v24 = vld [vmem:[%s14012_s2 + $0x8] sm:$0xff]  ;;  %v13129_v39 = vld [vmem:[%s14012_s2 + $0x10] sm:$0xff] }
 0x37b   : > { %11274 = vmatprep.mubr.msk.f32.mxu0 %vm12153_vm0, %v12152_v0  ;;  %11279 = vmatprep.mubr.msk.f32.mxu1 %vm12153_vm0, %v12152_v0  ;;  %v11921_v42 = vpop.eup %11920 }
 0x37c   : > { %11282 = vmatprep.subr.mxu0 %v12152_v0  ;;  %11287 = vmatprep.subr.mxu1 %v12152_v0  ;;  %v2955_v41 = vpop.xlane.xlu0 %2954  ;;  %v2986_v50 = vmul.f32 %v11921_v42, %v12881_v26  ;;  %v1441_v26 = vadd.f32 %v12735_v16, %v12910_v19  ;;  %v1521_v16 = vadd.f32 %v12751_v35, %v12910_v19 }
 0x37d   : > { %11275 = vmatmul.mubr.msk.f32.vlgmr.msra.gmra.mrb[72].mxu0 %vm314_vm1, %v2982_v52  ;;  %11280 = vmatmul.mubr.msk.f32.vlgmr.msra.gmra.mrb[72].mxu1 %vm314_vm1, %v2984_v62  ;;  %11924 = vrcp.f32 %v2955_v41  ;;  %v275_v62 = vld [vmem:[%s12358_s13] sm:$0xff]  ;;  %v282_v41 = vld [vmem:[%s12358_s13 + $0x38] sm:$0xff] }
 0x37e   : > { %11283 = vmatpush3.msra.mxu0 %v1201_v43  ;;  %11288 = vmatpush3.msra.mxu1 %v1281_v59  ;;  %v277_v43 = vld [vmem:[%s12358_s13 + $0x10] sm:$0xff]  ;;  %v280_v59 = vld [vmem:[%s12358_s13 + $0x28] sm:$0xff] }
 0x37f   : > { %11284 = vmatprep.mubr.msk.f32.mxu0 %vm12153_vm0, %v12152_v0  ;;  %11292 = vmatprep.subr.mxu0 %v12152_v0  ;;  %v11923_v63 = vpop.eup %11922 }
 0x380   : > { %11289 = vmatprep.mubr.msk.f32.mxu1 %vm12153_vm0, %v12152_v0  ;;  %11297 = vmatprep.subr.mxu1 %v12152_v0  ;;  %v2988_v61 = vmul.f32 %v11923_v63, %v12885_v31  ;;  %v2958_v1 = vpop.xlane.xlu0 %2957  ;;  %v284_v63 = vld [vmem:[%s12358_s13 + $0x48] sm:$0xff] }
 0x381   : > { %11285 = vmatmul.mubr.msk.f32.vlgmr.msra.gmra.mrb[74].mxu0 %vm314_vm1, %v2986_v50  ;;  %11926 = vrcp.f32 %v2958_v1  ;;  %v279_v50 = vld [vmem:[%s12358_s13 + $0x20] sm:$0xff] }
 0x382   : > { %11293 = vmatpush3.msra.mxu0 %v1361_v60  ;;  %11294 = vmatprep.mubr.msk.f32.mxu0 %vm12153_vm0, %v12152_v0  ;;  %v281_v60 = vld [vmem:[%s12358_s13 + $0x30] sm:$0xff]  ;;  %v283_v1 = vld [vmem:[%s12358_s13 + $0x40] sm:$0xff] }
 0x383   : > { %11290 = vmatmul.mubr.msk.f32.vlgmr.msra.gmra.mrb[74].mxu1 %vm314_vm1, %v2988_v61  ;;  %11302 = vmatprep.subr.mxu0 %v12152_v0  ;;  %v286_v61 = vld [vmem:[%s12358_s13 + $0x58] sm:$0xff] }
 0x384   : > { %11298 = vmatpush3.msra.mxu1 %v1441_v26  ;;  %11299 = vmatprep.mubr.msk.f32.mxu1 %vm12153_vm0, %v12152_v0  ;;  %v288_v26 = vld [vmem:[%s12358_s13 + $0x68] sm:$0xff] }
 0x385   : > { %11307 = vmatprep.subr.mxu1 %v12152_v0 }
 0x387   : > { %v11925_v15 = vpop.eup %11924 }
 0x388   : > { %v2964_v31 = vpop.xlane.xlu0 %2963  ;;  %v2990_v10 = vmul.f32 %v11925_v15, %v12893_v58  ;;  %v285_v15 = vld [vmem:[%s12358_s13 + $0x50] sm:$0xff] }
 0x389   : > { %11928 = vrcp.f32 %v2964_v31  ;;  %v290_v31 = vld [vmem:[%s12358_s13 + $0x78] sm:$0xff] }
 0x38a   : > { %11295 = vmatmul.mubr.msk.f32.vlgmr.msra.gmra.mrb[76].mxu0 %vm314_vm1, %v2990_v10  ;;  %v287_v10 = vld [vmem:[%s12358_s13 + $0x60] sm:$0xff] }
 0x38b   : > { %v11927_v4 = vpop.eup %11926  ;;  %11303 = vmatpush3.msra.mxu0 %v1521_v16  ;;  %11304 = vmatprep.mubr.msk.f32.mxu0 %vm12153_vm0, %v12152_v0  ;;  %v289_v16 = vld [vmem:[%s12358_s13 + $0x70] sm:$0xff] }
 0x38c   : > { %v2992_v8 = vmul.f32 %v11927_v4, %v12897_v48  ;;  %11312 = vmatprep.subr.mxu0 %v12152_v0 }
 0x38e   : > { %11300 = vmatmul.mubr.msk.f32.vlgmr.msra.gmra.mrb[76].mxu1 %vm314_vm1, %v2992_v8 }
 0x38f   : > { %11308 = vmatpush3.msra.mxu1 %v1601_v34  ;;  %11309 = vmatprep.mubr.msk.f32.mxu1 %vm12153_vm0, %v12152_v0 }
 0x390   : > { %11317 = vmatprep.subr.mxu1 %v12152_v0 }
 0x393   : > { %v11929_v35 = vpop.eup %11928 }
 0x394   : > { %v2996_v58 = vmul.f32 %v11929_v35, %v12902_v56  ;;  %v13027_v56 = vld [vmem:[%s14012_s2 + $0x18] sm:$0xff] }
 0x396   : > { %11310 = vmatmul.mubr.msk.f32.vlgmr.msra.gmra.mrb[78].mxu1 %vm314_vm1, %v2996_v58 }
 0x397   : > { %11319 = vmatprep.mubr.msk.f32.mxu1 %vm12153_vm0, %v12152_v0 }
 0x399   : > { %v2961_v48 = vpop.xlane.xlu1 %2960 }
 0x39a   : > { %11930 = vrcp.f32 %v2961_v48 }
 0x3a4   : > { %v11931_v9 = vpop.eup %11930 }
 0x3a5   : > { %v2994_v36 = vmul.f32 %v11931_v9, %v12906_v3 }
 0x3a7   : > { %11305 = vmatmul.mubr.msk.f32.vlgmr.msra.gmra.mrb[78].mxu0 %vm314_vm1, %v2994_v36 }
 0x3a8   : > { %11314 = vmatprep.mubr.msk.f32.mxu0 %vm12153_vm0, %v12152_v0 }
 0x43f   : > { %v3066_v44 = vpop.f32.mrb[64].mxu0  ;;  %v3139_v13 = vpop.f32.mrb[64].mxu1 }
 0x440   : > { %v11236_v11 = vpop.f32.mrb[65].mxu0  ;;  %v11241_v14 = vpop.f32.mrb[65].mxu1  ;;  %11313 = vmatpush3.msra.mxu0 %v3066_v44  ;;  %11318 = vmatpush3.msra.mxu1 %v3139_v13 }
 0x441   : > { %11322 = vmatprep.subr.mxu0 %v12152_v0  ;;  %11327 = vmatprep.subr.mxu1 %v12152_v0 }
 0x442   : > { %11315 = vmatmul.mubr.msk.f32.vlgmr.msra.gmra.mrb[80].mxu0 %vm314_vm1, %v13027_v56  ;;  %11320 = vmatmul.mubr.msk.f32.vlgmr.msra.gmra.mrb[80].mxu1 %vm314_vm1, %v13027_v56 }
 0x443   : > { %11324 = vmatprep.mubr.msk.f32.mxu0 %vm12153_vm0, %v12152_v0  ;;  %11329 = vmatprep.mubr.msk.f32.mxu1 %vm12153_vm0, %v12152_v0 }
 0x444   : > { %v3212_v3 = vpop.f32.mrb[66].mxu0  ;;  %v3285_v20 = vpop.f32.mrb[66].mxu1 }
 0x445   : > { %v11246_v18 = vpop.f32.mrb[67].mxu0  ;;  %v11251_v21 = vpop.f32.mrb[67].mxu1  ;;  %11323 = vmatpush3.msra.mxu0 %v3212_v3  ;;  %11328 = vmatpush3.msra.mxu1 %v3285_v20 }
 0x446   : > { %11332 = vmatprep.subr.mxu0 %v12152_v0  ;;  %11337 = vmatprep.subr.mxu1 %v12152_v0 }
 0x447   : > { %11325 = vmatmul.mubr.msk.f32.vlgmr.msra.gmra.mrb[82].mxu0 %vm314_vm1, %v13027_v56  ;;  %11330 = vmatmul.mubr.msk.f32.vlgmr.msra.gmra.mrb[82].mxu1 %vm314_vm1, %v13027_v56 }
 0x448   : > { %v3358_v25 = vpop.f32.mrb[68].mxu0  ;;  %v3431_v30 = vpop.f32.mrb[68].mxu1  ;;  %11334 = vmatprep.mubr.msk.f32.mxu0 %vm12153_vm0, %v12152_v0  ;;  %11339 = vmatprep.mubr.msk.f32.mxu1 %vm12153_vm0, %v12152_v0 }
 0x449   : > { %v11256_v57 = vpop.f32.mrb[69].mxu0  ;;  %v11261_v33 = vpop.f32.mrb[69].mxu1  ;;  %11333 = vmatpush3.msra.mxu0 %v3358_v25  ;;  %11338 = vmatpush3.msra.mxu1 %v3431_v30 }
 0x44a   : > { %11342 = vmatprep.subr.mxu0 %v12152_v0  ;;  %11347 = vmatprep.subr.mxu1 %v12152_v0 }
 0x44b   : > { %11335 = vmatmul.mubr.msk.f32.vlgmr.msra.gmra.mrb[84].mxu0 %vm314_vm1, %v13027_v56  ;;  %11340 = vmatmul.mubr.msk.f32.vlgmr.msra.gmra.mrb[84].mxu1 %vm314_vm1, %v13027_v56 }
 0x44c   : > { %v3504_v29 = vpop.f32.mrb[70].mxu0  ;;  %v3577_v37 = vpop.f32.mrb[70].mxu1  ;;  %11344 = vmatprep.mubr.msk.f32.mxu0 %vm12153_vm0, %v12152_v0  ;;  %11349 = vmatprep.mubr.msk.f32.mxu1 %vm12153_vm0, %v12152_v0 }
 0x44d   : > { %v11266_v38 = vpop.f32.mrb[71].mxu0  ;;  %v11271_v5 = vpop.f32.mrb[71].mxu1  ;;  %11343 = vmatpush3.msra.mxu0 %v3504_v29  ;;  %11348 = vmatpush3.msra.mxu1 %v3577_v37 }
 0x44e   : > { %11352 = vmatprep.subr.mxu0 %v12152_v0  ;;  %11357 = vmatprep.subr.mxu1 %v12152_v0 }
 0x44f   : > { %11345 = vmatmul.mubr.msk.f32.vlgmr.msra.gmra.mrb[86].mxu0 %vm314_vm1, %v13027_v56  ;;  %11350 = vmatmul.mubr.msk.f32.vlgmr.msra.gmra.mrb[86].mxu1 %vm314_vm1, %v13027_v56 }
 0x450   : > { %v3650_v12 = vpop.f32.mrb[72].mxu0  ;;  %v3723_v27 = vpop.f32.mrb[72].mxu1  ;;  %11354 = vmatprep.mubr.msk.f32.mxu0 %vm12153_vm0, %v12152_v0  ;;  %11359 = vmatprep.mubr.msk.f32.mxu1 %vm12153_vm0, %v12152_v0 }
 0x451   : > { %v11276_v53 = vpop.f32.mrb[73].mxu0  ;;  %v11281_v54 = vpop.f32.mrb[73].mxu1  ;;  %11353 = vmatpush3.msra.mxu0 %v3650_v12  ;;  %11358 = vmatpush3.msra.mxu1 %v3723_v27 }
 0x452   : > { %11362 = vmatprep.subr.mxu0 %v12152_v0  ;;  %11367 = vmatprep.subr.mxu1 %v12152_v0 }
 0x453   : > { %11355 = vmatmul.mubr.msk.f32.vlgmr.msra.gmra.mrb[88].mxu0 %vm314_vm1, %v13027_v56  ;;  %11360 = vmatmul.mubr.msk.f32.vlgmr.msra.gmra.mrb[88].mxu1 %vm314_vm1, %v13027_v56 }
 0x454   : > { %v3796_v40 = vpop.f32.mrb[74].mxu0  ;;  %11364 = vmatprep.mubr.msk.f32.mxu0 %vm12153_vm0, %v12152_v0  ;;  %11369 = vmatprep.mubr.msk.f32.mxu1 %vm12153_vm0, %v12152_v0 }
 0x455   : > { %v11286_v49 = vpop.f32.mrb[75].mxu0  ;;  %11363 = vmatpush3.msra.mxu0 %v3796_v40 }
 0x456   : > { %v3869_v17 = vpop.f32.mrb[74].mxu1  ;;  %11372 = vmatprep.subr.mxu0 %v12152_v0 }
 0x457   : > { %v11291_v45 = vpop.f32.mrb[75].mxu1  ;;  %11368 = vmatpush3.msra.mxu1 %v3869_v17  ;;  %11365 = vmatmul.mubr.msk.f32.vlgmr.msra.gmra.mrb[90].mxu0 %vm314_vm1, %v13027_v56 }
 0x458   : > { %11377 = vmatprep.subr.mxu1 %v12152_v0  ;;  %11370 = vmatmul.mubr.msk.f32.vlgmr.msra.gmra.mrb[90].mxu1 %vm314_vm1, %v13027_v56 }
 0x459   : > { %11379 = vmatprep.mubr.msk.f32.mxu1 %vm12153_vm0, %v12152_v0  ;;  %11374 = vmatprep.mubr.msk.f32.mxu0 %vm12153_vm0, %v12152_v0 }
 0x45d   : > { %v3942_v47 = vpop.f32.mrb[76].mxu0 }
 0x45e   : > { %v11296_v6 = vpop.f32.mrb[77].mxu0  ;;  %11373 = vmatpush3.msra.mxu0 %v3942_v47 }
 0x45f   : > { %11375 = vmatmul.mubr.msk.f32.vlgmr.msra.gmra.mrb[92].mxu0 %vm314_vm1, %v13027_v56  ;;  %11382 = vmatprep.subr.mxu0 %v12152_v0 }
 0x460   : > { %11384 = vmatprep.mubr.msk.f32.mxu0 %vm12153_vm0, %v12152_v0 }
 0x461   : > { %v4015_v7 = vpop.f32.mrb[76].mxu1 }
 0x462   : > { %v11301_v2 = vpop.f32.mrb[77].mxu1  ;;  %11378 = vmatpush3.msra.mxu1 %v4015_v7 }
 0x463   : > { %11380 = vmatmul.mubr.msk.f32.vlgmr.msra.gmra.mrb[92].mxu1 %vm314_vm1, %v13027_v56  ;;  %11387 = vmatprep.subr.mxu1 %v12152_v0 }
 0x464   : > { %11389 = vmatprep.mubr.msk.f32.mxu1 %vm12153_vm0, %v12152_v0 }
 0x469   : > { %v4161_v32 = vpop.f32.mrb[78].mxu1 }
 0x46a   : > { %v11311_v51 = vpop.f32.mrb[79].mxu1  ;;  %11388 = vmatpush3.msra.mxu1 %v4161_v32 }
 0x46b   : > { %11390 = vmatmul.mubr.msk.f32.vlgmr.msra.gmra.mrb[94].mxu1 %vm314_vm1, %v13027_v56  ;;  %11403 = vmatprep.subr.mxu1 %v12152_v0 }
 0x46c   : > { %11404 = vmatpush3.msra.mxu1 %v276_v46  ;;  %11405 = vmatprep.mubr.msk.f32.mxu1 %vm12153_vm0, %v12152_v0 }
 0x46d   : > { %11425 = vmatprep.subr.mxu1 %v12152_v0 }
 0x46f   : > { %11406 = vmatmul.mubr.msk.f32.vlgmr.msra.gmra.mrb[96].mxu1 %vm314_vm1, %v13110_v22 }
 0x470   : > { %11408 = vmatprep.mubr.msk.f32.mxu1 %vm12153_vm0, %v12152_v0  ;;  %11426 = vmatpush3.msra.mxu1 %v278_v55 }
 0x471   : > { %11447 = vmatprep.subr.mxu1 %v12152_v0 }
 0x473   : > { %11409 = vmatmul.mubr.msk.f32.gmra.mrb[98].mxu1 %vm314_vm1, %v13120_v24 }
 0x474   : > { %11411 = vmatprep.mubr.msk.f32.mxu1 %vm12153_vm0, %v12152_v0 }
 0x477   : > { %11412 = vmatmul.mubr.msk.f32.gmra.mrb[100].mxu1 %vm314_vm1, %v13129_v39 }
 0x478   : > { %11427 = vmatprep.mubr.msk.f32.mxu1 %vm12153_vm0, %v12152_v0 }
 0x47a   : > { %v4088_v52 = vpop.f32.mrb[78].mxu0 }
 0x47b   : > { %v11306_v42 = vpop.f32.mrb[79].mxu0  ;;  %11383 = vmatpush3.msra.mxu0 %v4088_v52  ;;  %11428 = vmatmul.mubr.msk.f32.vlgmr.msra.gmra.mrb[102].mxu1 %vm314_vm1, %v13110_v22 }
 0x47c   : > { %11385 = vmatmul.mubr.msk.f32.vlgmr.msra.gmra.mrb[94].mxu0 %vm314_vm1, %v13027_v56  ;;  %11392 = vmatprep.subr.mxu0 %v12152_v0 }
 0x47d   : > { %11430 = vmatprep.mubr.msk.f32.mxu1 %vm12153_vm0, %v12152_v0  ;;  %11393 = vmatpush3.msra.mxu0 %v275_v62 }
 0x47e   : > { %11394 = vmatprep.mubr.msk.f32.mxu0 %vm12153_vm0, %v12152_v0  ;;  %11414 = vmatprep.subr.mxu0 %v12152_v0 }
 0x47f   : > { %11431 = vmatmul.mubr.msk.f32.gmra.mrb[104].mxu1 %vm314_vm1, %v13120_v24 }
 0x480   : > { %11395 = vmatmul.mubr.msk.f32.vlgmr.msra.gmra.mrb[96].mxu0 %vm314_vm1, %v13110_v22  ;;  %11433 = vmatprep.mubr.msk.f32.mxu1 %vm12153_vm0, %v12152_v0 }
 0x481   : > { %11397 = vmatprep.mubr.msk.f32.mxu0 %vm12153_vm0, %v12152_v0  ;;  %11415 = vmatpush3.msra.mxu0 %v277_v43 }
 0x482   : > { %11448 = vmatpush3.msra.mxu1 %v280_v59  ;;  %11436 = vmatprep.subr.mxu0 %v12152_v0 }
 0x483   : > { %11434 = vmatmul.mubr.msk.f32.gmra.mrb[106].mxu1 %vm314_vm1, %v13129_v39  ;;  %11469 = vmatprep.subr.mxu1 %v12152_v0 }
 0x484   : > { %11398 = vmatmul.mubr.msk.f32.gmra.mrb[98].mxu0 %vm314_vm1, %v13120_v24  ;;  %11449 = vmatprep.mubr.msk.f32.mxu1 %vm12153_vm0, %v12152_v0 }
 0x485   : > { %11400 = vmatprep.mubr.msk.f32.mxu0 %vm12153_vm0, %v12152_v0 }
 0x487   : > { %11450 = vmatmul.mubr.msk.f32.vlgmr.msra.gmra.mrb[108].mxu1 %vm314_vm1, %v13110_v22 }
 0x488   : > { %11401 = vmatmul.mubr.msk.f32.gmra.mrb[100].mxu0 %vm314_vm1, %v13129_v39  ;;  %11452 = vmatprep.mubr.msk.f32.mxu1 %vm12153_vm0, %v12152_v0 }
 0x489   : > { %11416 = vmatprep.mubr.msk.f32.mxu0 %vm12153_vm0, %v12152_v0  ;;  %11470 = vmatpush3.msra.mxu1 %v282_v41 }
 0x48a   : > { %11491 = vmatprep.subr.mxu1 %v12152_v0 }
 0x48b   : > { %11453 = vmatmul.mubr.msk.f32.gmra.mrb[110].mxu1 %vm314_vm1, %v13120_v24 }
 0x48c   : > { %11417 = vmatmul.mubr.msk.f32.vlgmr.msra.gmra.mrb[102].mxu0 %vm314_vm1, %v13110_v22  ;;  %11455 = vmatprep.mubr.msk.f32.mxu1 %vm12153_vm0, %v12152_v0 }
 0x48d   : > { %11419 = vmatprep.mubr.msk.f32.mxu0 %vm12153_vm0, %v12152_v0  ;;  %11437 = vmatpush3.msra.mxu0 %v279_v50 }
 0x48e   : > { %11458 = vmatprep.subr.mxu0 %v12152_v0 }
 0x48f   : > { %11456 = vmatmul.mubr.msk.f32.gmra.mrb[112].mxu1 %vm314_vm1, %v13129_v39 }
 0x490   : > { %11420 = vmatmul.mubr.msk.f32.gmra.mrb[104].mxu0 %vm314_vm1, %v13120_v24  ;;  %11471 = vmatprep.mubr.msk.f32.mxu1 %vm12153_vm0, %v12152_v0 }
 0x491   : > { %11422 = vmatprep.mubr.msk.f32.mxu0 %vm12153_vm0, %v12152_v0 }
 0x493   : > { %11472 = vmatmul.mubr.msk.f32.vlgmr.msra.gmra.mrb[114].mxu1 %vm314_vm1, %v13110_v22 }
 0x494   : > { %11423 = vmatmul.mubr.msk.f32.gmra.mrb[106].mxu0 %vm314_vm1, %v13129_v39  ;;  %11474 = vmatprep.mubr.msk.f32.mxu1 %vm12153_vm0, %v12152_v0 }
 0x495   : > { %11438 = vmatprep.mubr.msk.f32.mxu0 %vm12153_vm0, %v12152_v0  ;;  %11492 = vmatpush3.msra.mxu1 %v284_v63 }
 0x496   : > { %11513 = vmatprep.subr.mxu1 %v12152_v0 }
 0x497   : > { %11475 = vmatmul.mubr.msk.f32.gmra.mrb[116].mxu1 %vm314_vm1, %v13120_v24 }
 0x498   : > { %11439 = vmatmul.mubr.msk.f32.vlgmr.msra.gmra.mrb[108].mxu0 %vm314_vm1, %v13110_v22  ;;  %11477 = vmatprep.mubr.msk.f32.mxu1 %vm12153_vm0, %v12152_v0 }
 0x499   : > { %11441 = vmatprep.mubr.msk.f32.mxu0 %vm12153_vm0, %v12152_v0  ;;  %11459 = vmatpush3.msra.mxu0 %v281_v60 }
 0x49a   : > { %11480 = vmatprep.subr.mxu0 %v12152_v0 }
 0x49b   : > { %11478 = vmatmul.mubr.msk.f32.gmra.mrb[118].mxu1 %vm314_vm1, %v13129_v39 }
 0x49c   : > { %11442 = vmatmul.mubr.msk.f32.gmra.mrb[110].mxu0 %vm314_vm1, %v13120_v24  ;;  %11493 = vmatprep.mubr.msk.f32.mxu1 %vm12153_vm0, %v12152_v0 }
 0x49d   : > { %11444 = vmatprep.mubr.msk.f32.mxu0 %vm12153_vm0, %v12152_v0 }
 0x49f   : > { %11494 = vmatmul.mubr.msk.f32.vlgmr.msra.gmra.mrb[120].mxu1 %vm314_vm1, %v13110_v22 }
 0x4a0   : > { %11445 = vmatmul.mubr.msk.f32.gmra.mrb[112].mxu0 %vm314_vm1, %v13129_v39  ;;  %11496 = vmatprep.mubr.msk.f32.mxu1 %vm12153_vm0, %v12152_v0 }
 0x4a1   : > { %11460 = vmatprep.mubr.msk.f32.mxu0 %vm12153_vm0, %v12152_v0  ;;  %11514 = vmatpush3.msra.mxu1 %v286_v61 }
 0x4a2   : > { %11535 = vmatprep.subr.mxu1 %v12152_v0 }
 0x4a3   : > { %11497 = vmatmul.mubr.msk.f32.gmra.mrb[122].mxu1 %vm314_vm1, %v13120_v24 }
 0x4a4   : > { %11461 = vmatmul.mubr.msk.f32.vlgmr.msra.gmra.mrb[114].mxu0 %vm314_vm1, %v13110_v22  ;;  %11499 = vmatprep.mubr.msk.f32.mxu1 %vm12153_vm0, %v12152_v0 }
 0x4a5   : > { %11463 = vmatprep.mubr.msk.f32.mxu0 %vm12153_vm0, %v12152_v0  ;;  %11481 = vmatpush3.msra.mxu0 %v283_v1 }
 0x4a6   : > { %11502 = vmatprep.subr.mxu0 %v12152_v0 }
 0x4a7   : > { %11500 = vmatmul.mubr.msk.f32.gmra.mrb[124].mxu1 %vm314_vm1, %v13129_v39 }
 0x4a8   : > { %11464 = vmatmul.mubr.msk.f32.gmra.mrb[116].mxu0 %vm314_vm1, %v13120_v24  ;;  %11515 = vmatprep.mubr.msk.f32.mxu1 %vm12153_vm0, %v12152_v0 }
 0x4a9   : > { %11466 = vmatprep.mubr.msk.f32.mxu0 %vm12153_vm0, %v12152_v0 }
 0x4ab   : > { %11516 = vmatmul.mubr.msk.f32.vlgmr.msra.gmra.mrb[126].mxu1 %vm314_vm1, %v13110_v22 }
 0x4ac   : > { %11467 = vmatmul.mubr.msk.f32.gmra.mrb[118].mxu0 %vm314_vm1, %v13129_v39  ;;  %11518 = vmatprep.mubr.msk.f32.mxu1 %vm12153_vm0, %v12152_v0 }
 0x4ad   : > { %11482 = vmatprep.mubr.msk.f32.mxu0 %vm12153_vm0, %v12152_v0  ;;  %11536 = vmatpush3.msra.mxu1 %v288_v26 }
 0x4ae   : > { %11557 = vmatprep.subr.mxu1 %v12152_v0 }
 0x4af   : > { %11519 = vmatmul.mubr.msk.f32.gmra.mrb[128].mxu1 %vm314_vm1, %v13120_v24 }
 0x4b0   : > { %11483 = vmatmul.mubr.msk.f32.vlgmr.msra.gmra.mrb[120].mxu0 %vm314_vm1, %v13110_v22  ;;  %11521 = vmatprep.mubr.msk.f32.mxu1 %vm12153_vm0, %v12152_v0 }
 0x4b1   : > { %11485 = vmatprep.mubr.msk.f32.mxu0 %vm12153_vm0, %v12152_v0  ;;  %11503 = vmatpush3.msra.mxu0 %v285_v15 }
 0x4b2   : > { %11524 = vmatprep.subr.mxu0 %v12152_v0 }
 0x4b3   : > { %11522 = vmatmul.mubr.msk.f32.gmra.mrb[130].mxu1 %vm314_vm1, %v13129_v39 }
 0x4b4   : > { %11486 = vmatmul.mubr.msk.f32.gmra.mrb[122].mxu0 %vm314_vm1, %v13120_v24  ;;  %11537 = vmatprep.mubr.msk.f32.mxu1 %vm12153_vm0, %v12152_v0 }
 0x4b5   : > { %11488 = vmatprep.mubr.msk.f32.mxu0 %vm12153_vm0, %v12152_v0 }
 0x4b7   : > { %11538 = vmatmul.mubr.msk.f32.vlgmr.msra.gmra.mrb[132].mxu1 %vm314_vm1, %v13110_v22 }
 0x4b8   : > { %11489 = vmatmul.mubr.msk.f32.gmra.mrb[124].mxu0 %vm314_vm1, %v13129_v39  ;;  %11540 = vmatprep.mubr.msk.f32.mxu1 %vm12153_vm0, %v12152_v0 }
 0x4b9   : > { %11504 = vmatprep.mubr.msk.f32.mxu0 %vm12153_vm0, %v12152_v0  ;;  %11558 = vmatpush3.msra.mxu1 %v290_v31 }
 0x4ba   : > { %11573 = vmatprep.subr.mxu1 %v12152_v0 }
 0x4bb   : > { %11541 = vmatmul.mubr.msk.f32.gmra.mrb[134].mxu1 %vm314_vm1, %v13120_v24 }
 0x4bc   : > { %11505 = vmatmul.mubr.msk.f32.vlgmr.msra.gmra.mrb[126].mxu0 %vm314_vm1, %v13110_v22  ;;  %11543 = vmatprep.mubr.msk.f32.mxu1 %vm12153_vm0, %v12152_v0 }
 0x4bd   : > { %11507 = vmatprep.mubr.msk.f32.mxu0 %vm12153_vm0, %v12152_v0  ;;  %11525 = vmatpush3.msra.mxu0 %v287_v10 }
 0x4be   : > { %11546 = vmatprep.subr.mxu0 %v12152_v0 }
 0x4bf   : > { %11544 = vmatmul.mubr.msk.f32.gmra.mrb[136].mxu1 %vm314_vm1, %v13129_v39 }
 0x4c0   : > { %11508 = vmatmul.mubr.msk.f32.gmra.mrb[128].mxu0 %vm314_vm1, %v13120_v24  ;;  %11559 = vmatprep.mubr.msk.f32.mxu1 %vm12153_vm0, %v12152_v0 }
 0x4c1   : > { %11510 = vmatprep.mubr.msk.f32.mxu0 %vm12153_vm0, %v12152_v0 }
 0x4c3   : > { %11560 = vmatmul.mubr.msk.f32.vlgmr.msra.gmra.mrb[138].mxu1 %vm314_vm1, %v13110_v22 }
 0x4c4   : > { %11511 = vmatmul.mubr.msk.f32.gmra.mrb[130].mxu0 %vm314_vm1, %v13129_v39  ;;  %11562 = vmatprep.mubr.msk.f32.mxu1 %vm12153_vm0, %v12152_v0 }
 0x4c5   : > { %11526 = vmatprep.mubr.msk.f32.mxu0 %vm12153_vm0, %v12152_v0 }
 0x4c7   : > { %11563 = vmatmul.mubr.msk.f32.gmra.mrb[140].mxu1 %vm314_vm1, %v13120_v24 }
 0x4c8   : > { %11527 = vmatmul.mubr.msk.f32.vlgmr.msra.gmra.mrb[132].mxu0 %vm314_vm1, %v13110_v22  ;;  %11565 = vmatprep.mubr.msk.f32.mxu1 %vm12153_vm0, %v12152_v0 }
 0x4c9   : > { %11529 = vmatprep.mubr.msk.f32.mxu0 %vm12153_vm0, %v12152_v0  ;;  %11547 = vmatpush3.msra.mxu0 %v289_v16 }
 0x4ca   : > { %11568 = vmatprep.subr.mxu0 %v12152_v0 }
 0x4cb   : > { %11566 = vmatmul.mubr.msk.f32.gmra.mrb[142].mxu1 %vm314_vm1, %v13129_v39 }
 0x4cc   : > { %11530 = vmatmul.mubr.msk.f32.gmra.mrb[134].mxu0 %vm314_vm1, %v13120_v24  ;;  %11575 = vmatprep.mubr.msk.f32.mxu1 %vm12153_vm0, %v12152_v0 }
 0x4cd   : > { %11532 = vmatprep.mubr.msk.f32.mxu0 %vm12153_vm0, %v12152_v0 }
 0x4d0   : > { %11533 = vmatmul.mubr.msk.f32.gmra.mrb[136].mxu0 %vm314_vm1, %v13129_v39 }
 0x4d1   : > { %11548 = vmatprep.mubr.msk.f32.mxu0 %vm12153_vm0, %v12152_v0 }
 0x4d4   : > { %11549 = vmatmul.mubr.msk.f32.vlgmr.msra.gmra.mrb[138].mxu0 %vm314_vm1, %v13110_v22 }
 0x4d5   : > { %11551 = vmatprep.mubr.msk.f32.mxu0 %vm12153_vm0, %v12152_v0 }
 0x4d8   : > { %11552 = vmatmul.mubr.msk.f32.gmra.mrb[140].mxu0 %vm314_vm1, %v13120_v24 }
 0x4d9   : > { %11554 = vmatprep.mubr.msk.f32.mxu0 %vm12153_vm0, %v12152_v0 }
 0x4dc   : > { %11555 = vmatmul.mubr.msk.f32.gmra.mrb[142].mxu0 %vm314_vm1, %v13129_v39 }
 0x4dd   : > { %11570 = vmatprep.mubr.msk.f32.mxu0 %vm12153_vm0, %v12152_v0 }
 0x515   : > { %v13348_v4 = vpop.f32.mrb[80].mxu0  ;;  %v13350_v8 = vpop.f32.mrb[80].mxu1 }
 0x516   : > { %v11316_v34 = vpop.f32.mrb[81].mxu0  ;;  %v11321_v35 = vpop.f32.mrb[81].mxu1 }
 0x51a   : > { %v13352_v58 = vpop.f32.mrb[82].mxu1  ;;  %v13354_v48 = vpop.f32.mrb[82].mxu0 }
 0x51b   : > { %v11331_v9 = vpop.f32.mrb[83].mxu1  ;;  %v11326_v36 = vpop.f32.mrb[83].mxu0 }
 0x51e   : > { %v13356_v44 = vpop.f32.mrb[84].mxu1  ;;  %v13358_v13 = vpop.f32.mrb[84].mxu0 }
 0x51f   : > { %v11341_v56 = vpop.f32.mrb[85].mxu1  ;;  %v11336_v11 = vpop.f32.mrb[85].mxu0 }
 0x522   : > { %v13360_v14 = vpop.f32.mrb[86].mxu1  ;;  %v13362_v3 = vpop.f32.mrb[86].mxu0 }
 0x523   : > { %v11351_v20 = vpop.f32.mrb[87].mxu1  ;;  %v11346_v18 = vpop.f32.mrb[87].mxu0 }
 0x526   : > { %v13364_v21 = vpop.f32.mrb[88].mxu1  ;;  %v13366_v25 = vpop.f32.mrb[88].mxu0 }
 0x527   : > { %v11361_v30 = vpop.f32.mrb[89].mxu1  ;;  %v11356_v57 = vpop.f32.mrb[89].mxu0 }
 0x52a   : > { %v13368_v33 = vpop.f32.mrb[90].mxu0 }
 0x52b   : > { %v13370_v29 = vpop.f32.mrb[90].mxu1  ;;  %v11366_v37 = vpop.f32.mrb[91].mxu0 }
 0x52c   : > { %v11371_v38 = vpop.f32.mrb[91].mxu1 }
 0x532   : > { %v13372_v5 = vpop.f32.mrb[92].mxu0 }
 0x533   : > { %v11376_v12 = vpop.f32.mrb[93].mxu0 }
 0x536   : > { %v13374_v27 = vpop.f32.mrb[92].mxu1 }
 0x537   : > { %v11381_v53 = vpop.f32.mrb[93].mxu1 }
 0x53e   : > { %v13376_v54 = vpop.f32.mrb[94].mxu1 }
 0x53f   : > { %v11391_v40 = vpop.f32.mrb[95].mxu1 }
 0x542   : > { %v5439_v49 = vpop.f32.mrb[96].mxu1 }
 0x543   : > { %v11407_v17 = vpop.f32.mrb[97].mxu1  ;;  %v5440_v7 = vadd.f32 %v5439_v49, %v12617_v28 }
 0x546   : > { %v5444_v45 = vpop.f32.mrb[98].mxu1 }
 0x547   : > { %v5445_v47 = vadd.f32 %v5444_v45, %v12615_v23  ;;  %v11410_v6 = vpop.f32.mrb[99].mxu1 }
 0x549   : > { %11574 = vmatpush3.xpose.msk.msra.mxu1 %vm1604_vm2, %v5445_v47 }
 0x54a   : > { %v13381_v2 = vpop.f32.mrb[100].mxu1  ;;  %11583 = vmatprep.subr.mxu1 %v12152_v0 }
 0x54b   : > { %v11413_v32 = vpop.f32.mrb[101].mxu1 }
 0x54c   : > { %11576 = vmatmul.mubr.msk.f32.vlgmr.msra.gmra.mrb[144].mxu1 %vm1604_vm2, %v5440_v7 }
 0x54d   : > { %11585 = vmatprep.mubr.msk.f32.mxu1 %vm12153_vm0, %v12152_v0 }
 0x54e   : > { %v5599_v46 = vpop.f32.mrb[102].mxu1 }
 0x54f   : > { %v13387_v51 = vpop.f32.mrb[94].mxu0  ;;  %v11429_v55 = vpop.f32.mrb[103].mxu1  ;;  %v5600_v43 = vadd.f32 %v5599_v46, %v12617_v28 }
 0x550   : > { %v11386_v22 = vpop.f32.mrb[95].mxu0 }
 0x552   : > { %v5604_v24 = vpop.f32.mrb[104].mxu1 }
 0x553   : > { %v5605_v39 = vadd.f32 %v5604_v24, %v12615_v23  ;;  %v5359_v52 = vpop.f32.mrb[96].mxu0  ;;  %v11432_v62 = vpop.f32.mrb[105].mxu1 }
 0x554   : > { %v11396_v42 = vpop.f32.mrb[97].mxu0  ;;  %v5360_v1 = vadd.f32 %v5359_v52, %v12617_v28 }
 0x555   : > { %11584 = vmatpush3.xpose.msk.msra.mxu1 %vm1604_vm2, %v5605_v39 }
 0x556   : > { %v13392_v59 = vpop.f32.mrb[106].mxu1  ;;  %11593 = vmatprep.subr.mxu1 %v12152_v0 }
 0x557   : > { %v5364_v41 = vpop.f32.mrb[98].mxu0  ;;  %v11435_v50 = vpop.f32.mrb[107].mxu1 }
 0x558   : > { %v5365_v63 = vadd.f32 %v5364_v41, %v12615_v23  ;;  %v11399_v60 = vpop.f32.mrb[99].mxu0  ;;  %11586 = vmatmul.mubr.msk.f32.vlgmr.msra.gmra.mrb[146].mxu1 %vm1604_vm2, %v5600_v43 }
 0x559   : > { %11595 = vmatprep.mubr.msk.f32.mxu1 %vm12153_vm0, %v12152_v0 }
 0x55a   : > { %v5759_v61 = vpop.f32.mrb[108].mxu1  ;;  %11569 = vmatpush3.xpose.msk.msra.mxu0 %vm1604_vm2, %v5365_v63 }
 0x55b   : > { %v13401_v26 = vpop.f32.mrb[100].mxu0  ;;  %v11451_v15 = vpop.f32.mrb[109].mxu1  ;;  %11578 = vmatprep.subr.mxu0 %v12152_v0  ;;  %v5760_v36 = vadd.f32 %v5759_v61, %v12617_v28 }
 0x55c   : > { %v11402_v31 = vpop.f32.mrb[101].mxu0 }
 0x55d   : > { %11571 = vmatmul.mubr.msk.f32.vlgmr.msra.gmra.mrb[144].mxu0 %vm1604_vm2, %v5360_v1 }
 0x55e   : > { %v5764_v10 = vpop.f32.mrb[110].mxu1  ;;  %11580 = vmatprep.mubr.msk.f32.mxu0 %vm12153_vm0, %v12152_v0 }
 0x55f   : > { %v5765_v16 = vadd.f32 %v5764_v10, %v12615_v23  ;;  %v5519_v34 = vpop.f32.mrb[102].mxu0  ;;  %v11454_v35 = vpop.f32.mrb[111].mxu1 }
 0x560   : > { %v11418_v9 = vpop.f32.mrb[103].mxu0  ;;  %v5520_v37 = vadd.f32 %v5519_v34, %v12617_v28 }
 0x561   : > { %11594 = vmatpush3.xpose.msk.msra.mxu1 %vm1604_vm2, %v5765_v16 }
 0x562   : > { %v13410_v56 = vpop.f32.mrb[112].mxu1  ;;  %11603 = vmatprep.subr.mxu1 %v12152_v0 }
 0x563   : > { %v5524_v11 = vpop.f32.mrb[104].mxu0  ;;  %v11457_v20 = vpop.f32.mrb[113].mxu1 }
 0x564   : > { %v5525_v18 = vadd.f32 %v5524_v11, %v12615_v23  ;;  %v11421_v30 = vpop.f32.mrb[105].mxu0  ;;  %11596 = vmatmul.mubr.msk.f32.vlgmr.msra.gmra.mrb[148].mxu1 %vm1604_vm2, %v5760_v36 }
 0x565   : > { %11605 = vmatprep.mubr.msk.f32.mxu1 %vm12153_vm0, %v12152_v0 }
 0x566   : > { %v5919_v57 = vpop.f32.mrb[114].mxu1  ;;  %11579 = vmatpush3.xpose.msk.msra.mxu0 %vm1604_vm2, %v5525_v18 }
 0x567   : > { %v13419_v38 = vpop.f32.mrb[106].mxu0  ;;  %v11473_v12 = vpop.f32.mrb[115].mxu1  ;;  %11588 = vmatprep.subr.mxu0 %v12152_v0  ;;  %v5920_v6 = vadd.f32 %v5919_v57, %v12617_v28 }
 0x568   : > { %v11424_v53 = vpop.f32.mrb[107].mxu0 }
 0x569   : > { %11581 = vmatmul.mubr.msk.f32.vlgmr.msra.gmra.mrb[146].mxu0 %vm1604_vm2, %v5520_v37 }
 0x56a   : > { %v5924_v40 = vpop.f32.mrb[116].mxu1  ;;  %11590 = vmatprep.mubr.msk.f32.mxu0 %vm12153_vm0, %v12152_v0 }
 0x56b   : > { %v5925_v49 = vadd.f32 %v5924_v40, %v12615_v23  ;;  %v5679_v17 = vpop.f32.mrb[108].mxu0  ;;  %v11476_v45 = vpop.f32.mrb[117].mxu1 }
 0x56c   : > { %v11440_v47 = vpop.f32.mrb[109].mxu0  ;;  %v5680_v39 = vadd.f32 %v5679_v17, %v12617_v28 }
 0x56d   : > { %11604 = vmatpush3.xpose.msk.msra.mxu1 %vm1604_vm2, %v5925_v49 }
 0x56e   : > { %v13428_v7 = vpop.f32.mrb[118].mxu1  ;;  %11613 = vmatprep.subr.mxu1 %v12152_v0 }
 0x56f   : > { %v5684_v32 = vpop.f32.mrb[110].mxu0  ;;  %v11479_v46 = vpop.f32.mrb[119].mxu1 }
 0x570   : > { %v5685_v55 = vadd.f32 %v5684_v32, %v12615_v23  ;;  %v11443_v22 = vpop.f32.mrb[111].mxu0  ;;  %11606 = vmatmul.mubr.msk.f32.vlgmr.msra.gmra.mrb[150].mxu1 %vm1604_vm2, %v5920_v6 }
 0x571   : > { %11615 = vmatprep.mubr.msk.f32.mxu1 %vm12153_vm0, %v12152_v0 }
 0x572   : > { %v6079_v24 = vpop.f32.mrb[120].mxu1  ;;  %11589 = vmatpush3.xpose.msk.msra.mxu0 %vm1604_vm2, %v5685_v55 }
 0x573   : > { %v13437_v52 = vpop.f32.mrb[112].mxu0  ;;  %v11495_v62 = vpop.f32.mrb[121].mxu1  ;;  %11598 = vmatprep.subr.mxu0 %v12152_v0  ;;  %v6080_v61 = vadd.f32 %v6079_v24, %v12617_v28 }
 0x574   : > { %v11446_v42 = vpop.f32.mrb[113].mxu0 }
 0x575   : > { %11591 = vmatmul.mubr.msk.f32.vlgmr.msra.gmra.mrb[148].mxu0 %vm1604_vm2, %v5680_v39 }
 0x576   : > { %v6084_v43 = vpop.f32.mrb[122].mxu1  ;;  %11600 = vmatprep.mubr.msk.f32.mxu0 %vm12153_vm0, %v12152_v0 }
 0x577   : > { %v6085_v41 = vadd.f32 %v6084_v43, %v12615_v23  ;;  %v5839_v50 = vpop.f32.mrb[114].mxu0  ;;  %v11498_v63 = vpop.f32.mrb[123].mxu1 }
 0x578   : > { %v11462_v60 = vpop.f32.mrb[115].mxu0  ;;  %v5840_v35 = vadd.f32 %v5839_v50, %v12617_v28 }
 0x579   : > { %11614 = vmatpush3.xpose.msk.msra.mxu1 %vm1604_vm2, %v6085_v41 }
 0x57a   : > { %v13446_v1 = vpop.f32.mrb[124].mxu1  ;;  %11623 = vmatprep.subr.mxu1 %v12152_v0 }
 0x57b   : > { %v5844_v15 = vpop.f32.mrb[116].mxu0  ;;  %v11501_v31 = vpop.f32.mrb[125].mxu1 }
 0x57c   : > { %v5845_v10 = vadd.f32 %v5844_v15, %v12615_v23  ;;  %v11465_v16 = vpop.f32.mrb[117].mxu0  ;;  %11616 = vmatmul.mubr.msk.f32.vlgmr.msra.gmra.mrb[152].mxu1 %vm1604_vm2, %v6080_v61 }
 0x57d   : > { %11625 = vmatprep.mubr.msk.f32.mxu1 %vm12153_vm0, %v12152_v0 }
 0x57e   : > { %v6239_v34 = vpop.f32.mrb[126].mxu1  ;;  %11599 = vmatpush3.xpose.msk.msra.mxu0 %vm1604_vm2, %v5845_v10 }
 0x57f   : > { %v13455_v9 = vpop.f32.mrb[118].mxu0  ;;  %v11517_v36 = vpop.f32.mrb[127].mxu1  ;;  %11608 = vmatprep.subr.mxu0 %v12152_v0  ;;  %v6240_v12 = vadd.f32 %v6239_v34, %v12617_v28 }
 0x580   : > { %v11468_v11 = vpop.f32.mrb[119].mxu0 }
 0x581   : > { %11601 = vmatmul.mubr.msk.f32.vlgmr.msra.gmra.mrb[150].mxu0 %vm1604_vm2, %v5840_v35 }
 0x582   : > { %v6244_v20 = vpop.f32.mrb[128].mxu1  ;;  %11610 = vmatprep.mubr.msk.f32.mxu0 %vm12153_vm0, %v12152_v0 }
 0x583   : > { %v6245_v18 = vadd.f32 %v6244_v20, %v12615_v23  ;;  %v5999_v30 = vpop.f32.mrb[120].mxu0  ;;  %v11520_v57 = vpop.f32.mrb[129].mxu1 }
 0x584   : > { %v11484_v37 = vpop.f32.mrb[121].mxu0  ;;  %v6000_v6 = vadd.f32 %v5999_v30, %v12617_v28 }
 0x585   : > { %11624 = vmatpush3.xpose.msk.msra.mxu1 %vm1604_vm2, %v6245_v18  ;;  %v5450_v37 = vadd.f32 %v13381_v2, %v12910_v19 }
 0x586   : > { %v13464_v53 = vpop.f32.mrb[130].mxu1  ;;  %11633 = vmatprep.subr.mxu1 %v12152_v0 }
 0x587   : > { %v6004_v40 = vpop.f32.mrb[122].mxu0  ;;  %v11523_v49 = vpop.f32.mrb[131].mxu1 }
 0x588   : > { %v6005_v17 = vadd.f32 %v6004_v40, %v12615_v23  ;;  %v11487_v45 = vpop.f32.mrb[123].mxu0  ;;  %11626 = vmatmul.mubr.msk.f32.vlgmr.msra.gmra.mrb[154].mxu1 %vm1604_vm2, %v6240_v12 }
 0x589   : > { %11635 = vmatprep.mubr.msk.f32.mxu1 %vm12153_vm0, %v12152_v0 }
 0x58a   : > { %v6399_v47 = vpop.f32.mrb[132].mxu1  ;;  %11609 = vmatpush3.xpose.msk.msra.mxu0 %vm1604_vm2, %v6005_v17 }
 0x58b   : > { %v13473_v32 = vpop.f32.mrb[124].mxu0  ;;  %v11539_v46 = vpop.f32.mrb[133].mxu1  ;;  %11618 = vmatprep.subr.mxu0 %v12152_v0  ;;  %v6400_v43 = vadd.f32 %v6399_v47, %v12617_v28 }
 0x58c   : > { %v11490_v55 = vpop.f32.mrb[125].mxu0 }
 0x58d   : > { %11611 = vmatmul.mubr.msk.f32.vlgmr.msra.gmra.mrb[152].mxu0 %vm1604_vm2, %v6000_v6 }
 0x58e   : > { %v6404_v22 = vpop.f32.mrb[134].mxu1  ;;  %11620 = vmatprep.mubr.msk.f32.mxu0 %vm12153_vm0, %v12152_v0 }
 0x58f   : > { %v6405_v24 = vadd.f32 %v6404_v22, %v12615_v23  ;;  %v6159_v39 = vpop.f32.mrb[126].mxu0  ;;  %v11542_v62 = vpop.f32.mrb[135].mxu1 }
 0x590   : > { %v11506_v42 = vpop.f32.mrb[127].mxu0  ;;  %v6160_v31 = vadd.f32 %v6159_v39, %v12617_v28 }
 0x591   : > { %11634 = vmatpush3.xpose.msk.msra.mxu1 %vm1604_vm2, %v6405_v24  ;;  %v5370_v42 = vadd.f32 %v13401_v26, %v12910_v19 }
 0x592   : > { %v13482_v41 = vpop.f32.mrb[136].mxu1  ;;  %11643 = vmatprep.subr.mxu1 %v12152_v0 }
 0x593   : > { %v6164_v50 = vpop.f32.mrb[128].mxu0  ;;  %v11545_v63 = vpop.f32.mrb[137].mxu1 }
 0x594   : > { %v6165_v60 = vadd.f32 %v6164_v50, %v12615_v23  ;;  %v11509_v61 = vpop.f32.mrb[129].mxu0  ;;  %11636 = vmatmul.mubr.msk.f32.vlgmr.msra.gmra.mrb[156].mxu1 %vm1604_vm2, %v6400_v43 }
 0x595   : > { %11645 = vmatprep.mubr.msk.f32.mxu1 %vm12153_vm0, %v12152_v0 }
 0x596   : > { %v6559_v15 = vpop.f32.mrb[138].mxu1  ;;  %11619 = vmatpush3.xpose.msk.msra.mxu0 %vm1604_vm2, %v6165_v60 }
 0x597   : > { %v13491_v10 = vpop.f32.mrb[130].mxu0  ;;  %v11561_v16 = vpop.f32.mrb[139].mxu1  ;;  %11628 = vmatprep.subr.mxu0 %v12152_v0  ;;  %v6560_v30 = vadd.f32 %v6559_v15, %v12617_v28 }
 0x598   : > { %v11512_v34 = vpop.f32.mrb[131].mxu0 }
 0x599   : > { %11621 = vmatmul.mubr.msk.f32.vlgmr.msra.gmra.mrb[154].mxu0 %vm1604_vm2, %v6160_v31 }
 0x59a   : > { %v6564_v35 = vpop.f32.mrb[140].mxu1  ;;  %11630 = vmatprep.mubr.msk.f32.mxu0 %vm12153_vm0, %v12152_v0 }
 0x59b   : > { %v6565_v36 = vadd.f32 %v6564_v35, %v12615_v23  ;;  %v6319_v11 = vpop.f32.mrb[132].mxu0  ;;  %v11564_v20 = vpop.f32.mrb[141].mxu1 }
 0x59c   : > { %v11528_v18 = vpop.f32.mrb[133].mxu0  ;;  %v6320_v45 = vadd.f32 %v6319_v11, %v12617_v28 }
 0x59d   : > { %11644 = vmatpush3.xpose.msk.msra.mxu1 %vm1604_vm2, %v6565_v36 }
 0x59e   : > { %v13500_v57 = vpop.f32.mrb[142].mxu1  ;;  %11653 = vmatprep.subr.mxu1 %v12152_v0 }
 0x59f   : > { %v6324_v12 = vpop.f32.mrb[134].mxu0  ;;  %v11567_v40 = vpop.f32.mrb[143].mxu1 }
 0x5a0   : > { %v6325_v49 = vadd.f32 %v6324_v12, %v12615_v23  ;;  %v11531_v17 = vpop.f32.mrb[135].mxu0  ;;  %11646 = vmatmul.mubr.msk.f32.vlgmr.msra.gmra.mrb[158].mxu1 %vm1604_vm2, %v6560_v30 }
 0x5a1   : > { %11654 = vmatpush3.msra.mxu1 %v5450_v37  ;;  %11655 = vmatprep.mubr.msk.f32.mxu1 %vm12153_vm0, %v12152_v0 }
 0x5a2   : > { %11629 = vmatpush3.xpose.msk.msra.mxu0 %vm1604_vm2, %v6325_v49  ;;  %11663 = vmatprep.subr.mxu1 %v12152_v0 }
 0x5a3   : > { %v13512_v47 = vpop.f32.mrb[136].mxu0  ;;  %11638 = vmatprep.subr.mxu0 %v12152_v0 }
 0x5a4   : > { %v11534_v2 = vpop.f32.mrb[137].mxu0 }
 0x5a5   : > { %11631 = vmatmul.mubr.msk.f32.vlgmr.msra.gmra.mrb[156].mxu0 %vm1604_vm2, %v6320_v45 }
 0x5a6   : > { %11640 = vmatprep.mubr.msk.f32.mxu0 %vm12153_vm0, %v12152_v0 }
 0x5a7   : > { %v6479_v6 = vpop.f32.mrb[138].mxu0 }
 0x5a8   : > { %v11550_v46 = vpop.f32.mrb[139].mxu0  ;;  %v6480_v39 = vadd.f32 %v6479_v6, %v12617_v28 }
 0x5ab   : > { %v6484_v55 = vpop.f32.mrb[140].mxu0 }
 0x5ac   : > { %v6485_v22 = vadd.f32 %v6484_v55, %v12615_v23  ;;  %v11553_v24 = vpop.f32.mrb[141].mxu0 }
 0x5ae   : > { %11639 = vmatpush3.xpose.msk.msra.mxu0 %vm1604_vm2, %v6485_v22 }
 0x5af   : > { %v13521_v62 = vpop.f32.mrb[142].mxu0  ;;  %11648 = vmatprep.subr.mxu0 %v12152_v0 }
 0x5b0   : > { %v11556_v43 = vpop.f32.mrb[143].mxu0 }
 0x5b1   : > { %11641 = vmatmul.mubr.msk.f32.vlgmr.msra.gmra.mrb[158].mxu0 %vm1604_vm2, %v6480_v39 }
 0x5b2   : > { %11649 = vmatpush3.msra.mxu0 %v5370_v42  ;;  %11650 = vmatprep.mubr.msk.f32.mxu0 %vm12153_vm0, %v12152_v0 }
 0x5b3   : > { %11658 = vmatprep.subr.mxu0 %v12152_v0 }
 0x61f   : > { %v13530_v23 = vpop.f32.mrb[144].mxu1 }
 0x620   : > { %v11577_v50 = vpop.f32.mrb[145].mxu1  ;;  %v7792_v26 = vsel %vm314_vm1, %v13530_v23, -inf }
 0x62b   : > { %v13532_v28 = vpop.f32.mrb[146].mxu1 }
 0x62c   : > { %v11587_v63 = vpop.f32.mrb[147].mxu1  ;;  %v7798_v11 = vsel %vm314_vm1, %v13532_v28, -inf }
 0x630   : > { %v6645_v60 = vpop.f32.mrb[144].mxu0 }
 0x631   : > { %v11572_v61 = vpop.f32.mrb[145].mxu0  ;;  %v7789_v15 = vsel %vm314_vm1, %v6645_v60, -inf }
 0x632   : > { %7790 = vmax.xlane.f32.xlu0 %v7789_v15 }
 0x636   : > { %7793 = vmax.xlane.f32.xlu0 %v7792_v26 }
 0x637   : > { %v13537_v31 = vpop.f32.mrb[148].mxu1 }
 0x638   : > { %v11597_v16 = vpop.f32.mrb[149].mxu1  ;;  %v7804_v40 = vsel %vm314_vm1, %v13537_v31, -inf }
 0x63c   : > { %v13539_v34 = vpop.f32.mrb[146].mxu0 }
 0x63d   : > { %v11582_v35 = vpop.f32.mrb[147].mxu0  ;;  %v7795_v36 = vsel %vm314_vm1, %v13539_v34, -inf }
 0x63e   : > { %7796 = vmax.xlane.f32.xlu0 %v7795_v36 }
 0x642   : > { %7799 = vmax.xlane.f32.xlu0 %v7798_v11 }
 0x643   : > { %v13545_v20 = vpop.f32.mrb[150].mxu1 }
 0x644   : > { %v11607_v18 = vpop.f32.mrb[151].mxu1  ;;  %v7810_v46 = vsel %vm314_vm1, %v13545_v20, -inf }
 0x648   : > { %v13547_v30 = vpop.f32.mrb[148].mxu0 }
 0x649   : > { %v11592_v37 = vpop.f32.mrb[149].mxu0  ;;  %v7801_v12 = vsel %vm314_vm1, %v13547_v30, -inf }
 0x64a   : > { %7802 = vmax.xlane.f32.xlu0 %v7801_v12 }
 0x64e   : > { %7805 = vmax.xlane.f32.xlu0 %v7804_v40 }
 0x64f   : > { %v13553_v49 = vpop.f32.mrb[152].mxu1 }
 0x650   : > { %v11617_v17 = vpop.f32.mrb[153].mxu1  ;;  %v7816_v24 = vsel %vm314_vm1, %v13553_v49, -inf }
 0x654   : > { %v13555_v45 = vpop.f32.mrb[150].mxu0 }
 0x655   : > { %v11602_v2 = vpop.f32.mrb[151].mxu0  ;;  %v7807_v6 = vsel %vm314_vm1, %v13555_v45, -inf }
 0x656   : > { %7808 = vmax.xlane.f32.xlu0 %v7807_v6 }
 0x65a   : > { %7811 = vmax.xlane.f32.xlu0 %v7810_v46 }
 0x65b   : > { %v13561_v55 = vpop.f32.mrb[154].mxu1 }
 0x65c   : > { %v11627_v22 = vpop.f32.mrb[155].mxu1  ;;  %v7822_v43 = vsel %vm314_vm1, %v13561_v55, -inf }
 0x65e   : > { %7817 = vmax.xlane.f32.xlu0 %v7816_v24 }
 0x660   : > { %v13565_v39 = vpop.f32.mrb[152].mxu0 }
 0x661   : > { %v11612_v42 = vpop.f32.mrb[153].mxu0  ;;  %v7813_v50 = vsel %vm314_vm1, %v13565_v39, -inf }
 0x662   : > { %7823 = vmax.xlane.f32.xlu0 %v7822_v43  ;;  %7814 = vmax.xlane.f32.xlu1 %v7813_v50 }
 0x667   : > { %v13571_v63 = vpop.f32.mrb[156].mxu1 }
 0x668   : > { %v11637_v61 = vpop.f32.mrb[157].mxu1  ;;  %v7828_v15 = vsel %vm314_vm1, %v13571_v63, -inf }
 0x669   : > { %7829 = vmax.xlane.f32.xlu0 %v7828_v15 }
 0x66c   : > { %v13575_v26 = vpop.f32.mrb[154].mxu0 }
 0x66d   : > { %v11622_v16 = vpop.f32.mrb[155].mxu0  ;;  %v7819_v35 = vsel %vm314_vm1, %v13575_v26, -inf }
 0x66e   : > { %7820 = vmax.xlane.f32.xlu1 %v7819_v35 }
 0x673   : > { %v13579_v36 = vpop.f32.mrb[158].mxu1 }
 0x674   : > { %v11647_v11 = vpop.f32.mrb[159].mxu1  ;;  %v7834_v18 = vsel %vm314_vm1, %v13579_v36, -inf }
 0x675   : > { %7835 = vmax.xlane.f32.xlu0 %v7834_v18 }
 0x678   : > { %v13583_v37 = vpop.f32.mrb[156].mxu0 }
 0x679   : > { %v11632_v12 = vpop.f32.mrb[157].mxu0  ;;  %v7825_v40 = vsel %vm314_vm1, %v13583_v37, -inf }
 0x67a   : > { %7826 = vmax.xlane.f32.xlu1 %v7825_v40 }
 0x684   : > { %v13587_v17 = vpop.f32.mrb[158].mxu0 }
 0x685   : > { %v11642_v2 = vpop.f32.mrb[159].mxu0  ;;  %v7831_v6 = vsel %vm314_vm1, %v13587_v17, -inf }
 0x686   : > { %7832 = vmax.xlane.f32.xlu1 %v7831_v6 }
 0x6bf   : > { %v7791_v46 = vpop.xlane.xlu0 %7790 }
 0x6c0   : > { %v7837_v22 = vsub.f32 %v6645_v60, %v7791_v46 }
 0x6c2   : > { %v7853_v24 = vmul.f32 1.442695, %v7837_v22 }
 0x6c3   : > { %v7794_v42 = vpop.xlane.xlu0 %7793 }
 0x6c4   : > { %11932 = vpow2.f32 %v7853_v24  ;;  %v7838_v43 = vsub.f32 %v13530_v23, %v7794_v42 }
 0x6c6   : > { %v7855_v50 = vmul.f32 1.442695, %v7838_v43 }
 0x6c8   : > { %11934 = vpow2.f32 %v7855_v50 }
 0x6cb   : > { %v7797_v61 = vpop.xlane.xlu0 %7796 }
 0x6cc   : > { %v7839_v15 = vsub.f32 %v13539_v34, %v7797_v61 }
 0x6ce   : > { %v13593_v16 = vpop.eup %11932  ;;  %v7857_v35 = vmul.f32 1.442695, %v7839_v15 }
 0x6cf   : > { %v7800_v11 = vpop.xlane.xlu0 %7799  ;;  %v7885_v18 = vsel %vm314_vm1, %v13593_v16, 0.0 }
 0x6d0   : > { %11936 = vpow2.f32 %v7857_v35  ;;  %v7840_v60 = vsub.f32 %v13532_v28, %v7800_v11  ;;  %7886 = vadd.xlane.f32.xlu1 %v7885_v18 }
 0x6d2   : > { %v13598_v12 = vpop.eup %11934  ;;  %v7859_v40 = vmul.f32 1.442695, %v7840_v60 }
 0x6d3   : > { %v7888_v23 = vsel %vm314_vm1, %v13598_v12, 0.0 }
 0x6d4   : > { %11938 = vpow2.f32 %v7859_v40  ;;  %7889 = vadd.xlane.f32.xlu0 %v7888_v23 }
 0x6d7   : > { %v7803_v34 = vpop.xlane.xlu0 %7802 }
 0x6d8   : > { %v7841_v2 = vsub.f32 %v13547_v30, %v7803_v34 }
 0x6da   : > { %v13603_v6 = vpop.eup %11936  ;;  %v7861_v46 = vmul.f32 1.442695, %v7841_v2 }
 0x6db   : > { %v7806_v22 = vpop.xlane.xlu0 %7805  ;;  %v7891_v24 = vsel %vm314_vm1, %v13603_v6, 0.0 }
 0x6dc   : > { %11940 = vpow2.f32 %v7861_v46  ;;  %v7842_v28 = vsub.f32 %v13537_v31, %v7806_v22  ;;  %7892 = vadd.xlane.f32.xlu1 %v7891_v24 }
 0x6de   : > { %v13608_v42 = vpop.eup %11938  ;;  %v7863_v43 = vmul.f32 1.442695, %v7842_v28 }
 0x6df   : > { %v7894_v50 = vsel %vm314_vm1, %v13608_v42, 0.0 }
 0x6e0   : > { %11942 = vpow2.f32 %v7863_v43  ;;  %7895 = vadd.xlane.f32.xlu0 %v7894_v50 }
 0x6e3   : > { %v7809_v30 = vpop.xlane.xlu0 %7808 }
 0x6e4   : > { %v7843_v61 = vsub.f32 %v13555_v45, %v7809_v30 }
 0x6e6   : > { %v13613_v15 = vpop.eup %11940  ;;  %v7865_v35 = vmul.f32 1.442695, %v7843_v61 }
 0x6e7   : > { %v7812_v11 = vpop.xlane.xlu0 %7811  ;;  %v7897_v18 = vsel %vm314_vm1, %v13613_v15, 0.0 }
 0x6e8   : > { %11944 = vpow2.f32 %v7865_v35  ;;  %v7844_v31 = vsub.f32 %v13545_v20, %v7812_v11  ;;  %7898 = vadd.xlane.f32.xlu1 %v7897_v18 }
 0x6ea   : > { %v13618_v60 = vpop.eup %11942  ;;  %v7867_v40 = vmul.f32 1.442695, %v7844_v31 }
 0x6eb   : > { %v7818_v23 = vpop.xlane.xlu0 %7817  ;;  %v7900_v34 = vsel %vm314_vm1, %v13618_v60, 0.0 }
 0x6ec   : > { %11946 = vpow2.f32 %v7867_v40  ;;  %v7846_v45 = vsub.f32 %v13553_v49, %v7818_v23  ;;  %7901 = vadd.xlane.f32.xlu0 %v7900_v34 }
 0x6ee   : > { %v7871_v2 = vmul.f32 1.442695, %v7846_v45 }
 0x6ef   : > { %v7824_v46 = vpop.xlane.xlu0 %7823  ;;  %v7815_v22 = vpop.xlane.xlu1 %7814 }
 0x6f0   : > { %11948 = vpow2.f32 %v7871_v2  ;;  %v7848_v24 = vsub.f32 %v13561_v55, %v7824_v46  ;;  %v7845_v20 = vsub.f32 %v13565_v39, %v7815_v22 }
 0x6f2   : > { %v13625_v28 = vpop.eup %11944  ;;  %v7875_v43 = vmul.f32 1.442695, %v7848_v24  ;;  %v7869_v50 = vmul.f32 1.442695, %v7845_v20 }
 0x6f3   : > { %v7903_v30 = vsel %vm314_vm1, %v13625_v28, 0.0 }
 0x6f4   : > { %11950 = vpow2.f32 %v7875_v43  ;;  %7904 = vadd.xlane.f32.xlu1 %v7903_v30 }
 0x6f5   : > { %11952 = vpow2.f32 %v7869_v50 }
 0x6f6   : > { %v13629_v49 = vpop.eup %11946  ;;  %v7830_v61 = vpop.xlane.xlu0 %7829 }
 0x6f7   : > { %v7850_v35 = vsub.f32 %v13571_v63, %v7830_v61  ;;  %v7906_v55 = vsel %vm314_vm1, %v13629_v49, 0.0 }
 0x6f8   : > { %7907 = vadd.xlane.f32.xlu0 %v7906_v55 }
 0x6f9   : > { %v7879_v39 = vmul.f32 1.442695, %v7850_v35 }
 0x6fa   : > { %v13634_v11 = vpop.eup %11948 }
 0x6fb   : > { %11954 = vpow2.f32 %v7879_v39  ;;  %v7821_v18 = vpop.xlane.xlu1 %7820  ;;  %v7912_v31 = vsel %vm314_vm1, %v13634_v11, 0.0 }
 0x6fc   : > { %v7847_v40 = vsub.f32 %v13575_v26, %v7821_v18  ;;  %7913 = vadd.xlane.f32.xlu0 %v7912_v31 }
 0x6fe   : > { %v13639_v23 = vpop.eup %11950  ;;  %v7873_v34 = vmul.f32 1.442695, %v7847_v40 }
 0x6ff   : > { %v13641_v45 = vpop.eup %11952  ;;  %v7918_v63 = vsel %vm314_vm1, %v13639_v23, 0.0 }
 0x700   : > { %11956 = vpow2.f32 %v7873_v34  ;;  %7919 = vadd.xlane.f32.xlu0 %v7918_v63  ;;  %v7909_v2 = vsel %vm314_vm1, %v13641_v45, 0.0 }
 0x701   : > { %7910 = vadd.xlane.f32.xlu1 %v7909_v2  ;;  %v298_v2 = vld [vmem:[%s14013_s3 + $0x18] sm:$0xff] }
 0x702   : > { %v7836_v46 = vpop.xlane.xlu0 %7835 }
 0x703   : > { %v7852_v22 = vsub.f32 %v13579_v36, %v7836_v46 }
 0x705   : > { %v13648_v24 = vpop.eup %11954  ;;  %v7883_v26 = vmul.f32 1.442695, %v7852_v22 }
 0x706   : > { %v7924_v20 = vsel %vm314_vm1, %v13648_v24, 0.0 }
 0x707   : > { %11958 = vpow2.f32 %v7883_v26  ;;  %7925 = vadd.xlane.f32.xlu0 %v7924_v20  ;;  %v7827_v43 = vpop.xlane.xlu1 %7826 }
 0x708   : > { %v7849_v50 = vsub.f32 %v13583_v37, %v7827_v43  ;;  %v5530_v43 = vadd.f32 %v13419_v38, %v12910_v19 }
 0x70a   : > { %v13653_v30 = vpop.eup %11956  ;;  %v7877_v61 = vmul.f32 1.442695, %v7849_v50 }
 0x70b   : > { %v7915_v35 = vsel %vm314_vm1, %v13653_v30, 0.0 }
 0x70c   : > { %11960 = vpow2.f32 %v7877_v61  ;;  %7916 = vadd.xlane.f32.xlu1 %v7915_v35 }
 0x711   : > { %v13657_v36 = vpop.eup %11958 }
 0x712   : > { %v7930_v55 = vsel %vm314_vm1, %v13657_v36, 0.0 }
 0x713   : > { %7931 = vadd.xlane.f32.xlu0 %v7930_v55  ;;  %v7833_v39 = vpop.xlane.xlu1 %7832 }
 0x714   : > { %v7851_v18 = vsub.f32 %v13587_v17, %v7833_v39 }
 0x716   : > { %v13662_v31 = vpop.eup %11960  ;;  %v7881_v37 = vmul.f32 1.442695, %v7851_v18 }
 0x717   : > { %v7921_v40 = vsel %vm314_vm1, %v13662_v31, 0.0 }
 0x718   : > { %11962 = vpow2.f32 %v7881_v37  ;;  %7922 = vadd.xlane.f32.xlu1 %v7921_v40 }
 0x722   : > { %v13666_v34 = vpop.eup %11962 }
 0x723   : > { %v7927_v63 = vsel %vm314_vm1, %v13666_v34, 0.0 }
 0x724   : > { %7928 = vadd.xlane.f32.xlu1 %v7927_v63 }
 0x735   : > { %4167 = vperm.xlu1 %11867, %v298_v2  }
 0x75d   : > { %v7887_v17 = vpop.xlane.xlu1 %7886 }
 0x75e   : > { %11964 = vrcp.f32 %v7887_v17 }
 0x761   : > { %v7890_v46 = vpop.xlane.xlu0 %7889 }
 0x762   : > { %11966 = vrcp.f32 %v7890_v46 }
 0x768   : > { %v11965_v22 = vpop.eup %11964 }
 0x769   : > { %v7934_v26 = vmul.f32 %v11965_v22, %v13593_v16  ;;  %v7893_v20 = vpop.xlane.xlu1 %7892  ;;  %v5610_v16 = vadd.f32 %v13392_v59, %v12910_v19 }
 0x76a   : > { %11968 = vrcp.f32 %v7893_v20 }
 0x76b   : > { %11651 = vmatmul.mubr.msk.f32.vlgmr.msra.gmra.mrb[160].mxu0 %vm314_vm1, %v7934_v26  ;;  %v6010_v26 = vadd.f32 %v13473_v32, %v12910_v19 }
 0x76c   : > { %v11967_v50 = vpop.eup %11966  ;;  %11659 = vmatpush3.msra.mxu0 %v5530_v43  ;;  %11660 = vmatprep.mubr.msk.f32.mxu0 %vm12153_vm0, %v12152_v0 }
 0x76d   : > { %v7936_v61 = vmul.f32 %v11967_v50, %v13598_v12  ;;  %v7896_v35 = vpop.xlane.xlu0 %7895  ;;  %11668 = vmatprep.subr.mxu0 %v12152_v0  ;;  %v5690_v12 = vadd.f32 %v13437_v52, %v12910_v19 }
 0x76e   : > { %11970 = vrcp.f32 %v7896_v35 }
 0x76f   : > { %11656 = vmatmul.mubr.msk.f32.vlgmr.msra.gmra.mrb[160].mxu1 %vm314_vm1, %v7936_v61 }
 0x770   : > { %11664 = vmatpush3.msra.mxu1 %v5610_v16  ;;  %11665 = vmatprep.mubr.msk.f32.mxu1 %vm12153_vm0, %v12152_v0 }
 0x771   : > { %11673 = vmatprep.subr.mxu1 %v12152_v0 }
 0x774   : > { %v11969_v38 = vpop.eup %11968 }
 0x775   : > { %v7938_v55 = vmul.f32 %v11969_v38, %v13603_v6  ;;  %v7899_v39 = vpop.xlane.xlu1 %7898  ;;  %v5770_v6 = vadd.f32 %v13410_v56, %v12910_v19 }
 0x776   : > { %11972 = vrcp.f32 %v7899_v39 }
 0x777   : > { %11661 = vmatmul.mubr.msk.f32.vlgmr.msra.gmra.mrb[162].mxu0 %vm314_vm1, %v7938_v55 }
 0x778   : > { %v11971_v59 = vpop.eup %11970  ;;  %11669 = vmatpush3.msra.mxu0 %v5690_v12  ;;  %11670 = vmatprep.mubr.msk.f32.mxu0 %vm12153_vm0, %v12152_v0 }
 0x779   : > { %v7940_v18 = vmul.f32 %v11971_v59, %v13608_v42  ;;  %v7902_v37 = vpop.xlane.xlu0 %7901  ;;  %11678 = vmatprep.subr.mxu0 %v12152_v0  ;;  %v5850_v42 = vadd.f32 %v13455_v9, %v12910_v19 }
 0x77a   : > { %11974 = vrcp.f32 %v7902_v37 }
 0x77b   : > { %11666 = vmatmul.mubr.msk.f32.vlgmr.msra.gmra.mrb[162].mxu1 %vm314_vm1, %v7940_v18 }
 0x77c   : > { %11674 = vmatpush3.msra.mxu1 %v5770_v6  ;;  %11675 = vmatprep.mubr.msk.f32.mxu1 %vm12153_vm0, %v12152_v0  ;;  %v6490_v6 = vadd.f32 %v13521_v62, %v12910_v19 }
 0x77d   : > { %11683 = vmatprep.subr.mxu1 %v12152_v0 }
 0x780   : > { %v11973_v52 = vpop.eup %11972 }
 0x781   : > { %v7942_v40 = vmul.f32 %v11973_v52, %v13613_v15  ;;  %v7905_v63 = vpop.xlane.xlu1 %7904  ;;  %v5930_v15 = vadd.f32 %v13428_v7, %v12910_v19 }
 0x782   : > { %11976 = vrcp.f32 %v7905_v63 }
 0x783   : > { %11671 = vmatmul.mubr.msk.f32.vlgmr.msra.gmra.mrb[164].mxu0 %vm314_vm1, %v7942_v40 }
 0x784   : > { %v11975_v56 = vpop.eup %11974  ;;  %11679 = vmatpush3.msra.mxu0 %v5850_v42  ;;  %11680 = vmatprep.mubr.msk.f32.mxu0 %vm12153_vm0, %v12152_v0 }
 0x785   : > { %v7944_v2 = vmul.f32 %v11975_v56, %v13618_v60  ;;  %v7908_v17 = vpop.xlane.xlu0 %7907  ;;  %11688 = vmatprep.subr.mxu0 %v12152_v0 }
 0x786   : > { %11978 = vrcp.f32 %v7908_v17 }
 0x787   : > { %11676 = vmatmul.mubr.msk.f32.vlgmr.msra.gmra.mrb[164].mxu1 %vm314_vm1, %v7944_v2 }
 0x788   : > { %11684 = vmatpush3.msra.mxu1 %v5930_v15  ;;  %11685 = vmatprep.mubr.msk.f32.mxu1 %vm12153_vm0, %v12152_v0 }
 0x789   : > { %v7914_v9 = vpop.xlane.xlu0 %7913  ;;  %11693 = vmatprep.subr.mxu1 %v12152_v0 }
 0x78a   : > { %11980 = vrcp.f32 %v7914_v9 }
 0x78c   : > { %v11977_v46 = vpop.eup %11976 }
 0x78d   : > { %v7946_v60 = vmul.f32 %v11977_v46, %v13625_v28  ;;  %v7920_v22 = vpop.xlane.xlu0 %7919  ;;  %v6090_v28 = vadd.f32 %v13446_v1, %v12910_v19 }
 0x78e   : > { %11982 = vrcp.f32 %v7920_v22  ;;  %v7911_v7 = vpop.xlane.xlu1 %7910 }
 0x78f   : > { %11984 = vrcp.f32 %v7911_v7  ;;  %11681 = vmatmul.mubr.msk.f32.vlgmr.msra.gmra.mrb[166].mxu0 %vm314_vm1, %v7946_v60 }
 0x790   : > { %v11979_v20 = vpop.eup %11978  ;;  %11689 = vmatpush3.msra.mxu0 %v6010_v26  ;;  %11690 = vmatprep.mubr.msk.f32.mxu0 %vm12153_vm0, %v12152_v0 }
 0x791   : > { %v7948_v43 = vmul.f32 %v11979_v20, %v13629_v49  ;;  %11698 = vmatprep.subr.mxu0 %v12152_v0  ;;  %v6250_v49 = vadd.f32 %v13464_v53, %v12910_v19  ;;  %v6170_v53 = vadd.f32 %v13491_v10, %v12910_v19 }
 0x793   : > { %11686 = vmatmul.mubr.msk.f32.vlgmr.msra.gmra.mrb[166].mxu1 %vm314_vm1, %v7948_v43 }
 0x794   : > { %v11981_v32 = vpop.eup %11980  ;;  %11694 = vmatpush3.msra.mxu1 %v6090_v28  ;;  %v7926_v50 = vpop.xlane.xlu0 %7925  ;;  %11695 = vmatprep.mubr.msk.f32.mxu1 %vm12153_vm0, %v12152_v0 }
 0x795   : > { %v7952_v61 = vmul.f32 %v11981_v32, %v13634_v11  ;;  %11986 = vrcp.f32 %v7926_v50  ;;  %11703 = vmatprep.subr.mxu1 %v12152_v0  ;;  %v6410_v11 = vadd.f32 %v13482_v41, %v12910_v19 }
 0x797   : > { %11696 = vmatmul.mubr.msk.f32.vlgmr.msra.gmra.mrb[168].mxu1 %vm314_vm1, %v7952_v61 }
 0x798   : > { %v11983_v35 = vpop.eup %11982  ;;  %11704 = vmatpush3.msra.mxu1 %v6250_v49  ;;  %11705 = vmatprep.mubr.msk.f32.mxu1 %vm12153_vm0, %v12152_v0 }
 0x799   : > { %v11985_v1 = vpop.eup %11984  ;;  %v7956_v16 = vmul.f32 %v11983_v35, %v13639_v23  ;;  %v7917_v38 = vpop.xlane.xlu1 %7916  ;;  %11713 = vmatprep.subr.mxu1 %v12152_v0 }
 0x79a   : > { %v7950_v55 = vmul.f32 %v11985_v1, %v13641_v45  ;;  %11988 = vrcp.f32 %v7917_v38  ;;  %v6570_v45 = vadd.f32 %v13500_v57, %v12910_v19 }
 0x79b   : > { %11706 = vmatmul.mubr.msk.f32.vlgmr.msra.gmra.mrb[170].mxu1 %vm314_vm1, %v7956_v16 }
 0x79c   : > { %11691 = vmatmul.mubr.msk.f32.vlgmr.msra.gmra.mrb[168].mxu0 %vm314_vm1, %v7950_v55  ;;  %11714 = vmatpush3.msra.mxu1 %v6410_v11 }
 0x79d   : > { %11699 = vmatpush3.msra.mxu0 %v6170_v53  ;;  %11715 = vmatprep.mubr.msk.f32.mxu1 %vm12153_vm0, %v12152_v0 }
 0x79e   : > { %11723 = vmatprep.subr.mxu1 %v12152_v0  ;;  %11700 = vmatprep.mubr.msk.f32.mxu0 %vm12153_vm0, %v12152_v0 }
 0x79f   : > { %v11987_v41 = vpop.eup %11986  ;;  %11708 = vmatprep.subr.mxu0 %v12152_v0 }
 0x7a0   : > { %v7960_v23 = vmul.f32 %v11987_v41, %v13648_v24  ;;  %v7932_v10 = vpop.xlane.xlu0 %7931  ;;  %v6330_v24 = vadd.f32 %v13512_v47, %v12910_v19  ;;  %v13782_v19 = vld [vmem:[%s14012_s2 + $0x18] sm:$0xff] }
 0x7a1   : > { %11990 = vrcp.f32 %v7932_v10 }
 0x7a2   : > { %11716 = vmatmul.mubr.msk.f32.vlgmr.msra.gmra.mrb[172].mxu1 %vm314_vm1, %v7960_v23 }
 0x7a3   : > { %11724 = vmatpush3.msra.mxu1 %v6570_v45  ;;  %11725 = vmatprep.mubr.msk.f32.mxu1 %vm12153_vm0, %v12152_v0 }
 0x7a4   : > { %v11989_v39 = vpop.eup %11988  ;;  %11733 = vmatprep.subr.mxu1 %v12152_v0 }
 0x7a5   : > { %v7954_v12 = vmul.f32 %v11989_v39, %v13653_v30  ;;  %v7923_v59 = vpop.xlane.xlu1 %7922 }
 0x7a6   : > { %11992 = vrcp.f32 %v7923_v59 }
 0x7a7   : > { %11701 = vmatmul.mubr.msk.f32.vlgmr.msra.gmra.mrb[170].mxu0 %vm314_vm1, %v7954_v12 }
 0x7a8   : > { %11709 = vmatpush3.msra.mxu0 %v6330_v24  ;;  %11710 = vmatprep.mubr.msk.f32.mxu0 %vm12153_vm0, %v12152_v0 }
 0x7a9   : > { %11718 = vmatprep.subr.mxu0 %v12152_v0 }
 0x7ab   : > { %v11991_v57 = vpop.eup %11990 }
 0x7ac   : > { %v7964_v18 = vmul.f32 %v11991_v57, %v13657_v36 }
 0x7ae   : > { %11726 = vmatmul.mubr.msk.f32.vlgmr.msra.gmra.mrb[174].mxu1 %vm314_vm1, %v7964_v18 }
 0x7af   : > { %11735 = vmatprep.mubr.msk.f32.mxu1 %vm12153_vm0, %v12152_v0 }
 0x7b0   : > { %v11993_v30 = vpop.eup %11992 }
 0x7b1   : > { %v7958_v47 = vmul.f32 %v11993_v30, %v13662_v31  ;;  %v7929_v37 = vpop.xlane.xlu1 %7928 }
 0x7b2   : > { %11994 = vrcp.f32 %v7929_v37 }
 0x7b3   : > { %11711 = vmatmul.mubr.msk.f32.vlgmr.msra.gmra.mrb[172].mxu0 %vm314_vm1, %v7958_v47 }
 0x7b4   : > { %11719 = vmatpush3.msra.mxu0 %v6490_v6  ;;  %11720 = vmatprep.mubr.msk.f32.mxu0 %vm12153_vm0, %v12152_v0  ;;  %v12001_v6 = vld [vmem:[%s12350_s23 + $0x8] sm:$0xff] }
 0x7b5   : > { %11728 = vmatprep.subr.mxu0 %v12152_v0  ;;  %v13858_v10 = vpop.permute.xlu1 %4167 }
 0x7b6   : > { %v4240_v39 = vadd.f32 %v13348_v4, %v13858_v10  ;;  %v4310_v30 = vadd.f32 %v13350_v8, %v13858_v10  ;;  %v4380_v8 = vadd.f32 %v13354_v48, %v13858_v10 }
 0x7bc   : > { %v11995_v36 = vpop.eup %11994 }
 0x7bd   : > { %v7962_v52 = vmul.f32 %v11995_v36, %v13666_v34 }
 0x7bf   : > { %11721 = vmatmul.mubr.msk.f32.vlgmr.msra.gmra.mrb[174].mxu0 %vm314_vm1, %v7962_v52 }
 0x7c0   : > { %11730 = vmatprep.mubr.msk.f32.mxu0 %vm12153_vm0, %v12152_v0 }
 0x83e   : > { %v8034_v31 = vpop.f32.mrb[160].mxu0 }
 0x83f   : > { %v11652_v40 = vpop.f32.mrb[161].mxu0  ;;  %11729 = vmatpush3.msra.mxu0 %v8034_v31 }
 0x840   : > { %11731 = vmatmul.mubr.msk.f32.vlgmr.msra.gmra.mrb[176].mxu0 %vm314_vm1, %v13782_v19  ;;  %11738 = vmatprep.subr.mxu0 %v12152_v0 }
 0x841   : > { %11740 = vmatprep.mubr.msk.f32.mxu0 %vm12153_vm0, %v12152_v0 }
 0x842   : > { %v8107_v62 = vpop.f32.mrb[160].mxu1 }
 0x843   : > { %v11657_v34 = vpop.f32.mrb[161].mxu1  ;;  %11734 = vmatpush3.msra.mxu1 %v8107_v62 }
 0x844   : > { %11736 = vmatmul.mubr.msk.f32.vlgmr.msra.gmra.mrb[176].mxu1 %vm314_vm1, %v13782_v19  ;;  %11743 = vmatprep.subr.mxu1 %v12152_v0  ;;  %v12002_v34 = vld [vmem:[%s12350_s23 + $0x10] sm:$0xff] }
 0x845   : > { %11745 = vmatprep.mubr.msk.f32.mxu1 %vm12153_vm0, %v12152_v0 }
 0x84a   : > { %v8180_v63 = vpop.f32.mrb[162].mxu0 }
 0x84b   : > { %v11662_v42 = vpop.f32.mrb[163].mxu0  ;;  %11739 = vmatpush3.msra.mxu0 %v8180_v63 }
 0x84c   : > { %11741 = vmatmul.mubr.msk.f32.vlgmr.msra.gmra.mrb[178].mxu0 %vm314_vm1, %v13782_v19  ;;  %11748 = vmatprep.subr.mxu0 %v12152_v0  ;;  %v4450_v42 = vadd.f32 %v13352_v58, %v13858_v10 }
 0x84d   : > { %11750 = vmatprep.mubr.msk.f32.mxu0 %vm12153_vm0, %v12152_v0 }
 0x84e   : > { %v8253_v56 = vpop.f32.mrb[162].mxu1 }
 0x84f   : > { %v11667_v2 = vpop.f32.mrb[163].mxu1  ;;  %11744 = vmatpush3.msra.mxu1 %v8253_v56 }
 0x850   : > { %11746 = vmatmul.mubr.msk.f32.vlgmr.msra.gmra.mrb[178].mxu1 %vm314_vm1, %v13782_v19  ;;  %11753 = vmatprep.subr.mxu1 %v12152_v0 }
 0x851   : > { %11755 = vmatprep.mubr.msk.f32.mxu1 %vm12153_vm0, %v12152_v0 }
 0x856   : > { %v8326_v17 = vpop.f32.mrb[164].mxu0 }
 0x857   : > { %v11672_v15 = vpop.f32.mrb[165].mxu0  ;;  %11749 = vmatpush3.msra.mxu0 %v8326_v17 }
 0x858   : > { %11751 = vmatmul.mubr.msk.f32.vlgmr.msra.gmra.mrb[180].mxu0 %vm314_vm1, %v13782_v19  ;;  %11758 = vmatprep.subr.mxu0 %v12152_v0  ;;  %v12003_v15 = vld [vmem:[%s12350_s23 + $0x18] sm:$0xff] }
 0x859   : > { %11760 = vmatprep.mubr.msk.f32.mxu0 %vm12153_vm0, %v12152_v0 }
 0x85a   : > { %v8399_v9 = vpop.f32.mrb[164].mxu1 }
 0x85b   : > { %v11677_v46 = vpop.f32.mrb[165].mxu1  ;;  %11754 = vmatpush3.msra.mxu1 %v8399_v9 }
 0x85c   : > { %11756 = vmatmul.mubr.msk.f32.vlgmr.msra.gmra.mrb[180].mxu1 %vm314_vm1, %v13782_v19  ;;  %11763 = vmatprep.subr.mxu1 %v12152_v0  ;;  %v4520_v46 = vadd.f32 %v13358_v13, %v13858_v10 }
 0x85d   : > { %11765 = vmatprep.mubr.msk.f32.mxu1 %vm12153_vm0, %v12152_v0 }
 0x862   : > { %v8472_v60 = vpop.f32.mrb[166].mxu0 }
 0x863   : > { %v11682_v22 = vpop.f32.mrb[167].mxu0  ;;  %11759 = vmatpush3.msra.mxu0 %v8472_v60 }
 0x864   : > { %11761 = vmatmul.mubr.msk.f32.vlgmr.msra.gmra.mrb[182].mxu0 %vm314_vm1, %v13782_v19  ;;  %11768 = vmatprep.subr.mxu0 %v12152_v0 }
 0x865   : > { %11770 = vmatprep.mubr.msk.f32.mxu0 %vm12153_vm0, %v12152_v0 }
 0x866   : > { %v8545_v26 = vpop.f32.mrb[166].mxu1 }
 0x867   : > { %v11687_v7 = vpop.f32.mrb[167].mxu1  ;;  %11764 = vmatpush3.msra.mxu1 %v8545_v26 }
 0x868   : > { %11766 = vmatmul.mubr.msk.f32.vlgmr.msra.gmra.mrb[182].mxu1 %vm314_vm1, %v13782_v19  ;;  %11773 = vmatprep.subr.mxu1 %v12152_v0  ;;  %v12004_v7 = vld [vmem:[%s12350_s23 + $0x20] sm:$0xff] }
 0x869   : > { %11775 = vmatprep.mubr.msk.f32.mxu1 %vm12153_vm0, %v12152_v0 }
 0x86a   : > { %v8691_v20 = vpop.f32.mrb[168].mxu1 }
 0x86b   : > { %v11697_v43 = vpop.f32.mrb[169].mxu1  ;;  %11774 = vmatpush3.msra.mxu1 %v8691_v20 }
 0x86c   : > { %11776 = vmatmul.mubr.msk.f32.vlgmr.msra.gmra.mrb[184].mxu1 %vm314_vm1, %v13782_v19  ;;  %11783 = vmatprep.subr.mxu1 %v12152_v0  ;;  %v4590_v43 = vadd.f32 %v13356_v44, %v13858_v10 }
 0x86d   : > { %11785 = vmatprep.mubr.msk.f32.mxu1 %vm12153_vm0, %v12152_v0 }
 0x86e   : > { %v8837_v28 = vpop.f32.mrb[170].mxu1 }
 0x86f   : > { %v8618_v32 = vpop.f32.mrb[168].mxu0  ;;  %v11707_v50 = vpop.f32.mrb[171].mxu1  ;;  %11784 = vmatpush3.msra.mxu1 %v8837_v28 }
 0x870   : > { %v11692_v61 = vpop.f32.mrb[169].mxu0  ;;  %11769 = vmatpush3.msra.mxu0 %v8618_v32  ;;  %11786 = vmatmul.mubr.msk.f32.vlgmr.msra.gmra.mrb[186].mxu1 %vm314_vm1, %v13782_v19 }
 0x871   : > { %11771 = vmatmul.mubr.msk.f32.vlgmr.msra.gmra.mrb[184].mxu0 %vm314_vm1, %v13782_v19  ;;  %11793 = vmatprep.subr.mxu1 %v12152_v0  ;;  %v12005_v61 = vld [vmem:[%s12350_s23 + $0x28] sm:$0xff] }
 0x872   : > { %11795 = vmatprep.mubr.msk.f32.mxu1 %vm12153_vm0, %v12152_v0  ;;  %11778 = vmatprep.subr.mxu0 %v12152_v0 }
 0x873   : > { %11780 = vmatprep.mubr.msk.f32.mxu0 %vm12153_vm0, %v12152_v0 }
 0x875   : > { %v8983_v49 = vpop.f32.mrb[172].mxu1 }
 0x876   : > { %v11717_v35 = vpop.f32.mrb[173].mxu1  ;;  %11794 = vmatpush3.msra.mxu1 %v8983_v49 }
 0x877   : > { %11796 = vmatmul.mubr.msk.f32.vlgmr.msra.gmra.mrb[188].mxu1 %vm314_vm1, %v13782_v19  ;;  %11803 = vmatprep.subr.mxu1 %v12152_v0  ;;  %v4660_v35 = vadd.f32 %v13362_v3, %v13858_v10  ;;  %v12007_v3 = vld [vmem:[%s12350_s23 + $0x38] sm:$0xff] }
 0x878   : > { %11805 = vmatprep.mubr.msk.f32.mxu1 %vm12153_vm0, %v12152_v0 }
 0x87a   : > { %v8764_v1 = vpop.f32.mrb[170].mxu0 }
 0x87b   : > { %v11702_v16 = vpop.f32.mrb[171].mxu0  ;;  %11779 = vmatpush3.msra.mxu0 %v8764_v1 }
 0x87c   : > { %11781 = vmatmul.mubr.msk.f32.vlgmr.msra.gmra.mrb[186].mxu0 %vm314_vm1, %v13782_v19  ;;  %11788 = vmatprep.subr.mxu0 %v12152_v0 }
 0x87d   : > { %11790 = vmatprep.mubr.msk.f32.mxu0 %vm12153_vm0, %v12152_v0 }
 0x881   : > { %v9129_v38 = vpop.f32.mrb[174].mxu1 }
 0x882   : > { %v11727_v11 = vpop.f32.mrb[175].mxu1  ;;  %11804 = vmatpush3.msra.mxu1 %v9129_v38 }
 0x883   : > { %11806 = vmatmul.mubr.msk.f32.vlgmr.msra.gmra.mrb[190].mxu1 %vm314_vm1, %v13782_v19  ;;  %v12006_v11 = vld [vmem:[%s12350_s23 + $0x30] sm:$0xff] }
 0x886   : > { %v8910_v55 = vpop.f32.mrb[172].mxu0 }
 0x887   : > { %v11712_v53 = vpop.f32.mrb[173].mxu0  ;;  %11789 = vmatpush3.msra.mxu0 %v8910_v55 }
 0x888   : > { %11791 = vmatmul.mubr.msk.f32.vlgmr.msra.gmra.mrb[188].mxu0 %vm314_vm1, %v13782_v19  ;;  %11798 = vmatprep.subr.mxu0 %v12152_v0  ;;  %v4730_v53 = vadd.f32 %v13360_v14, %v13858_v10 }
 0x889   : > { %11800 = vmatprep.mubr.msk.f32.mxu0 %vm12153_vm0, %v12152_v0  ;;  %v12000_v0 = vld [vmem:[%s12350_s23] sm:$0xff] }
 0x892   : > { %v9056_v41 = vpop.f32.mrb[174].mxu0 }
 0x893   : > { %v11722_v23 = vpop.f32.mrb[175].mxu0  ;;  %11799 = vmatpush3.msra.mxu0 %v9056_v41 }
 0x894   : > { %11801 = vmatmul.mubr.msk.f32.vlgmr.msra.gmra.mrb[190].mxu0 %vm314_vm1, %v13782_v19 }
 0x913   : > { %v9199_v45 = vpop.f32.mrb[176].mxu0 }
 0x914   : > { %v9200_v12 = vadd.f32 %v9199_v45, %v13858_v10  ;;  %v11732_v59 = vpop.f32.mrb[177].mxu0 }
 0x915   : > { %v4870_v59 = vadd.f32 %v13364_v21, %v13858_v10 }
 0x916   : > { %v10253_v24 = vadd.f32 %v9200_v12, %v4240_v39 }
 0x917   : > { %v9269_v57 = vpop.f32.mrb[176].mxu1 }
 0x918   : > { %v10269_v18 = vadd.f32 %v12000_v0, %v10253_v24  ;;  %v9270_v47 = vadd.f32 %v9269_v57, %v13858_v10  ;;  %v11737_v37 = vpop.f32.mrb[177].mxu1 }
 0x919   : > { %v5010_v37 = vadd.f32 %v13370_v29, %v13858_v10 }
 0x91a   : > { %10285 = vst.msk [vmem:[%s13868_s14] sm:$0xff] %vm1604_vm2, %v10269_v18  ;;  %v10254_v4 = vadd.f32 %v9270_v47, %v4310_v30  ;;  %v12008_v18 = vld [vmem:[%s12350_s23 + $0x48] sm:$0xff] }
 0x91c   : > { %v10270_v36 = vadd.f32 %v12001_v6, %v10254_v4  ;;  %v4800_v6 = vadd.f32 %v13366_v25, %v13858_v10  ;;  %v5150_v25 = vadd.f32 %v13374_v27, %v13858_v10 }
 0x91e   : > { %10286 = vst.msk [vmem:[%s13868_s14 + $0x8] sm:$0xff] %vm1604_vm2, %v10270_v36 }
 0x91f   : > { %v9339_v52 = vpop.f32.mrb[178].mxu0 }
 0x920   : > { %v9340_v31 = vadd.f32 %v9339_v52, %v13858_v10  ;;  %v11742_v40 = vpop.f32.mrb[179].mxu0 }
 0x921   : > { %v12009_v40 = vld [vmem:[%s12350_s23 + $0x58] sm:$0xff] }
 0x922   : > { %v10255_v19 = vadd.f32 %v9340_v31, %v4380_v8 }
 0x923   : > { %v9409_v62 = vpop.f32.mrb[178].mxu1 }
 0x924   : > { %v10271_v63 = vadd.f32 %v12002_v34, %v10255_v19  ;;  %v9410_v56 = vadd.f32 %v9409_v62, %v13858_v10  ;;  %v11747_v2 = vpop.f32.mrb[179].mxu1  ;;  %v12010_v62 = vld [vmem:[%s12350_s23 + $0x40] sm:$0xff] }
 0x925   : > { %v12011_v2 = vld [vmem:[%s12350_s23 + $0x68] sm:$0xff] }
 0x926   : > { %10287 = vst.msk [vmem:[%s13868_s14 + $0x10] sm:$0xff] %vm1604_vm2, %v10271_v63  ;;  %v10256_v17 = vadd.f32 %v9410_v56, %v4450_v42 }
 0x928   : > { %v10272_v48 = vadd.f32 %v12003_v15, %v10256_v17 }
 0x92a   : > { %10288 = vst.msk [vmem:[%s13868_s14 + $0x18] sm:$0xff] %vm1604_vm2, %v10272_v48  ;;  %v4940_v48 = vadd.f32 %v13368_v33, %v13858_v10 }
 0x92b   : > { %v9479_v9 = vpop.f32.mrb[180].mxu0 }
 0x92c   : > { %v9480_v60 = vadd.f32 %v9479_v9, %v13858_v10  ;;  %v11752_v58 = vpop.f32.mrb[181].mxu0 }
 0x92d   : > { %v12012_v58 = vld [vmem:[%s12350_s23 + $0x50] sm:$0xff] }
 0x92e   : > { %v10257_v22 = vadd.f32 %v9480_v60, %v4520_v46 }
 0x92f   : > { %v9549_v26 = vpop.f32.mrb[180].mxu1 }
 0x930   : > { %v10273_v20 = vadd.f32 %v12004_v7, %v10257_v22  ;;  %v9550_v28 = vadd.f32 %v9549_v26, %v13858_v10  ;;  %v11757_v32 = vpop.f32.mrb[181].mxu1  ;;  %v5290_v26 = vadd.f32 %v13376_v54, %v13858_v10 }
 0x932   : > { %10289 = vst.msk [vmem:[%s13868_s14 + $0x20] sm:$0xff] %vm1604_vm2, %v10273_v20  ;;  %v10258_v50 = vadd.f32 %v9550_v28, %v4590_v43  ;;  %v12013_v43 = vld [vmem:[%s12350_s23 + $0x78] sm:$0xff] }
 0x934   : > { %v10274_v13 = vadd.f32 %v12005_v61, %v10258_v50  ;;  %v5080_v50 = vadd.f32 %v13372_v5, %v13858_v10 }
 0x936   : > { %10290 = vst.msk [vmem:[%s13868_s14 + $0x28] sm:$0xff] %vm1604_vm2, %v10274_v13 }
 0x937   : > { %v9619_v49 = vpop.f32.mrb[182].mxu0 }
 0x938   : > { %v9620_v1 = vadd.f32 %v9619_v49, %v13858_v10  ;;  %v11762_v16 = vpop.f32.mrb[183].mxu0  ;;  %v12014_v49 = vld [vmem:[%s12350_s23 + $0x60] sm:$0xff] }
 0x939   : > { %v5220_v16 = vadd.f32 %v13387_v51, %v13858_v10 }
 0x93a   : > { %v10259_v44 = vadd.f32 %v9620_v1, %v4660_v35 }
 0x93b   : > { %v9689_v38 = vpop.f32.mrb[182].mxu1 }
 0x93c   : > { %v10275_v55 = vadd.f32 %v12006_v11, %v10259_v44  ;;  %v9690_v41 = vadd.f32 %v9689_v38, %v13858_v10  ;;  %v11767_v23 = vpop.f32.mrb[183].mxu1  ;;  %v12015_v11 = vld [vmem:[%s12350_s23 + $0x70] sm:$0xff] }
 0x93e   : > { %10291 = vst.msk [vmem:[%s13868_s14 + $0x30] sm:$0xff] %vm1604_vm2, %v10275_v55  ;;  %v10260_v45 = vadd.f32 %v9690_v41, %v4730_v53 }
 0x93f   : > { %v9829_v39 = vpop.f32.mrb[184].mxu1 }
 0x940   : > { %v10276_v12 = vadd.f32 %v12007_v3, %v10260_v45  ;;  %v9830_v24 = vadd.f32 %v9829_v39, %v13858_v10  ;;  %v11777_v57 = vpop.f32.mrb[185].mxu1 }
 0x942   : > { %10292 = vst.msk [vmem:[%s13868_s14 + $0x38] sm:$0xff] %vm1604_vm2, %v10276_v12  ;;  %v10262_v14 = vadd.f32 %v9830_v24, %v4870_v59 }
 0x943   : > { %v9969_v0 = vpop.f32.mrb[186].mxu1 }
 0x944   : > { %v10278_v30 = vadd.f32 %v12008_v18, %v10262_v14  ;;  %v9759_v47 = vpop.f32.mrb[184].mxu0  ;;  %v9970_v4 = vadd.f32 %v9969_v0, %v13858_v10  ;;  %v11787_v21 = vpop.f32.mrb[187].mxu1 }
 0x945   : > { %v9760_v36 = vadd.f32 %v9759_v47, %v13858_v10  ;;  %v11772_v52 = vpop.f32.mrb[185].mxu0 }
 0x946   : > { %10294 = vst.msk [vmem:[%s13868_s14 + $0x48] sm:$0xff] %vm1604_vm2, %v10278_v30  ;;  %v10264_v8 = vadd.f32 %v9970_v4, %v5010_v37 }
 0x947   : > { %v10261_v31 = vadd.f32 %v9760_v36, %v4800_v6 }
 0x948   : > { %v10280_v19 = vadd.f32 %v12009_v40, %v10264_v8 }
 0x949   : > { %v10277_v34 = vadd.f32 %v12010_v62, %v10261_v31 }
 0x94a   : > { %10296 = vst.msk [vmem:[%s13868_s14 + $0x58] sm:$0xff] %vm1604_vm2, %v10280_v19  ;;  %v10109_v29 = vpop.f32.mrb[188].mxu1 }
 0x94b   : > { %10293 = vst.msk [vmem:[%s13868_s14 + $0x40] sm:$0xff] %vm1604_vm2, %v10277_v34  ;;  %v10110_v63 = vadd.f32 %v10109_v29, %v13858_v10  ;;  %v11797_v42 = vpop.f32.mrb[189].mxu1 }
 0x94d   : > { %v10266_v56 = vadd.f32 %v10110_v63, %v5150_v25 }
 0x94f   : > { %v10282_v17 = vadd.f32 %v12011_v2, %v10266_v56  ;;  %v9899_v15 = vpop.f32.mrb[186].mxu0 }
 0x950   : > { %v9900_v9 = vadd.f32 %v9899_v15, %v13858_v10  ;;  %v11782_v46 = vpop.f32.mrb[187].mxu0 }
 0x951   : > { %10298 = vst.msk [vmem:[%s13868_s14 + $0x68] sm:$0xff] %vm1604_vm2, %v10282_v17 }
 0x952   : > { %v10263_v60 = vadd.f32 %v9900_v9, %v4940_v48 }
 0x954   : > { %v10279_v27 = vadd.f32 %v12012_v58, %v10263_v60 }
 0x956   : > { %10295 = vst.msk [vmem:[%s13868_s14 + $0x50] sm:$0xff] %vm1604_vm2, %v10279_v27  ;;  %v10249_v22 = vpop.f32.mrb[190].mxu1 }
 0x957   : > { %v10250_v7 = vadd.f32 %v10249_v22, %v13858_v10  ;;  %v11807_v33 = vpop.f32.mrb[191].mxu1 }
 0x959   : > { %v10268_v20 = vadd.f32 %v10250_v7, %v5290_v26 }
 0x95b   : > { %v10284_v28 = vadd.f32 %v12013_v43, %v10268_v20  ;;  %v10039_v32 = vpop.f32.mrb[188].mxu0 }
 0x95c   : > { %v10040_v61 = vadd.f32 %v10039_v32, %v13858_v10  ;;  %v11792_v13 = vpop.f32.mrb[189].mxu0 }
 0x95d   : > { %10300 = vst.msk [vmem:[%s13868_s14 + $0x78] sm:$0xff] %vm1604_vm2, %v10284_v28 }
 0x95e   : > { %v10265_v54 = vadd.f32 %v10040_v61, %v5080_v50 }
 0x960   : > { %v10281_v35 = vadd.f32 %v12014_v49, %v10265_v54 }
 0x962   : > { %10297 = vst.msk [vmem:[%s13868_s14 + $0x60] sm:$0xff] %vm1604_vm2, %v10281_v35 }
 0x967   : > { %v10179_v1 = vpop.f32.mrb[190].mxu0 }
 0x968   : > { %v10180_v5 = vadd.f32 %v10179_v1, %v13858_v10  ;;  %v11802_v44 = vpop.f32.mrb[191].mxu0 }
 0x96a   : > { %v10267_v38 = vadd.f32 %v10180_v5, %v5220_v16 }
 0x96c   : > { %v10283_v55 = vadd.f32 %v12015_v11, %v10267_v38 }
 0x96e   : > { %10299 = vst.msk [vmem:[%s13868_s14 + $0x70] sm:$0xff] %vm1604_vm2, %v10283_v55 }
 0x96f   : > { %12089 = shalt.err (!%p12086_p11)
}
 0x970   : > { %s12090_s23 = scalar_lea.hbm %s13961_s20, 2048  ;;  %s12094_s5 = scalar_lea.hbm %s14014_s4, 4096 }
 0x971   : > { %p12091_p3 = scmp.ne.s32.totalorder %s13961_s20, %s12090_s23  ;;  %p12095_p2 = scmp.lt.u32.totalorder %s13961_s20, %s14014_s4 }
 0x972   : > { %p12096_p4 = scmp.lt.u32.totalorder %s12094_s5, %s12090_s23  ;;  %p12098_p13 = scmp.lt.u32.totalorder %s12090_s23, %s13961_s20 }
 0x973   : > { %p12092_p8 = pnand %p12091_p3, %p14024_p1 }
 0x974   : > { %p12097_p6 = por %p12096_p4, %p12095_p2 }
 0x975   : > { %p12093_p0 = pneg %p12092_p8 }
 0x976   : > { %p12099_p12 = por %p12098_p13, %p12097_p6 }
 0x978   : > { %p12100_p10 = pnand %p12099_p12, %p12093_p0 }
 0x97a   : > { %12103 = shalt.err (!%p12100_p10)
}
 0x97b   : > { %s12156_s14 = smov 128   ;;  %s12157_s30 = smov 8  }
 0x97c   : > { %11812 = dma.vmem_to_hbm [thread:$0]  (%p14024_p1), %s13963_s11, 2048, %s13961_s20, %s10302_s22, %s12156_s14, %s12156_s14, %s12157_s30  }
 0x97d PF: > { %s10330_s29 = sand.u32 1, %s12134_s15   ;;  %p14025_p5 = scmp.ne.s32.totalorder %s14020_s28, 0 }
 0x97e   : > { %p14026_p7 = scmp.ge.s32.totalorder %s12146_s18, 2  ;;  %s10331_s26 = scalar_lea.sflag [#allocation4], %s10330_s29 }
 0x980   : > { %p11822_p9 = pnand %p14026_p7, %p14025_p5 }
 0x982   : > { %12129 = dma.done.wait (!%p11822_p9), %s10331_s26, 2048  }
 0x983   : > { %12131 = vsyncadd (!%p11822_p9), %s10331_s26, 4294965248  ;;  %p20_p11 = scmp.ge.s32.totalorder %s12208_s21, 4   ;;  %s14027_s15 = smov %s12138_s16 }
 0x984   : > { %s14028_s16 = smov %s12142_s17  ;;  %s14029_s17 = smov %s12220_s24 }
 0x985   : > { %s14030_s18 = smov %s12208_s21  ;;  %22 = sbr.rel (!%p20_p11) target bundleno = 7 (0x7), region = 94 }
 0x98c   :  { %10336 = vsyncpa [#allocation3], 1 }
 0x98d   :  { %10338 = vsyncpa [#allocation3 + $0x1], 1 }
 0x98e   :  { %10339 = vsyncpa [#allocation6], 1 }
 0x98f   :  { %10341 = vsyncpa [#allocation6 + $0x1], 1 }
 0x990   :  { %10342 = vsyncpa [#allocation4], 1 }
 0x991   :  { %10344 = vsyncpa [#allocation4 + $0x1], 1 }

</bundles_post_ra>
